<compile_context>
chip_gen: v7x
topology: tpu7x:2x2x1
jax: 0.10.0
libtpu: 0.0.40
codegen_flags: <defaults>
</compile_context>

<pallas_src>
import functools

import jax
import jax.numpy as jnp
from jax import lax
from jax.experimental import pallas as pl
from jax.experimental.pallas import tpu as pltpu


INPUT_SIZE = 1
HIDDEN_SIZE = 50
NUM_LAYERS = 2          # hard-wired to 2 layers in the kernel below
HP = 128                # per-gate lane-padded width (vreg lane count)


def _lstm_kernel(xp_ref,      # (T, B, 4*HP)  layer-0 preactivations x@Wih0+b0
                 whh0_ref,    # (HP, 4*HP)    layer-0 recurrent weight (padded)
                 w1_ref,      # (2*HP, 4*HP)  fused [Wih1; Whh1] (padded)
                 b1_ref,      # (1, 4*HP)     layer-1 combined bias (padded)
                 wfc_ref,     # (HP, 1)       fc weight (rows padded)
                 bfc_ref,     # (1, 1)
                 out_ref):    # (B, 1)
    T, B, G = xp_ref.shape
    # Gate layout (reordered, each HP lanes wide): [ i | f | o | g ].
    whh0 = whh0_ref[...]
    w1 = w1_ref[...]
    # Hoisted bias broadcast (loop constant; JAX does not CSE broadcast_in_dim).
    b1 = jnp.broadcast_to(b1_ref[...], (B, G))

    def activations(gates, c):
        sig = jax.nn.sigmoid(gates[:, : 3 * HP])      # i|f|o in one wide slab
        i = sig[:, 0 * HP:1 * HP]
        f = sig[:, 1 * HP:2 * HP]
        o = sig[:, 2 * HP:3 * HP]
        g = jnp.tanh(gates[:, 3 * HP:4 * HP])
        c_new = f * c + i * g
        h_new = o * jnp.tanh(c_new)
        return h_new, c_new

    def body(t, carry):
        h0, c0, h1, c1 = carry
        # Layer 0: only the recurrent matmul is on the serial path.
        g0 = xp_ref[t] + jnp.dot(h0, whh0, preferred_element_type=jnp.float32)
        h0, c0 = activations(g0, c0)
        # Layer 1: fused input+recurrent matmul on the lane-aligned concat.
        h_cat = jnp.concatenate([h0, h1], axis=1)            # (B, 2*HP)
        g1 = jnp.dot(h_cat, w1, preferred_element_type=jnp.float32) + b1
        h1, c1 = activations(g1, c1)
        return (h0, c0, h1, c1)

    zeros = jnp.zeros((B, HP), jnp.float32)
    # Fully unrolled (T static & small) for cross-timestep scheduling.
    _, _, h1, _ = lax.fori_loop(0, T, body, (zeros, zeros, zeros, zeros),
                                unroll=True)

    # fc on the last time step's top-layer hidden state (padded lanes are 0).
    out_ref[...] = (jnp.dot(h1, wfc_ref[...], preferred_element_type=jnp.float32)
                    + bfc_ref[...])


def init_params(key, input_size=INPUT_SIZE, hidden_size=HIDDEN_SIZE):
    """Deterministic parameter init (PyTorch-style U(-1/sqrt(H), 1/sqrt(H)))."""
    H = hidden_size
    bound = 1.0 / jnp.sqrt(jnp.float32(H))
    keys = jax.random.split(key, 10)

    def u(k, shape):
        return jax.random.uniform(k, shape, jnp.float32, -bound, bound)

    return {
        # layer 0
        "w_ih0": u(keys[0], (4 * H, input_size)),
        "w_hh0": u(keys[1], (4 * H, H)),
        "b_ih0": u(keys[2], (4 * H,)),
        "b_hh0": u(keys[3], (4 * H,)),
        # layer 1
        "w_ih1": u(keys[4], (4 * H, H)),
        "w_hh1": u(keys[5], (4 * H, H)),
        "b_ih1": u(keys[6], (4 * H,)),
        "b_hh1": u(keys[7], (4 * H,)),
        # fc
        "w_fc": u(keys[8], (1, H)),
        "b_fc": u(keys[9], (1,)),
    }


def _reorder_pad_cols(w_t, H):
    """(in, 4H) cols in PyTorch order (i,f,g,o) -> (in, 4*HP) in order (i,f,o,g),
    each gate zero-padded to HP lanes."""
    gi, gf, gg, go = (w_t[:, k * H:(k + 1) * H] for k in range(4))
    pad = lambda g: jnp.pad(g, ((0, 0), (0, HP - H)))
    return jnp.concatenate([pad(gi), pad(gf), pad(go), pad(gg)], axis=1)


def _reorder_pad_bias(b, H):
    """(4H,) in order (i,f,g,o) -> (1, 4*HP) in order (i,f,o,g), zero-padded."""
    gi, gf, gg, go = (b[k * H:(k + 1) * H] for k in range(4))
    pad = lambda g: jnp.pad(g, (0, HP - H))
    return jnp.concatenate([pad(gi), pad(gf), pad(go), pad(gg)])[None, :]


def _pad_rows(w, rows):
    return jnp.pad(w, ((0, rows - w.shape[0]), (0, 0)))


@functools.partial(jax.jit, static_argnames=())
def lstm_model_forward(x, params):
    """x: (B, T, input_size) float32  ->  (B, 1) float32."""
    B, T, _ = x.shape
    H = HIDDEN_SIZE

    # ---- weight prep: reorder gates to (i,f,o,g), pad each gate to HP lanes.
    wih0 = _reorder_pad_cols(params["w_ih0"].T, H)                  # (I, 4*HP)
    b0 = _reorder_pad_bias(params["b_ih0"] + params["b_hh0"], H)    # (1, 4*HP)
    whh0 = _pad_rows(_reorder_pad_cols(params["w_hh0"].T, H), HP)   # (HP, 4*HP)

    wih1 = _pad_rows(_reorder_pad_cols(params["w_ih1"].T, H), HP)   # (HP, 4*HP)
    whh1 = _pad_rows(_reorder_pad_cols(params["w_hh1"].T, H), HP)   # (HP, 4*HP)
    w1 = jnp.concatenate([wih1, whh1], axis=0)                      # (2HP, 4*HP)
    b1 = _reorder_pad_bias(params["b_ih1"] + params["b_hh1"], H)    # (1, 4*HP)

    wfc = _pad_rows(params["w_fc"].T, HP)                           # (HP, 1)
    bfc = params["b_fc"].reshape(1, 1)                              # (1, 1)

    # ---- hoist the layer-0 input projection out of the recurrent loop
    # (single bulk op over all timesteps; also keeps the (T,B,1) input out of
    # VMEM -- the kernel only sees the lane-dense (T, B, 4*HP) projection).
    x_tbi = jnp.transpose(x, (1, 0, 2)).astype(jnp.float32)         # (T, B, I)
    x_proj = jnp.matmul(x_tbi, wih0) + b0[None]                     # (T, B, 4*HP)

    vmem = pl.BlockSpec(memory_space=pltpu.MemorySpace.VMEM)
    out = pl.pallas_call(
        _lstm_kernel,
        out_shape=jax.ShapeDtypeStruct((B, 1), jnp.float32),
        in_specs=[vmem] * 6,
        out_specs=vmem,
    )(x_proj, whh0, w1, b1, wfc, bfc)
    return out


def _reference_forward(x, params):
    """Pure-JAX reference reproducing torch.nn.LSTM + Linear semantics."""
    B, T, _ = x.shape
    H = HIDDEN_SIZE

    def cell(x_t, h, c, w_ih, w_hh, b_ih, b_hh):
        gates = x_t @ w_ih.T + b_ih + h @ w_hh.T + b_hh
        i = jax.nn.sigmoid(gates[:, 0 * H:1 * H])
        f = jax.nn.sigmoid(gates[:, 1 * H:2 * H])
        g = jnp.tanh(gates[:, 2 * H:3 * H])
        o = jax.nn.sigmoid(gates[:, 3 * H:4 * H])
        c = f * c + i * g
        h = o * jnp.tanh(c)
        return h, c

    h0 = c0 = h1 = c1 = jnp.zeros((B, H), jnp.float32)
    for t in range(T):
        h0, c0 = cell(x[:, t, :], h0, c0,
                      params["w_ih0"], params["w_hh0"],
                      params["b_ih0"], params["b_hh0"])
        h1, c1 = cell(h0, h1, c1,
                      params["w_ih1"], params["w_hh1"],
                      params["b_ih1"], params["b_hh1"])
    return h1 @ params["w_fc"].T + params["b_fc"]


if __name__ == "__main__":
    key = jax.random.PRNGKey(0)
    k_x, k_p = jax.random.split(key)

    B, T = 2, 8
    x = jax.random.normal(k_x, (B, T, INPUT_SIZE), dtype=jnp.float32)
    params = init_params(k_p)

    out = lstm_model_forward(x, params)
    out = jax.block_until_ready(out)

    ref = _reference_forward(x, params)
    assert out.shape == (B, 1), out.shape
    assert jnp.allclose(out, ref, atol=1e-4, rtol=1e-4), (out, ref)

    print("KERNEL_OK")
</pallas_src>

<mosaic_0001>
module attributes {stable_mosaic.version = 11 : i64} {
  func.func @_lstm_kernel(%arg0: memref<8x2x512xf32, #tpu.memory_space<vmem>>, %arg1: memref<128x512xf32, #tpu.memory_space<vmem>>, %arg2: memref<256x512xf32, #tpu.memory_space<vmem>>, %arg3: memref<1x512xf32, #tpu.memory_space<vmem>>, %arg4: memref<128x1xf32, #tpu.memory_space<vmem>>, %arg5: memref<1x1xf32, #tpu.memory_space<vmem>>, %arg6: memref<2x1xf32, #tpu.memory_space<vmem>>) attributes {dimension_semantics = [], scalar_prefetch = 0 : i64, scratch_operands = 0 : i64, tpu.core_type = #tpu.core_type<tc>} {
    %c0 = arith.constant 0 : index
    %c0_0 = arith.constant 0 : index
    %0 = vector.load %arg1[%c0, %c0_0] : memref<128x512xf32, #tpu.memory_space<vmem>>, vector<128x512xf32>
    %c0_1 = arith.constant 0 : index
    %c0_2 = arith.constant 0 : index
    %1 = vector.load %arg2[%c0_1, %c0_2] : memref<256x512xf32, #tpu.memory_space<vmem>>, vector<256x512xf32>
    %c0_3 = arith.constant 0 : index
    %c0_4 = arith.constant 0 : index
    %2 = vector.load %arg3[%c0_3, %c0_4] : memref<1x512xf32, #tpu.memory_space<vmem>>, vector<1x512xf32>
    %3 = vector.shape_cast %2 : vector<1x512xf32> to vector<1x512xf32>
    %4 = vector.broadcast %3 : vector<1x512xf32> to vector<2x512xf32>
    %cst = arith.constant 0.000000e+00 : f32
    %5 = vector.broadcast %cst : f32 to vector<2x128xf32>
    %c0_i32 = arith.constant 0 : i32
    %6 = arith.index_cast %c0_i32 : i32 to index
    %c0_5 = arith.constant 0 : index
    %c0_6 = arith.constant 0 : index
    %7 = vector.load %arg0[%6, %c0_5, %c0_6] : memref<8x2x512xf32, #tpu.memory_space<vmem>>, vector<1x2x512xf32>
    %8 = vector.shape_cast %7 : vector<1x2x512xf32> to vector<2x512xf32>
    %cst_7 = arith.constant dense<0.000000e+00> : vector<2x512xf32>
    %9 = tpu.matmul %5, %0, %cst_7 {dimension_numbers = #tpu.dot_dimension_numbers<[1], [0], [0], [1], [0, 0, 1, 1], [], []>} : vector<2x128xf32>, vector<128x512xf32>, vector<2x512xf32> -> vector<2x512xf32>
    %10 = arith.addf %8, %9 : vector<2x512xf32>
    %11 = vector.extract_strided_slice %10 {offsets = [0, 0], sizes = [2, 384], strides = [1, 1]} : vector<2x512xf32> to vector<2x384xf32>
    %12 = arith.negf %11 : vector<2x384xf32>
    %13 = math.exp %12 : vector<2x384xf32>
    %cst_8 = arith.constant 1.000000e+00 : f32
    %14 = vector.broadcast %cst_8 : f32 to vector<2x384xf32>
    %15 = arith.addf %14, %13 : vector<2x384xf32>
    %16 = arith.divf %14, %15 : vector<2x384xf32>
    %17 = vector.extract_strided_slice %16 {offsets = [0, 0], sizes = [2, 128], strides = [1, 1]} : vector<2x384xf32> to vector<2x128xf32>
    %18 = vector.extract_strided_slice %16 {offsets = [0, 128], sizes = [2, 128], strides = [1, 1]} : vector<2x384xf32> to vector<2x128xf32>
    %19 = vector.extract_strided_slice %16 {offsets = [0, 256], sizes = [2, 128], strides = [1, 1]} : vector<2x384xf32> to vector<2x128xf32>
    %20 = vector.extract_strided_slice %10 {offsets = [0, 384], sizes = [2, 128], strides = [1, 1]} : vector<2x512xf32> to vector<2x128xf32>
    %21 = math.tanh %20 : vector<2x128xf32>
    %22 = arith.mulf %18, %5 : vector<2x128xf32>
    %23 = arith.mulf %17, %21 : vector<2x128xf32>
    %24 = arith.addf %22, %23 : vector<2x128xf32>
    %25 = math.tanh %24 : vector<2x128xf32>
    %26 = arith.mulf %19, %25 : vector<2x128xf32>
    %27 = tpu.concatenate %26, %5 in 1 : vector<2x128xf32>, vector<2x128xf32> -> vector<2x256xf32>
    %cst_9 = arith.constant dense<0.000000e+00> : vector<2x512xf32>
    %28 = tpu.matmul %27, %1, %cst_9 {dimension_numbers = #tpu.dot_dimension_numbers<[1], [0], [0], [1], [0, 0, 1, 1], [], []>} : vector<2x256xf32>, vector<256x512xf32>, vector<2x512xf32> -> vector<2x512xf32>
    %29 = arith.addf %28, %4 : vector<2x512xf32>
    %30 = vector.extract_strided_slice %29 {offsets = [0, 0], sizes = [2, 384], strides = [1, 1]} : vector<2x512xf32> to vector<2x384xf32>
    %31 = arith.negf %30 : vector<2x384xf32>
    %32 = math.exp %31 : vector<2x384xf32>
    %cst_10 = arith.constant 1.000000e+00 : f32
    %33 = vector.broadcast %cst_10 : f32 to vector<2x384xf32>
    %34 = arith.addf %33, %32 : vector<2x384xf32>
    %35 = arith.divf %33, %34 : vector<2x384xf32>
    %36 = vector.extract_strided_slice %35 {offsets = [0, 0], sizes = [2, 128], strides = [1, 1]} : vector<2x384xf32> to vector<2x128xf32>
    %37 = vector.extract_strided_slice %35 {offsets = [0, 128], sizes = [2, 128], strides = [1, 1]} : vector<2x384xf32> to vector<2x128xf32>
    %38 = vector.extract_strided_slice %35 {offsets = [0, 256], sizes = [2, 128], strides = [1, 1]} : vector<2x384xf32> to vector<2x128xf32>
    %39 = vector.extract_strided_slice %29 {offsets = [0, 384], sizes = [2, 128], strides = [1, 1]} : vector<2x512xf32> to vector<2x128xf32>
    %40 = math.tanh %39 : vector<2x128xf32>
    %41 = arith.mulf %37, %5 : vector<2x128xf32>
    %42 = arith.mulf %36, %40 : vector<2x128xf32>
    %43 = arith.addf %41, %42 : vector<2x128xf32>
    %44 = math.tanh %43 : vector<2x128xf32>
    %45 = arith.mulf %38, %44 : vector<2x128xf32>
    %c1_i32 = arith.constant 1 : i32
    %46 = arith.index_cast %c1_i32 : i32 to index
    %c0_11 = arith.constant 0 : index
    %c0_12 = arith.constant 0 : index
    %47 = vector.load %arg0[%46, %c0_11, %c0_12] : memref<8x2x512xf32, #tpu.memory_space<vmem>>, vector<1x2x512xf32>
    %48 = vector.shape_cast %47 : vector<1x2x512xf32> to vector<2x512xf32>
    %cst_13 = arith.constant dense<0.000000e+00> : vector<2x512xf32>
    %49 = tpu.matmul %26, %0, %cst_13 {dimension_numbers = #tpu.dot_dimension_numbers<[1], [0], [0], [1], [0, 0, 1, 1], [], []>} : vector<2x128xf32>, vector<128x512xf32>, vector<2x512xf32> -> vector<2x512xf32>
    %50 = arith.addf %48, %49 : vector<2x512xf32>
    %51 = vector.extract_strided_slice %50 {offsets = [0, 0], sizes = [2, 384], strides = [1, 1]} : vector<2x512xf32> to vector<2x384xf32>
    %52 = arith.negf %51 : vector<2x384xf32>
    %53 = math.exp %52 : vector<2x384xf32>
    %cst_14 = arith.constant 1.000000e+00 : f32
    %54 = vector.broadcast %cst_14 : f32 to vector<2x384xf32>
    %55 = arith.addf %54, %53 : vector<2x384xf32>
    %56 = arith.divf %54, %55 : vector<2x384xf32>
    %57 = vector.extract_strided_slice %56 {offsets = [0, 0], sizes = [2, 128], strides = [1, 1]} : vector<2x384xf32> to vector<2x128xf32>
    %58 = vector.extract_strided_slice %56 {offsets = [0, 128], sizes = [2, 128], strides = [1, 1]} : vector<2x384xf32> to vector<2x128xf32>
    %59 = vector.extract_strided_slice %56 {offsets = [0, 256], sizes = [2, 128], strides = [1, 1]} : vector<2x384xf32> to vector<2x128xf32>
    %60 = vector.extract_strided_slice %50 {offsets = [0, 384], sizes = [2, 128], strides = [1, 1]} : vector<2x512xf32> to vector<2x128xf32>
    %61 = math.tanh %60 : vector<2x128xf32>
    %62 = arith.mulf %58, %24 : vector<2x128xf32>
    %63 = arith.mulf %57, %61 : vector<2x128xf32>
    %64 = arith.addf %62, %63 : vector<2x128xf32>
    %65 = math.tanh %64 : vector<2x128xf32>
    %66 = arith.mulf %59, %65 : vector<2x128xf32>
    %67 = tpu.concatenate %66, %45 in 1 : vector<2x128xf32>, vector<2x128xf32> -> vector<2x256xf32>
    %cst_15 = arith.constant dense<0.000000e+00> : vector<2x512xf32>
    %68 = tpu.matmul %67, %1, %cst_15 {dimension_numbers = #tpu.dot_dimension_numbers<[1], [0], [0], [1], [0, 0, 1, 1], [], []>} : vector<2x256xf32>, vector<256x512xf32>, vector<2x512xf32> -> vector<2x512xf32>
    %69 = arith.addf %68, %4 : vector<2x512xf32>
    %70 = vector.extract_strided_slice %69 {offsets = [0, 0], sizes = [2, 384], strides = [1, 1]} : vector<2x512xf32> to vector<2x384xf32>
    %71 = arith.negf %70 : vector<2x384xf32>
    %72 = math.exp %71 : vector<2x384xf32>
    %cst_16 = arith.constant 1.000000e+00 : f32
    %73 = vector.broadcast %cst_16 : f32 to vector<2x384xf32>
    %74 = arith.addf %73, %72 : vector<2x384xf32>
    %75 = arith.divf %73, %74 : vector<2x384xf32>
    %76 = vector.extract_strided_slice %75 {offsets = [0, 0], sizes = [2, 128], strides = [1, 1]} : vector<2x384xf32> to vector<2x128xf32>
    %77 = vector.extract_strided_slice %75 {offsets = [0, 128], sizes = [2, 128], strides = [1, 1]} : vector<2x384xf32> to vector<2x128xf32>
    %78 = vector.extract_strided_slice %75 {offsets = [0, 256], sizes = [2, 128], strides = [1, 1]} : vector<2x384xf32> to vector<2x128xf32>
    %79 = vector.extract_strided_slice %69 {offsets = [0, 384], sizes = [2, 128], strides = [1, 1]} : vector<2x512xf32> to vector<2x128xf32>
    %80 = math.tanh %79 : vector<2x128xf32>
    %81 = arith.mulf %77, %43 : vector<2x128xf32>
    %82 = arith.mulf %76, %80 : vector<2x128xf32>
    %83 = arith.addf %81, %82 : vector<2x128xf32>
    %84 = math.tanh %83 : vector<2x128xf32>
    %85 = arith.mulf %78, %84 : vector<2x128xf32>
    %c2_i32 = arith.constant 2 : i32
    %86 = arith.index_cast %c2_i32 : i32 to index
    %c0_17 = arith.constant 0 : index
    %c0_18 = arith.constant 0 : index
    %87 = vector.load %arg0[%86, %c0_17, %c0_18] : memref<8x2x512xf32, #tpu.memory_space<vmem>>, vector<1x2x512xf32>
    %88 = vector.shape_cast %87 : vector<1x2x512xf32> to vector<2x512xf32>
    %cst_19 = arith.constant dense<0.000000e+00> : vector<2x512xf32>
    %89 = tpu.matmul %66, %0, %cst_19 {dimension_numbers = #tpu.dot_dimension_numbers<[1], [0], [0], [1], [0, 0, 1, 1], [], []>} : vector<2x128xf32>, vector<128x512xf32>, vector<2x512xf32> -> vector<2x512xf32>
    %90 = arith.addf %88, %89 : vector<2x512xf32>
    %91 = vector.extract_strided_slice %90 {offsets = [0, 0], sizes = [2, 384], strides = [1, 1]} : vector<2x512xf32> to vector<2x384xf32>
    %92 = arith.negf %91 : vector<2x384xf32>
    %93 = math.exp %92 : vector<2x384xf32>
    %cst_20 = arith.constant 1.000000e+00 : f32
    %94 = vector.broadcast %cst_20 : f32 to vector<2x384xf32>
    %95 = arith.addf %94, %93 : vector<2x384xf32>
    %96 = arith.divf %94, %95 : vector<2x384xf32>
    %97 = vector.extract_strided_slice %96 {offsets = [0, 0], sizes = [2, 128], strides = [1, 1]} : vector<2x384xf32> to vector<2x128xf32>
    %98 = vector.extract_strided_slice %96 {offsets = [0, 128], sizes = [2, 128], strides = [1, 1]} : vector<2x384xf32> to vector<2x128xf32>
    %99 = vector.extract_strided_slice %96 {offsets = [0, 256], sizes = [2, 128], strides = [1, 1]} : vector<2x384xf32> to vector<2x128xf32>
    %100 = vector.extract_strided_slice %90 {offsets = [0, 384], sizes = [2, 128], strides = [1, 1]} : vector<2x512xf32> to vector<2x128xf32>
    %101 = math.tanh %100 : vector<2x128xf32>
    %102 = arith.mulf %98, %64 : vector<2x128xf32>
    %103 = arith.mulf %97, %101 : vector<2x128xf32>
    %104 = arith.addf %102, %103 : vector<2x128xf32>
    %105 = math.tanh %104 : vector<2x128xf32>
    %106 = arith.mulf %99, %105 : vector<2x128xf32>
    %107 = tpu.concatenate %106, %85 in 1 : vector<2x128xf32>, vector<2x128xf32> -> vector<2x256xf32>
    %cst_21 = arith.constant dense<0.000000e+00> : vector<2x512xf32>
    %108 = tpu.matmul %107, %1, %cst_21 {dimension_numbers = #tpu.dot_dimension_numbers<[1], [0], [0], [1], [0, 0, 1, 1], [], []>} : vector<2x256xf32>, vector<256x512xf32>, vector<2x512xf32> -> vector<2x512xf32>
    %109 = arith.addf %108, %4 : vector<2x512xf32>
    %110 = vector.extract_strided_slice %109 {offsets = [0, 0], sizes = [2, 384], strides = [1, 1]} : vector<2x512xf32> to vector<2x384xf32>
    %111 = arith.negf %110 : vector<2x384xf32>
    %112 = math.exp %111 : vector<2x384xf32>
    %cst_22 = arith.constant 1.000000e+00 : f32
    %113 = vector.broadcast %cst_22 : f32 to vector<2x384xf32>
    %114 = arith.addf %113, %112 : vector<2x384xf32>
    %115 = arith.divf %113, %114 : vector<2x384xf32>
    %116 = vector.extract_strided_slice %115 {offsets = [0, 0], sizes = [2, 128], strides = [1, 1]} : vector<2x384xf32> to vector<2x128xf32>
    %117 = vector.extract_strided_slice %115 {offsets = [0, 128], sizes = [2, 128], strides = [1, 1]} : vector<2x384xf32> to vector<2x128xf32>
    %118 = vector.extract_strided_slice %115 {offsets = [0, 256], sizes = [2, 128], strides = [1, 1]} : vector<2x384xf32> to vector<2x128xf32>
    %119 = vector.extract_strided_slice %109 {offsets = [0, 384], sizes = [2, 128], strides = [1, 1]} : vector<2x512xf32> to vector<2x128xf32>
    %120 = math.tanh %119 : vector<2x128xf32>
    %121 = arith.mulf %117, %83 : vector<2x128xf32>
    %122 = arith.mulf %116, %120 : vector<2x128xf32>
    %123 = arith.addf %121, %122 : vector<2x128xf32>
    %124 = math.tanh %123 : vector<2x128xf32>
    %125 = arith.mulf %118, %124 : vector<2x128xf32>
    %c3_i32 = arith.constant 3 : i32
    %126 = arith.index_cast %c3_i32 : i32 to index
    %c0_23 = arith.constant 0 : index
    %c0_24 = arith.constant 0 : index
    %127 = vector.load %arg0[%126, %c0_23, %c0_24] : memref<8x2x512xf32, #tpu.memory_space<vmem>>, vector<1x2x512xf32>
    %128 = vector.shape_cast %127 : vector<1x2x512xf32> to vector<2x512xf32>
    %cst_25 = arith.constant dense<0.000000e+00> : vector<2x512xf32>
    %129 = tpu.matmul %106, %0, %cst_25 {dimension_numbers = #tpu.dot_dimension_numbers<[1], [0], [0], [1], [0, 0, 1, 1], [], []>} : vector<2x128xf32>, vector<128x512xf32>, vector<2x512xf32> -> vector<2x512xf32>
    %130 = arith.addf %128, %129 : vector<2x512xf32>
    %131 = vector.extract_strided_slice %130 {offsets = [0, 0], sizes = [2, 384], strides = [1, 1]} : vector<2x512xf32> to vector<2x384xf32>
    %132 = arith.negf %131 : vector<2x384xf32>
    %133 = math.exp %132 : vector<2x384xf32>
    %cst_26 = arith.constant 1.000000e+00 : f32
    %134 = vector.broadcast %cst_26 : f32 to vector<2x384xf32>
    %135 = arith.addf %134, %133 : vector<2x384xf32>
    %136 = arith.divf %134, %135 : vector<2x384xf32>
    %137 = vector.extract_strided_slice %136 {offsets = [0, 0], sizes = [2, 128], strides = [1, 1]} : vector<2x384xf32> to vector<2x128xf32>
    %138 = vector.extract_strided_slice %136 {offsets = [0, 128], sizes = [2, 128], strides = [1, 1]} : vector<2x384xf32> to vector<2x128xf32>
    %139 = vector.extract_strided_slice %136 {offsets = [0, 256], sizes = [2, 128], strides = [1, 1]} : vector<2x384xf32> to vector<2x128xf32>
    %140 = vector.extract_strided_slice %130 {offsets = [0, 384], sizes = [2, 128], strides = [1, 1]} : vector<2x512xf32> to vector<2x128xf32>
    %141 = math.tanh %140 : vector<2x128xf32>
    %142 = arith.mulf %138, %104 : vector<2x128xf32>
    %143 = arith.mulf %137, %141 : vector<2x128xf32>
    %144 = arith.addf %142, %143 : vector<2x128xf32>
    %145 = math.tanh %144 : vector<2x128xf32>
    %146 = arith.mulf %139, %145 : vector<2x128xf32>
    %147 = tpu.concatenate %146, %125 in 1 : vector<2x128xf32>, vector<2x128xf32> -> vector<2x256xf32>
    %cst_27 = arith.constant dense<0.000000e+00> : vector<2x512xf32>
    %148 = tpu.matmul %147, %1, %cst_27 {dimension_numbers = #tpu.dot_dimension_numbers<[1], [0], [0], [1], [0, 0, 1, 1], [], []>} : vector<2x256xf32>, vector<256x512xf32>, vector<2x512xf32> -> vector<2x512xf32>
    %149 = arith.addf %148, %4 : vector<2x512xf32>
    %150 = vector.extract_strided_slice %149 {offsets = [0, 0], sizes = [2, 384], strides = [1, 1]} : vector<2x512xf32> to vector<2x384xf32>
    %151 = arith.negf %150 : vector<2x384xf32>
    %152 = math.exp %151 : vector<2x384xf32>
    %cst_28 = arith.constant 1.000000e+00 : f32
    %153 = vector.broadcast %cst_28 : f32 to vector<2x384xf32>
    %154 = arith.addf %153, %152 : vector<2x384xf32>
    %155 = arith.divf %153, %154 : vector<2x384xf32>
    %156 = vector.extract_strided_slice %155 {offsets = [0, 0], sizes = [2, 128], strides = [1, 1]} : vector<2x384xf32> to vector<2x128xf32>
    %157 = vector.extract_strided_slice %155 {offsets = [0, 128], sizes = [2, 128], strides = [1, 1]} : vector<2x384xf32> to vector<2x128xf32>
    %158 = vector.extract_strided_slice %155 {offsets = [0, 256], sizes = [2, 128], strides = [1, 1]} : vector<2x384xf32> to vector<2x128xf32>
    %159 = vector.extract_strided_slice %149 {offsets = [0, 384], sizes = [2, 128], strides = [1, 1]} : vector<2x512xf32> to vector<2x128xf32>
    %160 = math.tanh %159 : vector<2x128xf32>
    %161 = arith.mulf %157, %123 : vector<2x128xf32>
    %162 = arith.mulf %156, %160 : vector<2x128xf32>
    %163 = arith.addf %161, %162 : vector<2x128xf32>
    %164 = math.tanh %163 : vector<2x128xf32>
    %165 = arith.mulf %158, %164 : vector<2x128xf32>
    %c4_i32 = arith.constant 4 : i32
    %166 = arith.index_cast %c4_i32 : i32 to index
    %c0_29 = arith.constant 0 : index
    %c0_30 = arith.constant 0 : index
    %167 = vector.load %arg0[%166, %c0_29, %c0_30] : memref<8x2x512xf32, #tpu.memory_space<vmem>>, vector<1x2x512xf32>
    %168 = vector.shape_cast %167 : vector<1x2x512xf32> to vector<2x512xf32>
    %cst_31 = arith.constant dense<0.000000e+00> : vector<2x512xf32>
    %169 = tpu.matmul %146, %0, %cst_31 {dimension_numbers = #tpu.dot_dimension_numbers<[1], [0], [0], [1], [0, 0, 1, 1], [], []>} : vector<2x128xf32>, vector<128x512xf32>, vector<2x512xf32> -> vector<2x512xf32>
    %170 = arith.addf %168, %169 : vector<2x512xf32>
    %171 = vector.extract_strided_slice %170 {offsets = [0, 0], sizes = [2, 384], strides = [1, 1]} : vector<2x512xf32> to vector<2x384xf32>
    %172 = arith.negf %171 : vector<2x384xf32>
    %173 = math.exp %172 : vector<2x384xf32>
    %cst_32 = arith.constant 1.000000e+00 : f32
    %174 = vector.broadcast %cst_32 : f32 to vector<2x384xf32>
    %175 = arith.addf %174, %173 : vector<2x384xf32>
    %176 = arith.divf %174, %175 : vector<2x384xf32>
    %177 = vector.extract_strided_slice %176 {offsets = [0, 0], sizes = [2, 128], strides = [1, 1]} : vector<2x384xf32> to vector<2x128xf32>
    %178 = vector.extract_strided_slice %176 {offsets = [0, 128], sizes = [2, 128], strides = [1, 1]} : vector<2x384xf32> to vector<2x128xf32>
    %179 = vector.extract_strided_slice %176 {offsets = [0, 256], sizes = [2, 128], strides = [1, 1]} : vector<2x384xf32> to vector<2x128xf32>
    %180 = vector.extract_strided_slice %170 {offsets = [0, 384], sizes = [2, 128], strides = [1, 1]} : vector<2x512xf32> to vector<2x128xf32>
    %181 = math.tanh %180 : vector<2x128xf32>
    %182 = arith.mulf %178, %144 : vector<2x128xf32>
    %183 = arith.mulf %177, %181 : vector<2x128xf32>
    %184 = arith.addf %182, %183 : vector<2x128xf32>
    %185 = math.tanh %184 : vector<2x128xf32>
    %186 = arith.mulf %179, %185 : vector<2x128xf32>
    %187 = tpu.concatenate %186, %165 in 1 : vector<2x128xf32>, vector<2x128xf32> -> vector<2x256xf32>
    %cst_33 = arith.constant dense<0.000000e+00> : vector<2x512xf32>
    %188 = tpu.matmul %187, %1, %cst_33 {dimension_numbers = #tpu.dot_dimension_numbers<[1], [0], [0], [1], [0, 0, 1, 1], [], []>} : vector<2x256xf32>, vector<256x512xf32>, vector<2x512xf32> -> vector<2x512xf32>
    %189 = arith.addf %188, %4 : vector<2x512xf32>
    %190 = vector.extract_strided_slice %189 {offsets = [0, 0], sizes = [2, 384], strides = [1, 1]} : vector<2x512xf32> to vector<2x384xf32>
    %191 = arith.negf %190 : vector<2x384xf32>
    %192 = math.exp %191 : vector<2x384xf32>
    %cst_34 = arith.constant 1.000000e+00 : f32
    %193 = vector.broadcast %cst_34 : f32 to vector<2x384xf32>
    %194 = arith.addf %193, %192 : vector<2x384xf32>
    %195 = arith.divf %193, %194 : vector<2x384xf32>
    %196 = vector.extract_strided_slice %195 {offsets = [0, 0], sizes = [2, 128], strides = [1, 1]} : vector<2x384xf32> to vector<2x128xf32>
    %197 = vector.extract_strided_slice %195 {offsets = [0, 128], sizes = [2, 128], strides = [1, 1]} : vector<2x384xf32> to vector<2x128xf32>
    %198 = vector.extract_strided_slice %195 {offsets = [0, 256], sizes = [2, 128], strides = [1, 1]} : vector<2x384xf32> to vector<2x128xf32>
    %199 = vector.extract_strided_slice %189 {offsets = [0, 384], sizes = [2, 128], strides = [1, 1]} : vector<2x512xf32> to vector<2x128xf32>
    %200 = math.tanh %199 : vector<2x128xf32>
    %201 = arith.mulf %197, %163 : vector<2x128xf32>
    %202 = arith.mulf %196, %200 : vector<2x128xf32>
    %203 = arith.addf %201, %202 : vector<2x128xf32>
    %204 = math.tanh %203 : vector<2x128xf32>
    %205 = arith.mulf %198, %204 : vector<2x128xf32>
    %c5_i32 = arith.constant 5 : i32
    %206 = arith.index_cast %c5_i32 : i32 to index
    %c0_35 = arith.constant 0 : index
    %c0_36 = arith.constant 0 : index
    %207 = vector.load %arg0[%206, %c0_35, %c0_36] : memref<8x2x512xf32, #tpu.memory_space<vmem>>, vector<1x2x512xf32>
    %208 = vector.shape_cast %207 : vector<1x2x512xf32> to vector<2x512xf32>
    %cst_37 = arith.constant dense<0.000000e+00> : vector<2x512xf32>
    %209 = tpu.matmul %186, %0, %cst_37 {dimension_numbers = #tpu.dot_dimension_numbers<[1], [0], [0], [1], [0, 0, 1, 1], [], []>} : vector<2x128xf32>, vector<128x512xf32>, vector<2x512xf32> -> vector<2x512xf32>
    %210 = arith.addf %208, %209 : vector<2x512xf32>
    %211 = vector.extract_strided_slice %210 {offsets = [0, 0], sizes = [2, 384], strides = [1, 1]} : vector<2x512xf32> to vector<2x384xf32>
    %212 = arith.negf %211 : vector<2x384xf32>
    %213 = math.exp %212 : vector<2x384xf32>
    %cst_38 = arith.constant 1.000000e+00 : f32
    %214 = vector.broadcast %cst_38 : f32 to vector<2x384xf32>
    %215 = arith.addf %214, %213 : vector<2x384xf32>
    %216 = arith.divf %214, %215 : vector<2x384xf32>
    %217 = vector.extract_strided_slice %216 {offsets = [0, 0], sizes = [2, 128], strides = [1, 1]} : vector<2x384xf32> to vector<2x128xf32>
    %218 = vector.extract_strided_slice %216 {offsets = [0, 128], sizes = [2, 128], strides = [1, 1]} : vector<2x384xf32> to vector<2x128xf32>
    %219 = vector.extract_strided_slice %216 {offsets = [0, 256], sizes = [2, 128], strides = [1, 1]} : vector<2x384xf32> to vector<2x128xf32>
    %220 = vector.extract_strided_slice %210 {offsets = [0, 384], sizes = [2, 128], strides = [1, 1]} : vector<2x512xf32> to vector<2x128xf32>
    %221 = math.tanh %220 : vector<2x128xf32>
    %222 = arith.mulf %218, %184 : vector<2x128xf32>
    %223 = arith.mulf %217, %221 : vector<2x128xf32>
    %224 = arith.addf %222, %223 : vector<2x128xf32>
    %225 = math.tanh %224 : vector<2x128xf32>
    %226 = arith.mulf %219, %225 : vector<2x128xf32>
    %227 = tpu.concatenate %226, %205 in 1 : vector<2x128xf32>, vector<2x128xf32> -> vector<2x256xf32>
    %cst_39 = arith.constant dense<0.000000e+00> : vector<2x512xf32>
    %228 = tpu.matmul %227, %1, %cst_39 {dimension_numbers = #tpu.dot_dimension_numbers<[1], [0], [0], [1], [0, 0, 1, 1], [], []>} : vector<2x256xf32>, vector<256x512xf32>, vector<2x512xf32> -> vector<2x512xf32>
    %229 = arith.addf %228, %4 : vector<2x512xf32>
    %230 = vector.extract_strided_slice %229 {offsets = [0, 0], sizes = [2, 384], strides = [1, 1]} : vector<2x512xf32> to vector<2x384xf32>
    %231 = arith.negf %230 : vector<2x384xf32>
    %232 = math.exp %231 : vector<2x384xf32>
    %cst_40 = arith.constant 1.000000e+00 : f32
    %233 = vector.broadcast %cst_40 : f32 to vector<2x384xf32>
    %234 = arith.addf %233, %232 : vector<2x384xf32>
    %235 = arith.divf %233, %234 : vector<2x384xf32>
    %236 = vector.extract_strided_slice %235 {offsets = [0, 0], sizes = [2, 128], strides = [1, 1]} : vector<2x384xf32> to vector<2x128xf32>
    %237 = vector.extract_strided_slice %235 {offsets = [0, 128], sizes = [2, 128], strides = [1, 1]} : vector<2x384xf32> to vector<2x128xf32>
    %238 = vector.extract_strided_slice %235 {offsets = [0, 256], sizes = [2, 128], strides = [1, 1]} : vector<2x384xf32> to vector<2x128xf32>
    %239 = vector.extract_strided_slice %229 {offsets = [0, 384], sizes = [2, 128], strides = [1, 1]} : vector<2x512xf32> to vector<2x128xf32>
    %240 = math.tanh %239 : vector<2x128xf32>
    %241 = arith.mulf %237, %203 : vector<2x128xf32>
    %242 = arith.mulf %236, %240 : vector<2x128xf32>
    %243 = arith.addf %241, %242 : vector<2x128xf32>
    %244 = math.tanh %243 : vector<2x128xf32>
    %245 = arith.mulf %238, %244 : vector<2x128xf32>
    %c6_i32 = arith.constant 6 : i32
    %246 = arith.index_cast %c6_i32 : i32 to index
    %c0_41 = arith.constant 0 : index
    %c0_42 = arith.constant 0 : index
    %247 = vector.load %arg0[%246, %c0_41, %c0_42] : memref<8x2x512xf32, #tpu.memory_space<vmem>>, vector<1x2x512xf32>
    %248 = vector.shape_cast %247 : vector<1x2x512xf32> to vector<2x512xf32>
    %cst_43 = arith.constant dense<0.000000e+00> : vector<2x512xf32>
    %249 = tpu.matmul %226, %0, %cst_43 {dimension_numbers = #tpu.dot_dimension_numbers<[1], [0], [0], [1], [0, 0, 1, 1], [], []>} : vector<2x128xf32>, vector<128x512xf32>, vector<2x512xf32> -> vector<2x512xf32>
    %250 = arith.addf %248, %249 : vector<2x512xf32>
    %251 = vector.extract_strided_slice %250 {offsets = [0, 0], sizes = [2, 384], strides = [1, 1]} : vector<2x512xf32> to vector<2x384xf32>
    %252 = arith.negf %251 : vector<2x384xf32>
    %253 = math.exp %252 : vector<2x384xf32>
    %cst_44 = arith.constant 1.000000e+00 : f32
    %254 = vector.broadcast %cst_44 : f32 to vector<2x384xf32>
    %255 = arith.addf %254, %253 : vector<2x384xf32>
    %256 = arith.divf %254, %255 : vector<2x384xf32>
    %257 = vector.extract_strided_slice %256 {offsets = [0, 0], sizes = [2, 128], strides = [1, 1]} : vector<2x384xf32> to vector<2x128xf32>
    %258 = vector.extract_strided_slice %256 {offsets = [0, 128], sizes = [2, 128], strides = [1, 1]} : vector<2x384xf32> to vector<2x128xf32>
    %259 = vector.extract_strided_slice %256 {offsets = [0, 256], sizes = [2, 128], strides = [1, 1]} : vector<2x384xf32> to vector<2x128xf32>
    %260 = vector.extract_strided_slice %250 {offsets = [0, 384], sizes = [2, 128], strides = [1, 1]} : vector<2x512xf32> to vector<2x128xf32>
    %261 = math.tanh %260 : vector<2x128xf32>
    %262 = arith.mulf %258, %224 : vector<2x128xf32>
    %263 = arith.mulf %257, %261 : vector<2x128xf32>
    %264 = arith.addf %262, %263 : vector<2x128xf32>
    %265 = math.tanh %264 : vector<2x128xf32>
    %266 = arith.mulf %259, %265 : vector<2x128xf32>
    %267 = tpu.concatenate %266, %245 in 1 : vector<2x128xf32>, vector<2x128xf32> -> vector<2x256xf32>
    %cst_45 = arith.constant dense<0.000000e+00> : vector<2x512xf32>
    %268 = tpu.matmul %267, %1, %cst_45 {dimension_numbers = #tpu.dot_dimension_numbers<[1], [0], [0], [1], [0, 0, 1, 1], [], []>} : vector<2x256xf32>, vector<256x512xf32>, vector<2x512xf32> -> vector<2x512xf32>
    %269 = arith.addf %268, %4 : vector<2x512xf32>
    %270 = vector.extract_strided_slice %269 {offsets = [0, 0], sizes = [2, 384], strides = [1, 1]} : vector<2x512xf32> to vector<2x384xf32>
    %271 = arith.negf %270 : vector<2x384xf32>
    %272 = math.exp %271 : vector<2x384xf32>
    %cst_46 = arith.constant 1.000000e+00 : f32
    %273 = vector.broadcast %cst_46 : f32 to vector<2x384xf32>
    %274 = arith.addf %273, %272 : vector<2x384xf32>
    %275 = arith.divf %273, %274 : vector<2x384xf32>
    %276 = vector.extract_strided_slice %275 {offsets = [0, 0], sizes = [2, 128], strides = [1, 1]} : vector<2x384xf32> to vector<2x128xf32>
    %277 = vector.extract_strided_slice %275 {offsets = [0, 128], sizes = [2, 128], strides = [1, 1]} : vector<2x384xf32> to vector<2x128xf32>
    %278 = vector.extract_strided_slice %275 {offsets = [0, 256], sizes = [2, 128], strides = [1, 1]} : vector<2x384xf32> to vector<2x128xf32>
    %279 = vector.extract_strided_slice %269 {offsets = [0, 384], sizes = [2, 128], strides = [1, 1]} : vector<2x512xf32> to vector<2x128xf32>
    %280 = math.tanh %279 : vector<2x128xf32>
    %281 = arith.mulf %277, %243 : vector<2x128xf32>
    %282 = arith.mulf %276, %280 : vector<2x128xf32>
    %283 = arith.addf %281, %282 : vector<2x128xf32>
    %284 = math.tanh %283 : vector<2x128xf32>
    %285 = arith.mulf %278, %284 : vector<2x128xf32>
    %c7_i32 = arith.constant 7 : i32
    %286 = arith.index_cast %c7_i32 : i32 to index
    %c0_47 = arith.constant 0 : index
    %c0_48 = arith.constant 0 : index
    %287 = vector.load %arg0[%286, %c0_47, %c0_48] : memref<8x2x512xf32, #tpu.memory_space<vmem>>, vector<1x2x512xf32>
    %288 = vector.shape_cast %287 : vector<1x2x512xf32> to vector<2x512xf32>
    %cst_49 = arith.constant dense<0.000000e+00> : vector<2x512xf32>
    %289 = tpu.matmul %266, %0, %cst_49 {dimension_numbers = #tpu.dot_dimension_numbers<[1], [0], [0], [1], [0, 0, 1, 1], [], []>} : vector<2x128xf32>, vector<128x512xf32>, vector<2x512xf32> -> vector<2x512xf32>
    %290 = arith.addf %288, %289 : vector<2x512xf32>
    %291 = vector.extract_strided_slice %290 {offsets = [0, 0], sizes = [2, 384], strides = [1, 1]} : vector<2x512xf32> to vector<2x384xf32>
    %292 = arith.negf %291 : vector<2x384xf32>
    %293 = math.exp %292 : vector<2x384xf32>
    %cst_50 = arith.constant 1.000000e+00 : f32
    %294 = vector.broadcast %cst_50 : f32 to vector<2x384xf32>
    %295 = arith.addf %294, %293 : vector<2x384xf32>
    %296 = arith.divf %294, %295 : vector<2x384xf32>
    %297 = vector.extract_strided_slice %296 {offsets = [0, 0], sizes = [2, 128], strides = [1, 1]} : vector<2x384xf32> to vector<2x128xf32>
    %298 = vector.extract_strided_slice %296 {offsets = [0, 128], sizes = [2, 128], strides = [1, 1]} : vector<2x384xf32> to vector<2x128xf32>
    %299 = vector.extract_strided_slice %296 {offsets = [0, 256], sizes = [2, 128], strides = [1, 1]} : vector<2x384xf32> to vector<2x128xf32>
    %300 = vector.extract_strided_slice %290 {offsets = [0, 384], sizes = [2, 128], strides = [1, 1]} : vector<2x512xf32> to vector<2x128xf32>
    %301 = math.tanh %300 : vector<2x128xf32>
    %302 = arith.mulf %298, %264 : vector<2x128xf32>
    %303 = arith.mulf %297, %301 : vector<2x128xf32>
    %304 = arith.addf %302, %303 : vector<2x128xf32>
    %305 = math.tanh %304 : vector<2x128xf32>
    %306 = arith.mulf %299, %305 : vector<2x128xf32>
    %307 = tpu.concatenate %306, %285 in 1 : vector<2x128xf32>, vector<2x128xf32> -> vector<2x256xf32>
    %cst_51 = arith.constant dense<0.000000e+00> : vector<2x512xf32>
    %308 = tpu.matmul %307, %1, %cst_51 {dimension_numbers = #tpu.dot_dimension_numbers<[1], [0], [0], [1], [0, 0, 1, 1], [], []>} : vector<2x256xf32>, vector<256x512xf32>, vector<2x512xf32> -> vector<2x512xf32>
    %309 = arith.addf %308, %4 : vector<2x512xf32>
    %310 = vector.extract_strided_slice %309 {offsets = [0, 0], sizes = [2, 384], strides = [1, 1]} : vector<2x512xf32> to vector<2x384xf32>
    %311 = arith.negf %310 : vector<2x384xf32>
    %312 = math.exp %311 : vector<2x384xf32>
    %cst_52 = arith.constant 1.000000e+00 : f32
    %313 = vector.broadcast %cst_52 : f32 to vector<2x384xf32>
    %314 = arith.addf %313, %312 : vector<2x384xf32>
    %315 = arith.divf %313, %314 : vector<2x384xf32>
    %316 = vector.extract_strided_slice %315 {offsets = [0, 0], sizes = [2, 128], strides = [1, 1]} : vector<2x384xf32> to vector<2x128xf32>
    %317 = vector.extract_strided_slice %315 {offsets = [0, 128], sizes = [2, 128], strides = [1, 1]} : vector<2x384xf32> to vector<2x128xf32>
    %318 = vector.extract_strided_slice %315 {offsets = [0, 256], sizes = [2, 128], strides = [1, 1]} : vector<2x384xf32> to vector<2x128xf32>
    %319 = vector.extract_strided_slice %309 {offsets = [0, 384], sizes = [2, 128], strides = [1, 1]} : vector<2x512xf32> to vector<2x128xf32>
    %320 = math.tanh %319 : vector<2x128xf32>
    %321 = arith.mulf %317, %283 : vector<2x128xf32>
    %322 = arith.mulf %316, %320 : vector<2x128xf32>
    %323 = arith.addf %321, %322 : vector<2x128xf32>
    %324 = math.tanh %323 : vector<2x128xf32>
    %325 = arith.mulf %318, %324 : vector<2x128xf32>
    %c8_i32 = arith.constant 8 : i32
    %c0_53 = arith.constant 0 : index
    %c0_54 = arith.constant 0 : index
    %326 = vector.load %arg4[%c0_53, %c0_54] : memref<128x1xf32, #tpu.memory_space<vmem>>, vector<128x1xf32>
    %cst_55 = arith.constant dense<0.000000e+00> : vector<2x1xf32>
    %327 = tpu.matmul %325, %326, %cst_55 {dimension_numbers = #tpu.dot_dimension_numbers<[1], [0], [0], [1], [0, 0, 1, 1], [], []>} : vector<2x128xf32>, vector<128x1xf32>, vector<2x1xf32> -> vector<2x1xf32>
    %c0_56 = arith.constant 0 : index
    %c0_57 = arith.constant 0 : index
    %328 = vector.load %arg5[%c0_56, %c0_57] : memref<1x1xf32, #tpu.memory_space<vmem>>, vector<1x1xf32>
    %329 = vector.broadcast %328 : vector<1x1xf32> to vector<2x1xf32>
    %330 = arith.addf %327, %329 : vector<2x1xf32>
    %c0_58 = arith.constant 0 : index
    %c0_59 = arith.constant 0 : index
    %331 = vector.load %arg6[%c0_58, %c0_59] : memref<2x1xf32, #tpu.memory_space<vmem>>, vector<2x1xf32>
    tpu.vector_store %arg6[%c0_58, %c0_59], %330 {strides = array<i32>} : memref<2x1xf32, #tpu.memory_space<vmem>>, vector<2x1xf32>,
    return
  }
}

</mosaic_0001>

<bundles_post_ra>
// kernel: lstm_model_forward.1
= control target key start
LH: loop header
LB: loop body
LE: loop exit
PB: predicated region body
PF: predicated region fallthrough
CT: control target
= control target key end

     0   :  { %v6814_v3 = vmov 0.0   ;;  %vm5012_vm0 = vmmov 0   ;;  %vm3155_vm1 = vcmask 1024   ;;  %s6807_s1 = inlined_call_operand.vmem [shape: f32[128,512], index: 1, kind: input, shape index: {}]   ;;  %s6808_s2 = inlined_call_operand.vmem [shape: f32[256,512], index: 2, kind: input, shape index: {}]   ;;  %s6809_s0 = inlined_call_operand.vmem [shape: f32[8,2,512], index: 0, kind: input, shape index: {}]   ;;  %s6810_s3 = inlined_call_operand.vmem [shape: f32[1,512], index: 3, kind: input, shape index: {}]   ;;  %s6811_s4 = inlined_call_operand.vmem [shape: f32[128,1], index: 4, kind: input, shape index: {}]   ;;  %s6812_s5 = inlined_call_operand.<no memory space> [shape: f32[1,1], index: 5, kind: input, shape index: {}]   ;;  %s6813_s6 = inlined_call_operand.vmem [shape: f32[2,1], index: 6, kind: output, shape index: {}]  }
   0x1   :  { %v26_v0 = vld [vmem:[%s6807_s1 + $0x8] sm:$0xff]  ;;  %v28_v2 = vld [vmem:[%s6807_s1 + $0x18] sm:$0xff]  ;;  %304 = vmatprep.mubr.f32.mxu0 %v6814_v3  ;;  %375 = vmatprep.mubr.f32.mxu1 %v6814_v3  ;;  %v25_v6 = vld [vmem:[%s6807_s1] sm:$0xff] }
   0x2   :  { %v30_v1 = vld [vmem:[%s6807_s1 + $0x28] sm:$0xff]  ;;  %v32_v5 = vld [vmem:[%s6807_s1 + $0x38] sm:$0xff]  ;;  %v29_v7 = vld [vmem:[%s6807_s1 + $0x20] sm:$0xff] }
   0x3   :  { %v5059_v4 = vpack.c.bf16 %v30_v1, %v26_v0  ;;  %v5070_v8 = vpack.c.bf16 %v32_v5, %v28_v2  ;;  %v5072_v9 = vpack.c.bf16 %v29_v7, %v25_v6  ;;  %v27_v10 = vld [vmem:[%s6807_s1 + $0x10] sm:$0xff]  ;;  %v34_v12 = vld [vmem:[%s6807_s1 + $0x48] sm:$0xff]  ;;  %v36_v15 = vld [vmem:[%s6807_s1 + $0x58] sm:$0xff] }
   0x4   :  { %v31_v11 = vld [vmem:[%s6807_s1 + $0x30] sm:$0xff]  ;;  %v38_v14 = vld [vmem:[%s6807_s1 + $0x68] sm:$0xff]  ;;  %v40_v16 = vld [vmem:[%s6807_s1 + $0x78] sm:$0xff] }
   0x5   :  { %6938 = vst [vmem:[#allocation3_spill] sm:$0xff] %v5059_v4  ;;  %6939 = vst [vmem:[#allocation4_spill] sm:$0xff] %v5070_v8  ;;  %3254 = vmatprep.subr.bf16.mxu0 %v5059_v4  ;;  %v5084_v13 = vpack.c.bf16 %v31_v11, %v27_v10  ;;  %3286 = vmatprep.subr.bf16.mxu1 %v5070_v8  ;;  %v5097_v17 = vpack.c.bf16 %v38_v14, %v34_v12  ;;  %v33_v19 = vld [vmem:[%s6807_s1 + $0x40] sm:$0xff]  ;;  %v35_v21 = vld [vmem:[%s6807_s1 + $0x50] sm:$0xff] }
   0x6   :  { %3256 = vmatpush1.bf16.msra.mxu0 %v5072_v9  ;;  %v5099_v18 = vpack.c.bf16 %v40_v16, %v36_v15  ;;  %v37_v20 = vld [vmem:[%s6807_s1 + $0x60] sm:$0xff]  ;;  %v39_v23 = vld [vmem:[%s6807_s1 + $0x70] sm:$0xff]  ;;  %v42_v24 = vld [vmem:[%s6807_s1 + $0x88] sm:$0xff] }
   0x7   :  { %3288 = vmatpush1.bf16.msra.mxu1 %v5084_v13  ;;  %v5111_v22 = vpack.c.bf16 %v37_v20, %v33_v19  ;;  %v46_v25 = vld [vmem:[%s6807_s1 + $0xa8] sm:$0xff]  ;;  %3258 = vmatprep.subr.bf16.mxu0 %v5097_v17  ;;  %v5124_v26 = vpack.c.bf16 %v39_v23, %v35_v21  ;;  %v44_v28 = vld [vmem:[%s6807_s1 + $0x98] sm:$0xff]  ;;  %v41_v30 = vld [vmem:[%s6807_s1 + $0x80] sm:$0xff] }
   0x8   :  { %3290 = vmatprep.subr.bf16.mxu1 %v5099_v18  ;;  %v5126_v27 = vpack.c.bf16 %v46_v25, %v42_v24  ;;  %v48_v29 = vld [vmem:[%s6807_s1 + $0xb8] sm:$0xff]  ;;  %v45_v32 = vld [vmem:[%s6807_s1 + $0xa0] sm:$0xff]  ;;  %v43_v33 = vld [vmem:[%s6807_s1 + $0x90] sm:$0xff] }
   0x9   :  { %v5137_v31 = vpack.c.bf16 %v48_v29, %v44_v28  ;;  %v47_v34 = vld [vmem:[%s6807_s1 + $0xb0] sm:$0xff]  ;;  %v5149_v35 = vpack.c.bf16 %v45_v32, %v41_v30  ;;  %v50_v36 = vld [vmem:[%s6807_s1 + $0xc8] sm:$0xff]  ;;  %v52_v38 = vld [vmem:[%s6807_s1 + $0xd8] sm:$0xff] }
   0xa   :  { %3260 = vmatpush1.bf16.msra.mxu0 %v5111_v22  ;;  %v54_v37 = vld [vmem:[%s6807_s1 + $0xe8] sm:$0xff]  ;;  %v5162_v39 = vpack.c.bf16 %v47_v34, %v43_v33  ;;  %v56_v41 = vld [vmem:[%s6807_s1 + $0xf8] sm:$0xff]  ;;  %v49_v42 = vld [vmem:[%s6807_s1 + $0xc0] sm:$0xff] }
   0xb   :  { %3292 = vmatpush1.bf16.msra.mxu1 %v5124_v26  ;;  %3262 = vmatprep.subr.bf16.mxu0 %v5126_v27  ;;  %v5164_v40 = vpack.c.bf16 %v54_v37, %v50_v36  ;;  %v53_v43 = vld [vmem:[%s6807_s1 + $0xe0] sm:$0xff]  ;;  %v5176_v44 = vpack.c.bf16 %v56_v41, %v52_v38  ;;  %v51_v45 = vld [vmem:[%s6807_s1 + $0xd0] sm:$0xff]  ;;  %v58_v47 = vld [vmem:[%s6807_s1 + $0x108] sm:$0xff] }
   0xc   :  { %3294 = vmatprep.subr.bf16.mxu1 %v5137_v31  ;;  %v55_v46 = vld [vmem:[%s6807_s1 + $0xf0] sm:$0xff]  ;;  %v62_v48 = vld [vmem:[%s6807_s1 + $0x128] sm:$0xff]  ;;  %v60_v49 = vld [vmem:[%s6807_s1 + $0x118] sm:$0xff]  ;;  %v5197_v51 = vpack.c.bf16 %v53_v43, %v49_v42 }
   0xd   :  { %v64_v50 = vld [vmem:[%s6807_s1 + $0x138] sm:$0xff]  ;;  %v5201_v52 = vpack.c.bf16 %v55_v46, %v51_v45  ;;  %v5203_v53 = vpack.c.bf16 %v62_v48, %v58_v47  ;;  %v57_v54 = vld [vmem:[%s6807_s1 + $0x100] sm:$0xff]  ;;  %v59_v56 = vld [vmem:[%s6807_s1 + $0x110] sm:$0xff] }
   0xe   :  { %3264 = vmatpush1.bf16.msra.mxu0 %v5149_v35  ;;  %v61_v55 = vld [vmem:[%s6807_s1 + $0x120] sm:$0xff]  ;;  %v5215_v57 = vpack.c.bf16 %v64_v50, %v60_v49  ;;  %v63_v58 = vld [vmem:[%s6807_s1 + $0x130] sm:$0xff]  ;;  %v66_v59 = vld [vmem:[%s6807_s1 + $0x148] sm:$0xff] }
   0xf   :  { %3296 = vmatpush1.bf16.msra.mxu1 %v5162_v39  ;;  %3266 = vmatprep.subr.bf16.mxu0 %v5164_v40  ;;  %v70_v60 = vld [vmem:[%s6807_s1 + $0x168] sm:$0xff]  ;;  %v68_v61 = vld [vmem:[%s6807_s1 + $0x158] sm:$0xff]  ;;  %v5233_v63 = vpack.c.bf16 %v61_v55, %v57_v54  ;;  %v5237_v0 = vpack.c.bf16 %v63_v58, %v59_v56  ;;  %v65_v2 = vld [vmem:[%s6807_s1 + $0x140] sm:$0xff] }
  0x10   :  { %3298 = vmatprep.subr.bf16.mxu1 %v5176_v44  ;;  %v72_v62 = vld [vmem:[%s6807_s1 + $0x178] sm:$0xff]  ;;  %v5239_v1 = vpack.c.bf16 %v70_v60, %v66_v59  ;;  %v69_v5 = vld [vmem:[%s6807_s1 + $0x160] sm:$0xff]  ;;  %v67_v6 = vld [vmem:[%s6807_s1 + $0x150] sm:$0xff] }
  0x11   :  { %v5251_v7 = vpack.c.bf16 %v72_v62, %v68_v61  ;;  %v71_v10 = vld [vmem:[%s6807_s1 + $0x170] sm:$0xff]  ;;  %v74_v11 = vld [vmem:[%s6807_s1 + $0x188] sm:$0xff]  ;;  %v76_v14 = vld [vmem:[%s6807_s1 + $0x198] sm:$0xff]  ;;  %v5269_v16 = vpack.c.bf16 %v69_v5, %v65_v2 }
  0x12   :  { %3268 = vmatpush1.bf16.msra.mxu0 %v5197_v51  ;;  %v78_v12 = vld [vmem:[%s6807_s1 + $0x1a8] sm:$0xff]  ;;  %v80_v15 = vld [vmem:[%s6807_s1 + $0x1b8] sm:$0xff]  ;;  %v5273_v19 = vpack.c.bf16 %v71_v10, %v67_v6  ;;  %v73_v21 = vld [vmem:[%s6807_s1 + $0x180] sm:$0xff] }
  0x13   :  { %3300 = vmatpush1.bf16.msra.mxu1 %v5201_v52  ;;  %3270 = vmatprep.subr.bf16.mxu0 %v5203_v53  ;;  %v5275_v20 = vpack.c.bf16 %v78_v12, %v74_v11  ;;  %v77_v23 = vld [vmem:[%s6807_s1 + $0x1a0] sm:$0xff]  ;;  %v75_v24 = vld [vmem:[%s6807_s1 + $0x190] sm:$0xff]  ;;  %v5287_v25 = vpack.c.bf16 %v80_v15, %v76_v14  ;;  %v82_v29 = vld [vmem:[%s6807_s1 + $0x1c8] sm:$0xff] }
  0x14   :  { %3302 = vmatprep.subr.bf16.mxu1 %v5215_v57  ;;  %v79_v28 = vld [vmem:[%s6807_s1 + $0x1b0] sm:$0xff]  ;;  %v86_v30 = vld [vmem:[%s6807_s1 + $0x1e8] sm:$0xff]  ;;  %v84_v32 = vld [vmem:[%s6807_s1 + $0x1d8] sm:$0xff]  ;;  %v5305_v34 = vpack.c.bf16 %v77_v23, %v73_v21 }
  0x15   :  { %v88_v33 = vld [vmem:[%s6807_s1 + $0x1f8] sm:$0xff]  ;;  %v5309_v36 = vpack.c.bf16 %v79_v28, %v75_v24  ;;  %v5311_v37 = vpack.c.bf16 %v86_v30, %v82_v29  ;;  %v81_v38 = vld [vmem:[%s6807_s1 + $0x1c0] sm:$0xff]  ;;  %v83_v42 = vld [vmem:[%s6807_s1 + $0x1d0] sm:$0xff] }
  0x16   :  { %3272 = vmatpush1.bf16.msra.mxu0 %v5233_v63  ;;  %v85_v41 = vld [vmem:[%s6807_s1 + $0x1e0] sm:$0xff]  ;;  %v5323_v43 = vpack.c.bf16 %v88_v33, %v84_v32  ;;  %v87_v45 = vld [vmem:[%s6807_s1 + $0x1f0] sm:$0xff]  ;;  %v90_v46 = vld [vmem:[%s6808_s2 + $0x8] sm:$0xff] }
  0x17   :  { %3304 = vmatpush1.bf16.msra.mxu1 %v5237_v0  ;;  %3274 = vmatprep.subr.bf16.mxu0 %v5239_v1  ;;  %v94_v47 = vld [vmem:[%s6808_s2 + $0x28] sm:$0xff]  ;;  %v92_v48 = vld [vmem:[%s6808_s2 + $0x18] sm:$0xff]  ;;  %v5341_v50 = vpack.c.bf16 %v85_v41, %v81_v38  ;;  %v5345_v54 = vpack.c.bf16 %v87_v45, %v83_v42  ;;  %v89_v56 = vld [vmem:[%s6808_s2] sm:$0xff] }
  0x18   :  { %3306 = vmatprep.subr.bf16.mxu1 %v5251_v7  ;;  %v96_v49 = vld [vmem:[%s6808_s2 + $0x38] sm:$0xff]  ;;  %v5347_v55 = vpack.c.bf16 %v94_v47, %v90_v46  ;;  %v93_v58 = vld [vmem:[%s6808_s2 + $0x20] sm:$0xff]  ;;  %v91_v59 = vld [vmem:[%s6808_s2 + $0x10] sm:$0xff] }
  0x19   :  { %v5359_v60 = vpack.c.bf16 %v96_v49, %v92_v48  ;;  %v95_v61 = vld [vmem:[%s6808_s2 + $0x30] sm:$0xff]  ;;  %v98_v62 = vld [vmem:[%s6808_s2 + $0x48] sm:$0xff]  ;;  %v100_v5 = vld [vmem:[%s6808_s2 + $0x58] sm:$0xff]  ;;  %v5377_v10 = vpack.c.bf16 %v93_v58, %v89_v56 }
  0x1a   :  { %3276 = vmatpush1.bf16.msra.mxu0 %v5269_v16  ;;  %v102_v2 = vld [vmem:[%s6808_s2 + $0x68] sm:$0xff]  ;;  %v104_v6 = vld [vmem:[%s6808_s2 + $0x78] sm:$0xff]  ;;  %v5381_v11 = vpack.c.bf16 %v95_v61, %v91_v59  ;;  %v97_v14 = vld [vmem:[%s6808_s2 + $0x40] sm:$0xff] }
  0x1b   :  { %3308 = vmatpush1.bf16.msra.mxu1 %v5273_v19  ;;  %3278 = vmatprep.subr.bf16.mxu0 %v5275_v20  ;;  %v5383_v12 = vpack.c.bf16 %v102_v2, %v98_v62  ;;  %v101_v15 = vld [vmem:[%s6808_s2 + $0x60] sm:$0xff]  ;;  %v99_v21 = vld [vmem:[%s6808_s2 + $0x50] sm:$0xff]  ;;  %v5395_v23 = vpack.c.bf16 %v104_v6, %v100_v5  ;;  %v106_v28 = vld [vmem:[%s6808_s2 + $0x88] sm:$0xff] }
  0x1c   :  { %3310 = vmatprep.subr.bf16.mxu1 %v5287_v25  ;;  %v103_v24 = vld [vmem:[%s6808_s2 + $0x70] sm:$0xff]  ;;  %v110_v29 = vld [vmem:[%s6808_s2 + $0xa8] sm:$0xff]  ;;  %v108_v30 = vld [vmem:[%s6808_s2 + $0x98] sm:$0xff]  ;;  %v5415_v33 = vpack.c.bf16 %v101_v15, %v97_v14 }
  0x1d   :  { %v112_v32 = vld [vmem:[%s6808_s2 + $0xb8] sm:$0xff]  ;;  %v5419_v38 = vpack.c.bf16 %v103_v24, %v99_v21  ;;  %v5421_v41 = vpack.c.bf16 %v110_v29, %v106_v28  ;;  %v105_v42 = vld [vmem:[%s6808_s2 + $0x80] sm:$0xff]  ;;  %v107_v47 = vld [vmem:[%s6808_s2 + $0x90] sm:$0xff] }
  0x1e   :  { %3280 = vmatpush1.bf16.msra.mxu0 %v5305_v34  ;;  %v109_v45 = vld [vmem:[%s6808_s2 + $0xa0] sm:$0xff]  ;;  %v5430_v46 = vpack.c.bf16 %v112_v32, %v108_v30  ;;  %v111_v48 = vld [vmem:[%s6808_s2 + $0xb0] sm:$0xff]  ;;  %v114_v58 = vld [vmem:[%s6808_s2 + $0xc8] sm:$0xff] }
  0x1f   :  { %3312 = vmatpush1.bf16.msra.mxu1 %v5309_v36  ;;  %3282 = vmatprep.subr.bf16.mxu0 %v5311_v37  ;;  %v5441_v49 = vpack.c.bf16 %v109_v45, %v105_v42  ;;  %v5445_v56 = vpack.c.bf16 %v111_v48, %v107_v47  ;;  %v118_v59 = vld [vmem:[%s6808_s2 + $0xe8] sm:$0xff]  ;;  %v116_v61 = vld [vmem:[%s6808_s2 + $0xd8] sm:$0xff]  ;;  %v113_v5 = vld [vmem:[%s6808_s2 + $0xc0] sm:$0xff] }
  0x20   :  { %3314 = vmatprep.subr.bf16.mxu1 %v5323_v43  ;;  %v5459_v62 = vpack.c.bf16 %v118_v59, %v114_v58  ;;  %v120_v2 = vld [vmem:[%s6808_s2 + $0xf8] sm:$0xff]  ;;  %v117_v6 = vld [vmem:[%s6808_s2 + $0xe0] sm:$0xff]  ;;  %v115_v21 = vld [vmem:[%s6808_s2 + $0xd0] sm:$0xff] }
  0x21   :  { %v5470_v14 = vpack.c.bf16 %v120_v2, %v116_v61  ;;  %v5472_v15 = vpack.c.bf16 %v117_v6, %v113_v5  ;;  %v119_v24 = vld [vmem:[%s6808_s2 + $0xf0] sm:$0xff]  ;;  %v122_v29 = vld [vmem:[%s6808_s2 + $0x108] sm:$0xff]  ;;  %v124_v42 = vld [vmem:[%s6808_s2 + $0x118] sm:$0xff] }
  0x22   :  { %3284 = vmatpush1.bf16.msra.mxu0 %v5341_v50  ;;  %6940 = vst [vmem:[#allocation5_spill] sm:$0xff] %v5459_v62  ;;  %v5481_v28 = vpack.c.bf16 %v119_v24, %v115_v21  ;;  %v126_v30 = vld [vmem:[%s6808_s2 + $0x128] sm:$0xff]  ;;  %v128_v45 = vld [vmem:[%s6808_s2 + $0x138] sm:$0xff]  ;;  %v121_v47 = vld [vmem:[%s6808_s2 + $0x100] sm:$0xff] }
  0x23   :  { %3316 = vmatpush1.bf16.msra.mxu1 %v5345_v54  ;;  %3318 = vmatprep.subr.bf16.mxu0 %v5347_v55  ;;  %6941 = vst [vmem:[#allocation6_spill] sm:$0xff] %v5470_v14  ;;  %6942 = vst [vmem:[#allocation7_spill] sm:$0xff] %v5472_v15  ;;  %v5492_v32 = vpack.c.bf16 %v126_v30, %v122_v29  ;;  %v5503_v48 = vpack.c.bf16 %v128_v45, %v124_v42  ;;  %v125_v58 = vld [vmem:[%s6808_s2 + $0x120] sm:$0xff]  ;;  %v123_v59 = vld [vmem:[%s6808_s2 + $0x110] sm:$0xff] }
  0x24   :  { %3382 = vmatprep.subr.bf16.mxu1 %v5359_v60  ;;  %6943 = vst [vmem:[#allocation8_spill] sm:$0xff] %v5481_v28  ;;  %v127_v61 = vld [vmem:[%s6808_s2 + $0x130] sm:$0xff]  ;;  %v5515_v2 = vpack.c.bf16 %v125_v58, %v121_v47  ;;  %v130_v6 = vld [vmem:[%s6808_s2 + $0x148] sm:$0xff]  ;;  %v132_v24 = vld [vmem:[%s6808_s2 + $0x158] sm:$0xff] }
  0x25   :  { %305 = vmatmul.mubr.f32.vlgmr.msra.gmra.mrb[0].mxu0 %v6814_v3  ;;  %6944 = vst [vmem:[#allocation9_spill] sm:$0xff] %v5492_v32  ;;  %6945 = vst [vmem:[#allocation10_spill] sm:$0xff] %v5503_v48  ;;  %v5517_v5 = vpack.c.bf16 %v127_v61, %v123_v59  ;;  %v134_v21 = vld [vmem:[%s6808_s2 + $0x168] sm:$0xff]  ;;  %v136_v30 = vld [vmem:[%s6808_s2 + $0x178] sm:$0xff] }
  0x26   :  { %376 = vmatmul.mubr.f32.vlgmr.msra.gmra.mrb[0].mxu1 %v6814_v3  ;;  %3320 = vmatpush1.bf16.msra.mxu0 %v5377_v10  ;;  %6946 = vst [vmem:[#allocation11_spill] sm:$0xff] %v5515_v2  ;;  %v5531_v29 = vpack.c.bf16 %v134_v21, %v130_v6  ;;  %v129_v42 = vld [vmem:[%s6808_s2 + $0x140] sm:$0xff]  ;;  %v5542_v47 = vpack.c.bf16 %v136_v30, %v132_v24  ;;  %v131_v59 = vld [vmem:[%s6808_s2 + $0x150] sm:$0xff]  ;;  %v138_v21 = vld [vmem:[%s6808_s2 + $0x188] sm:$0xff] }
  0x27   :  { %3384 = vmatpush1.bf16.msra.mxu1 %v5381_v11  ;;  %3322 = vmatprep.subr.bf16.mxu0 %v5383_v12  ;;  %6947 = vst [vmem:[#allocation12_spill] sm:$0xff] %v5517_v5  ;;  %v133_v45 = vld [vmem:[%s6808_s2 + $0x160] sm:$0xff]  ;;  %v135_v61 = vld [vmem:[%s6808_s2 + $0x170] sm:$0xff]  ;;  %v142_v24 = vld [vmem:[%s6808_s2 + $0x1a8] sm:$0xff] }
  0x28   :  { %3386 = vmatprep.subr.bf16.mxu1 %v5395_v23  ;;  %489 = vmatprep.mubr.f32.mxu0 %v6814_v3  ;;  %6948 = vst [vmem:[#allocation13_spill] sm:$0xff] %v5531_v29  ;;  %6949 = vst [vmem:[#allocation14_spill] sm:$0xff] %v5542_v47  ;;  %v5544_v58 = vpack.c.bf16 %v133_v45, %v129_v42  ;;  %v5553_v6 = vpack.c.bf16 %v135_v61, %v131_v59  ;;  %v140_v30 = vld [vmem:[%s6808_s2 + $0x198] sm:$0xff]  ;;  %v137_v59 = vld [vmem:[%s6808_s2 + $0x180] sm:$0xff] }
  0x29   :  { %560 = vmatprep.mubr.f32.mxu1 %v6814_v3  ;;  %v5567_v42 = vpack.c.bf16 %v142_v24, %v138_v21  ;;  %v144_v45 = vld [vmem:[%s6808_s2 + $0x1b8] sm:$0xff]  ;;  %v141_v61 = vld [vmem:[%s6808_s2 + $0x1a0] sm:$0xff]  ;;  %v139_v21 = vld [vmem:[%s6808_s2 + $0x190] sm:$0xff] }
  0x2a   :  { %3324 = vmatpush1.bf16.msra.mxu0 %v5415_v33  ;;  %6950 = vst [vmem:[#allocation15_spill] sm:$0xff] %v5544_v58  ;;  %6951 = vst [vmem:[#allocation16_spill] sm:$0xff] %v5553_v6  ;;  %v5578_v3 = vpack.c.bf16 %v144_v45, %v140_v30  ;;  %v143_v24 = vld [vmem:[%s6808_s2 + $0x1b0] sm:$0xff]  ;;  %v146_v30 = vld [vmem:[%s6808_s2 + $0x1c8] sm:$0xff] }
  0x2b   :  { %3388 = vmatpush1.bf16.msra.mxu1 %v5419_v38  ;;  %3326 = vmatprep.subr.bf16.mxu0 %v5421_v41  ;;  %6952 = vst [vmem:[#allocation17_spill] sm:$0xff] %v5567_v42  ;;  %v150_v45 = vld [vmem:[%s6808_s2 + $0x1e8] sm:$0xff] }
  0x2c   :  { %3390 = vmatprep.subr.bf16.mxu1 %v5430_v46  ;;  %6953 = vst [vmem:[#allocation18_spill] sm:$0xff] %v5578_v3 }
  0x2e   :  { %3328 = vmatpush1.bf16.msra.mxu0 %v5441_v49 }
  0x2f   :  { %3392 = vmatpush1.bf16.msra.mxu1 %v5445_v56  ;;  %3330 = vmatprep.subr.bf16.mxu0 %v5459_v62 }
  0x30   :  { %3394 = vmatprep.subr.bf16.mxu1 %v5470_v14 }
  0x32   :  { %3332 = vmatpush1.bf16.msra.mxu0 %v5472_v15 }
  0x33   :  { %3396 = vmatpush1.bf16.msra.mxu1 %v5481_v28  ;;  %3334 = vmatprep.subr.bf16.mxu0 %v5492_v32 }
  0x34   :  { %3398 = vmatprep.subr.bf16.mxu1 %v5503_v48  ;;  %v209_v48 = vld [vmem:[%s6808_s2 + $0x3c0] sm:$0xff] }
  0x36   :  { %3336 = vmatpush1.bf16.msra.mxu0 %v5515_v2  ;;  %v216_v2 = vld [vmem:[%s6808_s2 + $0x3f8] sm:$0xff] }
  0x37   :  { %3400 = vmatpush1.bf16.msra.mxu1 %v5517_v5  ;;  %3338 = vmatprep.subr.bf16.mxu0 %v5531_v29 }
  0x38   :  { %3402 = vmatprep.subr.bf16.mxu1 %v5542_v47  ;;  %v5580_v47 = vpack.c.bf16 %v141_v61, %v137_v59  ;;  %v148_v59 = vld [vmem:[%s6808_s2 + $0x1d8] sm:$0xff]  ;;  %v5603_v61 = vpack.c.bf16 %v150_v45, %v146_v30  ;;  %v147_v30 = vld [vmem:[%s6808_s2 + $0x1d0] sm:$0xff] }
  0x39   :  { %v151_v45 = vld [vmem:[%s6808_s2 + $0x1f0] sm:$0xff] }
  0x3a   :  { %3340 = vmatpush1.bf16.msra.mxu0 %v5544_v58  ;;  %6954 = vst [vmem:[#allocation19_spill] sm:$0xff] %v5580_v47  ;;  %6956 = vst [vmem:[#allocation21_spill] sm:$0xff] %v5603_v61 }
  0x3b   :  { %3404 = vmatpush1.bf16.msra.mxu1 %v5553_v6  ;;  %3342 = vmatprep.subr.bf16.mxu0 %v5567_v42  ;;  %v5589_v6 = vpack.c.bf16 %v143_v24, %v139_v21  ;;  %v152_v21 = vld [vmem:[%s6808_s2 + $0x1f8] sm:$0xff]  ;;  %v145_v24 = vld [vmem:[%s6808_s2 + $0x1c0] sm:$0xff] }
  0x3c   :  { %3406 = vmatprep.subr.bf16.mxu1 %v5578_v3  ;;  %v149_v3 = vld [vmem:[%s6808_s2 + $0x1e0] sm:$0xff]  ;;  %v5614_v42 = vpack.c.bf16 %v152_v21, %v148_v59  ;;  %v154_v59 = vld [vmem:[%s6808_s2 + $0x208] sm:$0xff]  ;;  %v156_v21 = vld [vmem:[%s6808_s2 + $0x218] sm:$0xff] }
  0x3d   :  { %6955 = vst [vmem:[#allocation20_spill] sm:$0xff] %v5589_v6  ;;  %v5616_v58 = vpack.c.bf16 %v149_v3, %v145_v24  ;;  %v158_v3 = vld [vmem:[%s6808_s2 + $0x228] sm:$0xff] }
  0x3e   :  { %3344 = vmatpush1.bf16.msra.mxu0 %v5580_v47  ;;  %6957 = vst [vmem:[#allocation22_spill] sm:$0xff] %v5614_v42  ;;  %v5639_v24 = vpack.c.bf16 %v158_v3, %v154_v59  ;;  %v155_v59 = vld [vmem:[%s6808_s2 + $0x210] sm:$0xff] }
  0x3f   :  { %3408 = vmatpush1.bf16.msra.mxu1 %v5589_v6  ;;  %6958 = vst [vmem:[#allocation23_spill] sm:$0xff] %v5616_v58  ;;  %3346 = vmatprep.subr.bf16.mxu0 %v5603_v61  ;;  %v5625_v6 = vpack.c.bf16 %v151_v45, %v147_v30  ;;  %v160_v30 = vld [vmem:[%s6808_s2 + $0x238] sm:$0xff]  ;;  %v153_v45 = vld [vmem:[%s6808_s2 + $0x200] sm:$0xff]  ;;  %v159_v3 = vld [vmem:[%s6808_s2 + $0x230] sm:$0xff] }
  0x40   :  { %3410 = vmatprep.subr.bf16.mxu1 %v5614_v42  ;;  %6960 = vst [vmem:[#allocation25_spill] sm:$0xff] %v5639_v24  ;;  %v157_v42 = vld [vmem:[%s6808_s2 + $0x220] sm:$0xff]  ;;  %v5650_v61 = vpack.c.bf16 %v160_v30, %v156_v21  ;;  %v162_v21 = vld [vmem:[%s6808_s2 + $0x248] sm:$0xff]  ;;  %v164_v30 = vld [vmem:[%s6808_s2 + $0x258] sm:$0xff] }
  0x41   :  { %6959 = vst [vmem:[#allocation24_spill] sm:$0xff] %v5625_v6  ;;  %v5652_v47 = vpack.c.bf16 %v157_v42, %v153_v45  ;;  %v166_v42 = vld [vmem:[%s6808_s2 + $0x268] sm:$0xff] }
  0x42   :  { %3348 = vmatpush1.bf16.msra.mxu0 %v5616_v58  ;;  %6961 = vst [vmem:[#allocation26_spill] sm:$0xff] %v5650_v61  ;;  %v5675_v45 = vpack.c.bf16 %v166_v42, %v162_v21  ;;  %v163_v21 = vld [vmem:[%s6808_s2 + $0x250] sm:$0xff] }
  0x43   :  { %3412 = vmatpush1.bf16.msra.mxu1 %v5625_v6  ;;  %6962 = vst [vmem:[#allocation27_spill] sm:$0xff] %v5652_v47  ;;  %3350 = vmatprep.subr.bf16.mxu0 %v5639_v24  ;;  %v5661_v6 = vpack.c.bf16 %v159_v3, %v155_v59  ;;  %v168_v59 = vld [vmem:[%s6808_s2 + $0x278] sm:$0xff]  ;;  %v161_v3 = vld [vmem:[%s6808_s2 + $0x240] sm:$0xff]  ;;  %v167_v42 = vld [vmem:[%s6808_s2 + $0x270] sm:$0xff] }
  0x44   :  { %3414 = vmatprep.subr.bf16.mxu1 %v5650_v61  ;;  %6964 = vst [vmem:[#allocation29_spill] sm:$0xff] %v5675_v45  ;;  %v165_v61 = vld [vmem:[%s6808_s2 + $0x260] sm:$0xff]  ;;  %v5686_v24 = vpack.c.bf16 %v168_v59, %v164_v30  ;;  %v170_v30 = vld [vmem:[%s6808_s2 + $0x288] sm:$0xff]  ;;  %v172_v59 = vld [vmem:[%s6808_s2 + $0x298] sm:$0xff] }
  0x45   :  { %6963 = vst [vmem:[#allocation28_spill] sm:$0xff] %v5661_v6  ;;  %v5688_v58 = vpack.c.bf16 %v165_v61, %v161_v3  ;;  %v174_v61 = vld [vmem:[%s6808_s2 + $0x2a8] sm:$0xff] }
  0x46   :  { %3352 = vmatpush1.bf16.msra.mxu0 %v5652_v47  ;;  %6965 = vst [vmem:[#allocation30_spill] sm:$0xff] %v5686_v24  ;;  %v5711_v3 = vpack.c.bf16 %v174_v61, %v170_v30  ;;  %v171_v30 = vld [vmem:[%s6808_s2 + $0x290] sm:$0xff] }
  0x47   :  { %3416 = vmatpush1.bf16.msra.mxu1 %v5661_v6  ;;  %6966 = vst [vmem:[#allocation31_spill] sm:$0xff] %v5688_v58  ;;  %3354 = vmatprep.subr.bf16.mxu0 %v5675_v45  ;;  %v5697_v6 = vpack.c.bf16 %v167_v42, %v163_v21  ;;  %v176_v21 = vld [vmem:[%s6808_s2 + $0x2b8] sm:$0xff]  ;;  %v169_v42 = vld [vmem:[%s6808_s2 + $0x280] sm:$0xff]  ;;  %v175_v61 = vld [vmem:[%s6808_s2 + $0x2b0] sm:$0xff] }
  0x48   :  { %3418 = vmatprep.subr.bf16.mxu1 %v5686_v24  ;;  %6968 = vst [vmem:[#allocation33_spill] sm:$0xff] %v5711_v3  ;;  %v173_v24 = vld [vmem:[%s6808_s2 + $0x2a0] sm:$0xff]  ;;  %v5722_v45 = vpack.c.bf16 %v176_v21, %v172_v59  ;;  %v178_v59 = vld [vmem:[%s6808_s2 + $0x2c8] sm:$0xff]  ;;  %v180_v21 = vld [vmem:[%s6808_s2 + $0x2d8] sm:$0xff] }
  0x49   :  { %6967 = vst [vmem:[#allocation32_spill] sm:$0xff] %v5697_v6  ;;  %v5724_v47 = vpack.c.bf16 %v173_v24, %v169_v42  ;;  %v182_v24 = vld [vmem:[%s6808_s2 + $0x2e8] sm:$0xff] }
  0x4a   :  { %3356 = vmatpush1.bf16.msra.mxu0 %v5688_v58  ;;  %6969 = vst [vmem:[#allocation34_spill] sm:$0xff] %v5722_v45  ;;  %v5747_v42 = vpack.c.bf16 %v182_v24, %v178_v59  ;;  %v179_v59 = vld [vmem:[%s6808_s2 + $0x2d0] sm:$0xff] }
  0x4b   :  { %3420 = vmatpush1.bf16.msra.mxu1 %v5697_v6  ;;  %6970 = vst [vmem:[#allocation35_spill] sm:$0xff] %v5724_v47  ;;  %3358 = vmatprep.subr.bf16.mxu0 %v5711_v3  ;;  %v5733_v6 = vpack.c.bf16 %v175_v61, %v171_v30  ;;  %v184_v30 = vld [vmem:[%s6808_s2 + $0x2f8] sm:$0xff]  ;;  %v177_v61 = vld [vmem:[%s6808_s2 + $0x2c0] sm:$0xff]  ;;  %v183_v24 = vld [vmem:[%s6808_s2 + $0x2f0] sm:$0xff] }
  0x4c   :  { %3422 = vmatprep.subr.bf16.mxu1 %v5722_v45  ;;  %6972 = vst [vmem:[#allocation37_spill] sm:$0xff] %v5747_v42  ;;  %v181_v45 = vld [vmem:[%s6808_s2 + $0x2e0] sm:$0xff]  ;;  %v5758_v3 = vpack.c.bf16 %v184_v30, %v180_v21  ;;  %v186_v21 = vld [vmem:[%s6808_s2 + $0x308] sm:$0xff]  ;;  %v188_v30 = vld [vmem:[%s6808_s2 + $0x318] sm:$0xff] }
  0x4d   :  { %6971 = vst [vmem:[#allocation36_spill] sm:$0xff] %v5733_v6  ;;  %v5760_v58 = vpack.c.bf16 %v181_v45, %v177_v61  ;;  %v190_v45 = vld [vmem:[%s6808_s2 + $0x328] sm:$0xff] }
  0x4e   :  { %3360 = vmatpush1.bf16.msra.mxu0 %v5724_v47  ;;  %6973 = vst [vmem:[#allocation38_spill] sm:$0xff] %v5758_v3  ;;  %v5783_v61 = vpack.c.bf16 %v190_v45, %v186_v21  ;;  %v187_v21 = vld [vmem:[%s6808_s2 + $0x310] sm:$0xff] }
  0x4f   :  { %3424 = vmatpush1.bf16.msra.mxu1 %v5733_v6  ;;  %6974 = vst [vmem:[#allocation39_spill] sm:$0xff] %v5760_v58  ;;  %3362 = vmatprep.subr.bf16.mxu0 %v5747_v42  ;;  %v5769_v6 = vpack.c.bf16 %v183_v24, %v179_v59  ;;  %v192_v59 = vld [vmem:[%s6808_s2 + $0x338] sm:$0xff]  ;;  %v185_v24 = vld [vmem:[%s6808_s2 + $0x300] sm:$0xff]  ;;  %v191_v45 = vld [vmem:[%s6808_s2 + $0x330] sm:$0xff] }
  0x50   :  { %3426 = vmatprep.subr.bf16.mxu1 %v5758_v3  ;;  %6976 = vst [vmem:[#allocation41_spill] sm:$0xff] %v5783_v61  ;;  %v189_v3 = vld [vmem:[%s6808_s2 + $0x320] sm:$0xff]  ;;  %v5794_v42 = vpack.c.bf16 %v192_v59, %v188_v30  ;;  %v196_v30 = vld [vmem:[%s6808_s2 + $0x358] sm:$0xff] }
  0x51   :  { %6975 = vst [vmem:[#allocation40_spill] sm:$0xff] %v5769_v6  ;;  %v5796_v47 = vpack.c.bf16 %v189_v3, %v185_v24  ;;  %v198_v3 = vld [vmem:[%s6808_s2 + $0x368] sm:$0xff]  ;;  %v200_v59 = vld [vmem:[%s6808_s2 + $0x378] sm:$0xff] }
  0x52   :  { %3364 = vmatpush1.bf16.msra.mxu0 %v5760_v58  ;;  %6977 = vst [vmem:[#allocation42_spill] sm:$0xff] %v5794_v42  ;;  %v5808_v58 = vpack.c.bf16 %v191_v45, %v187_v21  ;;  %v5822_v29 = vpack.c.bf16 %v200_v59, %v196_v30  ;;  %v193_v21 = vld [vmem:[%s6808_s2 + $0x340] sm:$0xff]  ;;  %v202_v30 = vld [vmem:[%s6808_s2 + $0x388] sm:$0xff] }
  0x53   :  { %3428 = vmatpush1.bf16.msra.mxu1 %v5769_v6  ;;  %6978 = vst [vmem:[#allocation43_spill] sm:$0xff] %v5796_v47  ;;  %v194_v6 = vld [vmem:[%s6808_s2 + $0x348] sm:$0xff]  ;;  %3366 = vmatprep.subr.bf16.mxu0 %v5783_v61  ;;  %v197_v45 = vld [vmem:[%s6808_s2 + $0x360] sm:$0xff]  ;;  %v195_v61 = vld [vmem:[%s6808_s2 + $0x350] sm:$0xff] }
  0x54   :  { %6979 = vst [vmem:[#allocation44_spill] sm:$0xff] %v5808_v58  ;;  %3430 = vmatprep.subr.bf16.mxu1 %v5794_v42  ;;  %v5820_v24 = vpack.c.bf16 %v198_v3, %v194_v6  ;;  %6981 = vst [vmem:[#allocation46_spill] sm:$0xff] %v5822_v29  ;;  %v5835_v6 = vpack.c.bf16 %v197_v45, %v193_v21  ;;  %v199_v3 = vld [vmem:[%s6808_s2 + $0x370] sm:$0xff]  ;;  %v206_v59 = vld [vmem:[%s6808_s2 + $0x3a8] sm:$0xff] }
  0x55   :  { %v5850_v21 = vpack.c.bf16 %v206_v59, %v202_v30  ;;  %v204_v45 = vld [vmem:[%s6808_s2 + $0x398] sm:$0xff]  ;;  %v201_v42 = vld [vmem:[%s6808_s2 + $0x380] sm:$0xff]  ;;  %v207_v30 = vld [vmem:[%s6808_s2 + $0x3b0] sm:$0xff] }
  0x56   :  { %6980 = vst [vmem:[#allocation45_spill] sm:$0xff] %v5820_v24  ;;  %3368 = vmatpush1.bf16.msra.mxu0 %v5796_v47  ;;  %6982 = vst [vmem:[#allocation47_spill] sm:$0xff] %v5835_v6  ;;  %v5848_v47 = vpack.c.bf16 %v199_v3, %v195_v61  ;;  %v205_v61 = vld [vmem:[%s6808_s2 + $0x3a0] sm:$0xff]  ;;  %v203_v3 = vld [vmem:[%s6808_s2 + $0x390] sm:$0xff] }
  0x57   :  { %3432 = vmatpush1.bf16.msra.mxu1 %v5808_v58  ;;  %3370 = vmatprep.subr.bf16.mxu0 %v5820_v24  ;;  %6984 = vst [vmem:[#allocation49_spill] sm:$0xff] %v5850_v21  ;;  %v208_v58 = vld [vmem:[%s6808_s2 + $0x3b8] sm:$0xff]  ;;  %v210_v59 = vld [vmem:[%s6808_s2 + $0x3c8] sm:$0xff]  ;;  %v5885_v24 = vpack.c.bf16 %v207_v30, %v203_v3  ;;  %v215_v3 = vld [vmem:[%s6808_s2 + $0x3f0] sm:$0xff] }
  0x58   :  { %3434 = vmatprep.subr.bf16.mxu1 %v5822_v29  ;;  %6983 = vst [vmem:[#allocation48_spill] sm:$0xff] %v5848_v47  ;;  %v5861_v5 = vpack.c.bf16 %v208_v58, %v204_v45  ;;  %v214_v58 = vld [vmem:[%s6808_s2 + $0x3e8] sm:$0xff]  ;;  %v212_v45 = vld [vmem:[%s6808_s2 + $0x3d8] sm:$0xff]  ;;  %v5883_v29 = vpack.c.bf16 %v205_v61, %v201_v42  ;;  %v213_v42 = vld [vmem:[%s6808_s2 + $0x3e0] sm:$0xff] }
  0x59   :  { %6987 = vst [vmem:[#allocation52_spill] sm:$0xff] %v5885_v24  ;;  %v5895_v32 = vpack.c.bf16 %v214_v58, %v210_v59  ;;  %v211_v61 = vld [vmem:[%s6808_s2 + $0x3d0] sm:$0xff]  ;;  %v5910_v30 = vpack.c.bf16 %v213_v42, %v209_v48  ;;  %v219_v59 = vlaneseq  ;;  %v5010_v58 = vmov 1983009808  }
  0x5a   :  { %6985 = vst [vmem:[#allocation50_spill] sm:$0xff] %v5861_v5  ;;  %3372 = vmatpush1.bf16.msra.mxu0 %v5835_v6  ;;  %6986 = vst [vmem:[#allocation51_spill] sm:$0xff] %v5883_v29  ;;  %v5897_v6 = vpack.c.bf16 %v216_v2, %v212_v45  ;;  %v5912_v2 = vpack.c.bf16 %v215_v3, %v211_v61  ;;  %v389_v45 = vunpack.c.l.s4 %v5010_v58  ;;  %v239_v58 = vld [vmem:[%s6809_s0] sm:$0xff] }
  0x5b   :  { %3436 = vmatpush1.bf16.msra.mxu1 %v5848_v47  ;;  %3374 = vmatprep.subr.bf16.mxu0 %v5850_v21  ;;  %6988 = vst [vmem:[#allocation53_spill] sm:$0xff] %v5895_v32  ;;  %6990 = vst [vmem:[#allocation55_spill] sm:$0xff] %v5910_v30 }
  0x5c   :  { %3438 = vmatprep.subr.bf16.mxu1 %v5861_v5  ;;  %6989 = vst [vmem:[#allocation54_spill] sm:$0xff] %v5897_v6  ;;  %6991 = vst [vmem:[#allocation56_spill] sm:$0xff] %v5912_v2  ;;  %v390_v48 = vunpack.c.0.s8 %v389_v45 }
  0x5e   :  { %3376 = vmatpush1.bf16.msra.mxu0 %v5883_v29 }
  0x5f   :  { %3440 = vmatpush1.bf16.msra.mxu1 %v5885_v24  ;;  %3378 = vmatprep.subr.bf16.mxu0 %v5895_v32  ;;  %v5920_v24 = vshrl.u32 %v219_v59, 7 }
  0x60   :  { %3442 = vmatprep.subr.bf16.mxu1 %v5897_v6 }
  0x61   :  { %6992 = vst [vmem:[#allocation57_spill] sm:$0xff] %v5920_v24  ;;  %v5923_v61 = vsub.s32 %v390_v48, %v5920_v24 }
  0x62   :  { %3380 = vmatpush1.bf16.msra.mxu0 %v5910_v30 }
  0x63   :  { %3444 = vmatpush1.bf16.msra.mxu1 %v5912_v2  ;;  %3446 = vmatprep.subr.bf16.mxu0 %v5059_v4  ;;  %6993 = vst [vmem:[#allocation58_spill] sm:$0xff] %v5923_v61 }
  0x64   :  { %3478 = vmatprep.subr.bf16.mxu1 %v5070_v8 }
  0xf8   :  { %v306_v42 = vpop.f32.mrb[0].mxu0 }
  0xf9   :  { %v377_v3 = vpop.f32.mrb[0].mxu1  ;;  %v308_v6 = vpop.f32.mrb[1].mxu0 }
  0xfa   :  { %v386_v32 = vcombine.low %v306_v42, %v308_v6  ;;  %v379_v30 = vpop.f32.mrb[1].mxu1 }
  0xfb   :  { %v387_v29 = vcombine.low %v377_v3, %v379_v30 }
  0xfc   :  { %v394_v2 = vrot.slane %v386_v32, %v5923_v61 }
  0xfd   :  { %v401_v4 = vrot.slane %v387_v29, %v5923_v61 }
  0xff   :  { %v402_v59 = vcombine.low %v394_v2, %v401_v4  ;;  %v6997_v2 = vld [vmem:[#allocation11_spill] sm:$0xff] }
 0x101   :  { %v404_v8 = vadd.f32 %v402_v59, %v239_v58  ;;  %v6999_v58 = vld [vmem:[#allocation13_spill] sm:$0xff]  ;;  %v7000_v59 = vld [vmem:[#allocation14_spill] sm:$0xff] }
 0x103   :  { %v3161_v45 = vmul.f32 -1.442695, %v404_v8  ;;  %v412_v24 = vrot.slane %v404_v8, 6  ;;  %v6994_v8 = vmov 0.0  }
 0x105   :  { %4817 = vpow2.f32 %v3161_v45  ;;  %v7001_v45 = vld [vmem:[#allocation15_spill] sm:$0xff] }
 0x10f   :  { %v4818_v5 = vpop.eup %4817 }
 0x110   :  { %v408_v48 = vadd.f32 1.0, %v4818_v5  ;;  %v6995_v5 = vld [vmem:[#allocation9_spill] sm:$0xff] }
 0x112   :  { %4819 = vrcp.f32 %v408_v48  ;;  %v7002_v48 = vld [vmem:[#allocation16_spill] sm:$0xff] }
 0x113   :  { %4821 = vtanh.f32 %v412_v24  ;;  %v6996_v24 = vld [vmem:[#allocation10_spill] sm:$0xff] }
 0x11c   :  { %v4820_v6 = vpop.eup %4819 }
 0x11d   :  { %v416_v42 = vrot.slane %v4820_v6, 2  ;;  %v4822_v30 = vpop.eup %4821  ;;  %v422_v29 = vrot.slane %v4820_v6, 4 }
 0x11e   :  { %v419_v3 = vmul.f32 %v4822_v30, %v4820_v6  ;;  %v7003_v6 = vld [vmem:[#allocation17_spill] sm:$0xff]  ;;  %v7005_v30 = vld [vmem:[#allocation19_spill] sm:$0xff] }
 0x11f   :  { %v418_v32 = vmul.f32 0.0, %v416_v42  ;;  %v7004_v42 = vld [vmem:[#allocation18_spill] sm:$0xff] }
 0x121   :  { %v5930_v21 = vadd.f32 %v419_v3, %v418_v32  ;;  %v7006_v3 = vld [vmem:[#allocation20_spill] sm:$0xff]  ;;  %v7007_v32 = vld [vmem:[#allocation21_spill] sm:$0xff] }
 0x123   :  { %4823 = vtanh.f32 %v5930_v21 }
 0x12d   :  { %v4824_v61 = vpop.eup %4823 }
 0x12e   :  { %v424_v4 = vmul.f32 %v4824_v61, %v422_v29  ;;  %v6998_v61 = vld [vmem:[#allocation12_spill] sm:$0xff]  ;;  %v7008_v29 = vld [vmem:[#allocation22_spill] sm:$0xff] }
 0x130   :  { %490 = vmatmul.mubr.f32.vlgmr.msra.gmra.mrb[2].mxu0 %v424_v4  ;;  %561 = vmatmul.mubr.f32.vlgmr.msra.gmra.mrb[2].mxu1 %v424_v4 }
 0x131   :  { %3448 = vmatpush1.bf16.msra.mxu0 %v5072_v9  ;;  %3480 = vmatpush1.bf16.msra.mxu1 %v5084_v13 }
 0x132   :  { %3450 = vmatprep.subr.bf16.mxu0 %v5097_v17  ;;  %3482 = vmatprep.subr.bf16.mxu1 %v5099_v18 }
 0x133   :  { %657 = vmatprep.mubr.f32.mxu0 %v6994_v8  ;;  %728 = vmatprep.mubr.f32.mxu1 %v6994_v8 }
 0x135   :  { %3452 = vmatpush1.bf16.msra.mxu0 %v5111_v22  ;;  %3484 = vmatpush1.bf16.msra.mxu1 %v5124_v26 }
 0x136   :  { %3454 = vmatprep.subr.bf16.mxu0 %v5126_v27  ;;  %3486 = vmatprep.subr.bf16.mxu1 %v5137_v31 }
 0x139   :  { %3456 = vmatpush1.bf16.msra.mxu0 %v5149_v35  ;;  %3488 = vmatpush1.bf16.msra.mxu1 %v5162_v39 }
 0x13a   :  { %3458 = vmatprep.subr.bf16.mxu0 %v5164_v40  ;;  %3490 = vmatprep.subr.bf16.mxu1 %v5176_v44 }
 0x13d   :  { %3460 = vmatpush1.bf16.msra.mxu0 %v5197_v51  ;;  %3492 = vmatpush1.bf16.msra.mxu1 %v5201_v52 }
 0x13e   :  { %3462 = vmatprep.subr.bf16.mxu0 %v5203_v53  ;;  %3494 = vmatprep.subr.bf16.mxu1 %v5215_v57 }
 0x141   :  { %3464 = vmatpush1.bf16.msra.mxu0 %v5233_v63  ;;  %3496 = vmatpush1.bf16.msra.mxu1 %v5237_v0 }
 0x142   :  { %3466 = vmatprep.subr.bf16.mxu0 %v5239_v1  ;;  %3498 = vmatprep.subr.bf16.mxu1 %v5251_v7 }
 0x145   :  { %3468 = vmatpush1.bf16.msra.mxu0 %v5269_v16  ;;  %3500 = vmatpush1.bf16.msra.mxu1 %v5273_v19 }
 0x146   :  { %3470 = vmatprep.subr.bf16.mxu0 %v5275_v20  ;;  %3502 = vmatprep.subr.bf16.mxu1 %v5287_v25 }
 0x149   :  { %3472 = vmatpush1.bf16.msra.mxu0 %v5305_v34  ;;  %3504 = vmatpush1.bf16.msra.mxu1 %v5309_v36 }
 0x14a   :  { %3474 = vmatprep.subr.bf16.mxu0 %v5311_v37  ;;  %3506 = vmatprep.subr.bf16.mxu1 %v5323_v43 }
 0x14d   :  { %3476 = vmatpush1.bf16.msra.mxu0 %v5341_v50  ;;  %3508 = vmatpush1.bf16.msra.mxu1 %v5345_v54 }
 0x14e   :  { %3510 = vmatprep.subr.bf16.mxu0 %v5347_v55  ;;  %3574 = vmatprep.subr.bf16.mxu1 %v5359_v60 }
 0x150   :  { %658 = vmatmul.mubr.f32.vlgmr.msra.gmra.mrb[4].mxu0 %v424_v4  ;;  %729 = vmatmul.mubr.f32.vlgmr.msra.gmra.mrb[4].mxu1 %v424_v4  ;;  %v7009_v4 = vld [vmem:[#allocation23_spill] sm:$0xff] }
 0x151   :  { %3512 = vmatpush1.bf16.msra.mxu0 %v5377_v10  ;;  %3576 = vmatpush1.bf16.msra.mxu1 %v5381_v11 }
 0x152   :  { %3514 = vmatprep.subr.bf16.mxu0 %v5383_v12  ;;  %3578 = vmatprep.subr.bf16.mxu1 %v5395_v23 }
 0x155   :  { %3516 = vmatpush1.bf16.msra.mxu0 %v5415_v33  ;;  %3580 = vmatpush1.bf16.msra.mxu1 %v5419_v38 }
 0x156   :  { %3518 = vmatprep.subr.bf16.mxu0 %v5421_v41  ;;  %3582 = vmatprep.subr.bf16.mxu1 %v5430_v46 }
 0x159   :  { %3520 = vmatpush1.bf16.msra.mxu0 %v5441_v49  ;;  %3584 = vmatpush1.bf16.msra.mxu1 %v5445_v56 }
 0x15a   :  { %3522 = vmatprep.subr.bf16.mxu0 %v5459_v62  ;;  %3586 = vmatprep.subr.bf16.mxu1 %v5470_v14 }
 0x15d   :  { %3524 = vmatpush1.bf16.msra.mxu0 %v5472_v15  ;;  %3588 = vmatpush1.bf16.msra.mxu1 %v5481_v28 }
 0x15e   :  { %3526 = vmatprep.subr.bf16.mxu0 %v6995_v5  ;;  %3590 = vmatprep.subr.bf16.mxu1 %v6996_v24 }
 0x161   :  { %3528 = vmatpush1.bf16.msra.mxu0 %v6997_v2  ;;  %3592 = vmatpush1.bf16.msra.mxu1 %v6998_v61 }
 0x162   :  { %3530 = vmatprep.subr.bf16.mxu0 %v6999_v58  ;;  %3594 = vmatprep.subr.bf16.mxu1 %v7000_v59  ;;  %v7010_v58 = vld [vmem:[#allocation24_spill] sm:$0xff]  ;;  %v7011_v59 = vld [vmem:[#allocation25_spill] sm:$0xff] }
 0x165   :  { %3532 = vmatpush1.bf16.msra.mxu0 %v7001_v45  ;;  %3596 = vmatpush1.bf16.msra.mxu1 %v7002_v48  ;;  %v7012_v45 = vld [vmem:[#allocation26_spill] sm:$0xff]  ;;  %v7013_v48 = vld [vmem:[#allocation27_spill] sm:$0xff] }
 0x166   :  { %3534 = vmatprep.subr.bf16.mxu0 %v7003_v6  ;;  %3598 = vmatprep.subr.bf16.mxu1 %v7004_v42  ;;  %v7014_v6 = vld [vmem:[#allocation28_spill] sm:$0xff]  ;;  %v7015_v42 = vld [vmem:[#allocation29_spill] sm:$0xff] }
 0x169   :  { %3536 = vmatpush1.bf16.msra.mxu0 %v7005_v30  ;;  %3600 = vmatpush1.bf16.msra.mxu1 %v7006_v3  ;;  %v7016_v30 = vld [vmem:[#allocation30_spill] sm:$0xff]  ;;  %v7017_v3 = vld [vmem:[#allocation31_spill] sm:$0xff] }
 0x16a   :  { %3538 = vmatprep.subr.bf16.mxu0 %v7007_v32  ;;  %3602 = vmatprep.subr.bf16.mxu1 %v7008_v29  ;;  %v7018_v32 = vld [vmem:[#allocation32_spill] sm:$0xff]  ;;  %v7019_v29 = vld [vmem:[#allocation33_spill] sm:$0xff] }
 0x16d   :  { %3540 = vmatpush1.bf16.msra.mxu0 %v7009_v4  ;;  %3604 = vmatpush1.bf16.msra.mxu1 %v7010_v58  ;;  %v7020_v4 = vld [vmem:[#allocation34_spill] sm:$0xff]  ;;  %v7021_v58 = vld [vmem:[#allocation35_spill] sm:$0xff] }
 0x16e   :  { %3542 = vmatprep.subr.bf16.mxu0 %v7011_v59  ;;  %3606 = vmatprep.subr.bf16.mxu1 %v7012_v45  ;;  %v7022_v59 = vld [vmem:[#allocation36_spill] sm:$0xff]  ;;  %v7023_v45 = vld [vmem:[#allocation37_spill] sm:$0xff] }
 0x171   :  { %3544 = vmatpush1.bf16.msra.mxu0 %v7013_v48  ;;  %3608 = vmatpush1.bf16.msra.mxu1 %v7014_v6  ;;  %v7024_v48 = vld [vmem:[#allocation38_spill] sm:$0xff]  ;;  %v7025_v6 = vld [vmem:[#allocation39_spill] sm:$0xff] }
 0x172   :  { %3546 = vmatprep.subr.bf16.mxu0 %v7015_v42  ;;  %3610 = vmatprep.subr.bf16.mxu1 %v7016_v30  ;;  %v7026_v42 = vld [vmem:[#allocation40_spill] sm:$0xff]  ;;  %v7027_v30 = vld [vmem:[#allocation41_spill] sm:$0xff] }
 0x175   :  { %3548 = vmatpush1.bf16.msra.mxu0 %v7017_v3  ;;  %3612 = vmatpush1.bf16.msra.mxu1 %v7018_v32  ;;  %v7028_v3 = vld [vmem:[#allocation42_spill] sm:$0xff]  ;;  %v7029_v32 = vld [vmem:[#allocation43_spill] sm:$0xff] }
 0x176   :  { %3550 = vmatprep.subr.bf16.mxu0 %v7019_v29  ;;  %3614 = vmatprep.subr.bf16.mxu1 %v7020_v4  ;;  %v7030_v29 = vld [vmem:[#allocation44_spill] sm:$0xff]  ;;  %v7031_v4 = vld [vmem:[#allocation45_spill] sm:$0xff] }
 0x179   :  { %3552 = vmatpush1.bf16.msra.mxu0 %v7021_v58  ;;  %3616 = vmatpush1.bf16.msra.mxu1 %v7022_v59  ;;  %v7032_v58 = vld [vmem:[#allocation46_spill] sm:$0xff]  ;;  %v7033_v59 = vld [vmem:[#allocation47_spill] sm:$0xff] }
 0x17a   :  { %3554 = vmatprep.subr.bf16.mxu0 %v7023_v45  ;;  %3618 = vmatprep.subr.bf16.mxu1 %v7024_v48  ;;  %v7034_v48 = vld [vmem:[#allocation49_spill] sm:$0xff] }
 0x17d   :  { %3556 = vmatpush1.bf16.msra.mxu0 %v7025_v6  ;;  %3620 = vmatpush1.bf16.msra.mxu1 %v7026_v42  ;;  %v7035_v6 = vld [vmem:[#allocation50_spill] sm:$0xff]  ;;  %v7036_v42 = vld [vmem:[#allocation51_spill] sm:$0xff] }
 0x17e   :  { %3558 = vmatprep.subr.bf16.mxu0 %v7027_v30  ;;  %3622 = vmatprep.subr.bf16.mxu1 %v7028_v3  ;;  %v7037_v30 = vld [vmem:[#allocation52_spill] sm:$0xff]  ;;  %v7038_v3 = vld [vmem:[#allocation53_spill] sm:$0xff] }
 0x181   :  { %3560 = vmatpush1.bf16.msra.mxu0 %v7029_v32  ;;  %3624 = vmatpush1.bf16.msra.mxu1 %v7030_v29  ;;  %v7039_v32 = vld [vmem:[#allocation54_spill] sm:$0xff]  ;;  %v7040_v29 = vld [vmem:[#allocation55_spill] sm:$0xff] }
 0x182   :  { %3562 = vmatprep.subr.bf16.mxu0 %v7031_v4  ;;  %3626 = vmatprep.subr.bf16.mxu1 %v7032_v58  ;;  %v7041_v4 = vld [vmem:[#allocation56_spill] sm:$0xff]  ;;  %v7042_v58 = vld [vmem:[#allocation3_spill] sm:$0xff] }
 0x185   :  { %3564 = vmatpush1.bf16.msra.mxu0 %v7033_v59  ;;  %3628 = vmatpush1.bf16.msra.mxu1 %v5848_v47  ;;  %v7043_v59 = vld [vmem:[#allocation4_spill] sm:$0xff]  ;;  %v7044_v47 = vld [vmem:[#allocation57_spill] sm:$0xff] }
 0x186   :  { %3566 = vmatprep.subr.bf16.mxu0 %v7034_v48  ;;  %3630 = vmatprep.subr.bf16.mxu1 %v7035_v6  ;;  %v221_v48 = vsub.s32 0, %v7044_v47  ;;  %v233_v5 = vsub.s32 3, %v7044_v47 }
 0x189   :  { %3568 = vmatpush1.bf16.msra.mxu0 %v7036_v42  ;;  %3632 = vmatpush1.bf16.msra.mxu1 %v7037_v30  ;;  %v217_v42 = vld [vmem:[%s6810_s3] sm:$0xf]  ;;  %v225_v30 = vsub.s32 1, %v7044_v47 }
 0x18a   :  { %3570 = vmatprep.subr.bf16.mxu0 %v7038_v3  ;;  %3634 = vmatprep.subr.bf16.mxu1 %v7039_v32  ;;  %v6036_v6 = vrot.slane %v217_v42, %v221_v48  ;;  %v6046_v48 = vrot.slane %v217_v42, %v233_v5 }
 0x18b   :  { %v6038_v3 = vrot.slane %v217_v42, %v225_v30 }
 0x18c   :  { %7045 = vst [vmem:[#allocation57_spill] sm:$0xff] %v6036_v6 }
 0x18d   :  { %3572 = vmatpush1.bf16.msra.mxu0 %v7040_v29  ;;  %3636 = vmatpush1.bf16.msra.mxu1 %v7041_v4 }
 0x18e   :  { %3638 = vmatprep.subr.bf16.mxu0 %v7042_v58  ;;  %3670 = vmatprep.subr.bf16.mxu1 %v7043_v59  ;;  %v229_v58 = vsub.s32 2, %v7044_v47 }
 0x190   :  { %v6044_v28 = vrot.slane %v217_v42, %v229_v58 }
 0x192   :  { %7046 = vst [vmem:[#allocation59_spill] sm:$0xff] %v6044_v28 }
 0x203   :  { %v491_v32 = vpop.f32.mrb[2].mxu0  ;;  %v562_v29 = vpop.f32.mrb[2].mxu1 }
 0x204   :  { %v492_v4 = vadd.f32 %v491_v32, %v6036_v6  ;;  %v493_v45 = vpop.f32.mrb[3].mxu0  ;;  %v564_v59 = vpop.f32.mrb[3].mxu1  ;;  %v563_v30 = vadd.f32 %v562_v29, %v6044_v28 }
 0x205   :  { %v494_v61 = vadd.f32 %v493_v45, %v6038_v3  ;;  %v565_v32 = vadd.f32 %v564_v59, %v6046_v48 }
 0x206   :  { %v3162_v2 = vmul.f32 -1.442695, %v492_v4  ;;  %v3164_v6 = vmul.f32 -1.442695, %v563_v30 }
 0x207   :  { %v3163_v24 = vmul.f32 -1.442695, %v494_v61 }
 0x208   :  { %4825 = vpow2.f32 %v3162_v2 }
 0x209   :  { %4827 = vpow2.f32 %v3163_v24 }
 0x20a   :  { %4829 = vtanh.f32 %v565_v32 }
 0x20b   :  { %4831 = vpow2.f32 %v3164_v6 }
 0x212   :  { %v4826_v15 = vpop.eup %4825 }
 0x213   :  { %v576_v14 = vadd.f32 1.0, %v4826_v15  ;;  %v4828_v62 = vpop.eup %4827 }
 0x214   :  { %v577_v61 = vadd.f32 1.0, %v4828_v62  ;;  %v4830_v47 = vpop.eup %4829  ;;  %v7047_v62 = vld [vmem:[#allocation58_spill] sm:$0xff] }
 0x215   :  { %4833 = vrcp.f32 %v576_v14  ;;  %v4832_v2 = vpop.eup %4831 }
 0x216   :  { %4835 = vrcp.f32 %v577_v61  ;;  %v578_v5 = vadd.f32 1.0, %v4832_v2  ;;  %v3165_v61 = vld [vmem:[%s6809_s0 + $0x8] sm:$0xff] }
 0x218   :  { %4837 = vrcp.f32 %v578_v5 }
 0x21f   :  { %v4834_v58 = vpop.eup %4833 }
 0x220   :  { %v587_v45 = vmul.f32 %v4834_v58, %v4830_v47  ;;  %v4836_v24 = vpop.eup %4835 }
 0x221   :  { %v586_v42 = vmul.f32 0.0, %v4836_v24 }
 0x223   :  { %v659_v4 = vpop.f32.mrb[4].mxu0  ;;  %v730_v29 = vpop.f32.mrb[4].mxu1  ;;  %v6050_v28 = vadd.f32 %v587_v45, %v586_v42 }
 0x224   :  { %v661_v59 = vpop.f32.mrb[5].mxu0  ;;  %v732_v30 = vpop.f32.mrb[5].mxu1 }
 0x225   :  { %v739_v15 = vcombine.low %v659_v4, %v661_v59  ;;  %v740_v32 = vcombine.low %v730_v29, %v732_v30  ;;  %4839 = vtanh.f32 %v6050_v28  ;;  %v4838_v45 = vpop.eup %4837 }
 0x227   :  { %v747_v14 = vrot.slane %v739_v15, %v7047_v62  ;;  %v754_v6 = vrot.slane %v740_v32, %v7047_v62 }
 0x229   :  { %v755_v47 = vcombine.low %v747_v14, %v754_v6 }
 0x22b   :  { %v757_v2 = vadd.f32 %v3165_v61, %v755_v47 }
 0x22d   :  { %v3166_v58 = vmul.f32 -1.442695, %v757_v2  ;;  %v765_v29 = vrot.slane %v757_v2, 6  ;;  %v7050_v2 = vld [vmem:[#allocation7_spill] sm:$0xff] }
 0x22f   :  { %4841 = vpow2.f32 %v3166_v58  ;;  %v4840_v24 = vpop.eup %4839  ;;  %v7051_v58 = vld [vmem:[#allocation8_spill] sm:$0xff] }
 0x230   :  { %v590_v42 = vmul.f32 %v4840_v24, %v4838_v45  ;;  %v7052_v45 = vld [vmem:[#allocation9_spill] sm:$0xff]  ;;  %v7053_v24 = vld [vmem:[#allocation10_spill] sm:$0xff] }
 0x232   :  { %842 = vmatprep.mubr.f32.mxu0 %v590_v42  ;;  %913 = vmatprep.mubr.f32.mxu1 %v590_v42  ;;  %v7054_v42 = vld [vmem:[#allocation11_spill] sm:$0xff] }
 0x239   :  { %v4842_v5 = vpop.eup %4841 }
 0x23a   :  { %v761_v4 = vadd.f32 1.0, %v4842_v5  ;;  %v7055_v5 = vld [vmem:[#allocation12_spill] sm:$0xff] }
 0x23c   :  { %4843 = vrcp.f32 %v761_v4  ;;  %v7056_v4 = vld [vmem:[#allocation13_spill] sm:$0xff] }
 0x23d   :  { %4845 = vtanh.f32 %v765_v29  ;;  %v7057_v29 = vld [vmem:[#allocation14_spill] sm:$0xff] }
 0x246   :  { %v4844_v59 = vpop.eup %4843 }
 0x247   :  { %v769_v30 = vrot.slane %v4844_v59, 2  ;;  %v4846_v15 = vpop.eup %4845  ;;  %v775_v6 = vrot.slane %v4844_v59, 4 }
 0x248   :  { %v772_v32 = vmul.f32 %v4846_v15, %v4844_v59  ;;  %v7058_v59 = vld [vmem:[#allocation15_spill] sm:$0xff]  ;;  %v7060_v15 = vld [vmem:[#allocation17_spill] sm:$0xff] }
 0x249   :  { %v771_v62 = vmul.f32 %v769_v30, %v5930_v21  ;;  %v7048_v21 = vld [vmem:[#allocation5_spill] sm:$0xff]  ;;  %v7059_v30 = vld [vmem:[#allocation16_spill] sm:$0xff] }
 0x24b   :  { %v6059_v14 = vadd.f32 %v772_v32, %v771_v62  ;;  %v7049_v62 = vld [vmem:[#allocation6_spill] sm:$0xff] }
 0x24c   :  { %v7061_v32 = vld [vmem:[#allocation18_spill] sm:$0xff] }
 0x24d   :  { %4847 = vtanh.f32 %v6059_v14 }
 0x257   :  { %v4848_v61 = vpop.eup %4847 }
 0x258   :  { %v777_v47 = vmul.f32 %v4848_v61, %v775_v6  ;;  %v7062_v6 = vld [vmem:[#allocation19_spill] sm:$0xff]  ;;  %v7063_v61 = vld [vmem:[#allocation20_spill] sm:$0xff] }
 0x25a   :  { %843 = vmatmul.mubr.f32.vlgmr.msra.gmra.mrb[6].mxu0 %v777_v47  ;;  %914 = vmatmul.mubr.f32.vlgmr.msra.gmra.mrb[6].mxu1 %v777_v47 }
 0x25b   :  { %3640 = vmatpush1.bf16.msra.mxu0 %v5072_v9  ;;  %3672 = vmatpush1.bf16.msra.mxu1 %v5084_v13 }
 0x25c   :  { %3642 = vmatprep.subr.bf16.mxu0 %v5097_v17  ;;  %3674 = vmatprep.subr.bf16.mxu1 %v5099_v18 }
 0x25d   :  { %1010 = vmatprep.mubr.f32.mxu0 %v6994_v8  ;;  %1081 = vmatprep.mubr.f32.mxu1 %v6994_v8 }
 0x25f   :  { %3644 = vmatpush1.bf16.msra.mxu0 %v5111_v22  ;;  %3676 = vmatpush1.bf16.msra.mxu1 %v5124_v26 }
 0x260   :  { %3646 = vmatprep.subr.bf16.mxu0 %v5126_v27  ;;  %3678 = vmatprep.subr.bf16.mxu1 %v5137_v31 }
 0x263   :  { %3648 = vmatpush1.bf16.msra.mxu0 %v5149_v35  ;;  %3680 = vmatpush1.bf16.msra.mxu1 %v5162_v39 }
 0x264   :  { %3650 = vmatprep.subr.bf16.mxu0 %v5164_v40  ;;  %3682 = vmatprep.subr.bf16.mxu1 %v5176_v44 }
 0x267   :  { %3652 = vmatpush1.bf16.msra.mxu0 %v5197_v51  ;;  %3684 = vmatpush1.bf16.msra.mxu1 %v5201_v52 }
 0x268   :  { %3654 = vmatprep.subr.bf16.mxu0 %v5203_v53  ;;  %3686 = vmatprep.subr.bf16.mxu1 %v5215_v57 }
 0x26b   :  { %3656 = vmatpush1.bf16.msra.mxu0 %v5233_v63  ;;  %3688 = vmatpush1.bf16.msra.mxu1 %v5237_v0 }
 0x26c   :  { %3658 = vmatprep.subr.bf16.mxu0 %v5239_v1  ;;  %3690 = vmatprep.subr.bf16.mxu1 %v5251_v7 }
 0x26f   :  { %3660 = vmatpush1.bf16.msra.mxu0 %v5269_v16  ;;  %3692 = vmatpush1.bf16.msra.mxu1 %v5273_v19 }
 0x270   :  { %3662 = vmatprep.subr.bf16.mxu0 %v5275_v20  ;;  %3694 = vmatprep.subr.bf16.mxu1 %v5287_v25 }
 0x273   :  { %3664 = vmatpush1.bf16.msra.mxu0 %v5305_v34  ;;  %3696 = vmatpush1.bf16.msra.mxu1 %v5309_v36 }
 0x274   :  { %3666 = vmatprep.subr.bf16.mxu0 %v5311_v37  ;;  %3698 = vmatprep.subr.bf16.mxu1 %v5323_v43 }
 0x277   :  { %3668 = vmatpush1.bf16.msra.mxu0 %v5341_v50  ;;  %3700 = vmatpush1.bf16.msra.mxu1 %v5345_v54 }
 0x278   :  { %3702 = vmatprep.subr.bf16.mxu0 %v5347_v55  ;;  %3766 = vmatprep.subr.bf16.mxu1 %v5359_v60 }
 0x27a   :  { %1011 = vmatmul.mubr.f32.vlgmr.msra.gmra.mrb[8].mxu0 %v777_v47  ;;  %1082 = vmatmul.mubr.f32.vlgmr.msra.gmra.mrb[8].mxu1 %v777_v47  ;;  %v7064_v47 = vld [vmem:[#allocation21_spill] sm:$0xff] }
 0x27b   :  { %3704 = vmatpush1.bf16.msra.mxu0 %v5377_v10  ;;  %3768 = vmatpush1.bf16.msra.mxu1 %v5381_v11 }
 0x27c   :  { %3706 = vmatprep.subr.bf16.mxu0 %v5383_v12  ;;  %3770 = vmatprep.subr.bf16.mxu1 %v5395_v23 }
 0x27f   :  { %3708 = vmatpush1.bf16.msra.mxu0 %v5415_v33  ;;  %3772 = vmatpush1.bf16.msra.mxu1 %v5419_v38 }
 0x280   :  { %3710 = vmatprep.subr.bf16.mxu0 %v5421_v41  ;;  %3774 = vmatprep.subr.bf16.mxu1 %v5430_v46 }
 0x283   :  { %3712 = vmatpush1.bf16.msra.mxu0 %v5441_v49  ;;  %3776 = vmatpush1.bf16.msra.mxu1 %v5445_v56 }
 0x284   :  { %3714 = vmatprep.subr.bf16.mxu0 %v7048_v21  ;;  %3778 = vmatprep.subr.bf16.mxu1 %v7049_v62 }
 0x287   :  { %3716 = vmatpush1.bf16.msra.mxu0 %v7050_v2  ;;  %3780 = vmatpush1.bf16.msra.mxu1 %v7051_v58 }
 0x288   :  { %3718 = vmatprep.subr.bf16.mxu0 %v7052_v45  ;;  %3782 = vmatprep.subr.bf16.mxu1 %v7053_v24  ;;  %v7102_v24 = vld [vmem:[#allocation57_spill] sm:$0xff] }
 0x28b   :  { %3720 = vmatpush1.bf16.msra.mxu0 %v7054_v42  ;;  %3784 = vmatpush1.bf16.msra.mxu1 %v7055_v5  ;;  %v7065_v42 = vld [vmem:[#allocation22_spill] sm:$0xff]  ;;  %v7066_v5 = vld [vmem:[#allocation23_spill] sm:$0xff] }
 0x28c   :  { %3722 = vmatprep.subr.bf16.mxu0 %v7056_v4  ;;  %3786 = vmatprep.subr.bf16.mxu1 %v7057_v29  ;;  %v7067_v4 = vld [vmem:[#allocation24_spill] sm:$0xff]  ;;  %v7068_v29 = vld [vmem:[#allocation25_spill] sm:$0xff] }
 0x28f   :  { %3724 = vmatpush1.bf16.msra.mxu0 %v7058_v59  ;;  %3788 = vmatpush1.bf16.msra.mxu1 %v7059_v30  ;;  %v7069_v59 = vld [vmem:[#allocation26_spill] sm:$0xff]  ;;  %v7070_v30 = vld [vmem:[#allocation27_spill] sm:$0xff] }
 0x290   :  { %3726 = vmatprep.subr.bf16.mxu0 %v7060_v15  ;;  %3790 = vmatprep.subr.bf16.mxu1 %v7061_v32  ;;  %v7071_v15 = vld [vmem:[#allocation28_spill] sm:$0xff]  ;;  %v7072_v32 = vld [vmem:[#allocation29_spill] sm:$0xff] }
 0x293   :  { %3728 = vmatpush1.bf16.msra.mxu0 %v7062_v6  ;;  %3792 = vmatpush1.bf16.msra.mxu1 %v7063_v61  ;;  %v7073_v6 = vld [vmem:[#allocation30_spill] sm:$0xff]  ;;  %v7074_v61 = vld [vmem:[#allocation31_spill] sm:$0xff] }
 0x294   :  { %3730 = vmatprep.subr.bf16.mxu0 %v7064_v47  ;;  %3794 = vmatprep.subr.bf16.mxu1 %v7065_v42  ;;  %v7075_v47 = vld [vmem:[#allocation32_spill] sm:$0xff]  ;;  %v7076_v42 = vld [vmem:[#allocation33_spill] sm:$0xff] }
 0x297   :  { %3732 = vmatpush1.bf16.msra.mxu0 %v7066_v5  ;;  %3796 = vmatpush1.bf16.msra.mxu1 %v7067_v4  ;;  %v7077_v5 = vld [vmem:[#allocation34_spill] sm:$0xff]  ;;  %v7078_v4 = vld [vmem:[#allocation35_spill] sm:$0xff] }
 0x298   :  { %3734 = vmatprep.subr.bf16.mxu0 %v7068_v29  ;;  %3798 = vmatprep.subr.bf16.mxu1 %v7069_v59  ;;  %v7079_v29 = vld [vmem:[#allocation36_spill] sm:$0xff]  ;;  %v7080_v59 = vld [vmem:[#allocation37_spill] sm:$0xff] }
 0x29b   :  { %3736 = vmatpush1.bf16.msra.mxu0 %v7070_v30  ;;  %3800 = vmatpush1.bf16.msra.mxu1 %v7071_v15  ;;  %v7081_v30 = vld [vmem:[#allocation38_spill] sm:$0xff]  ;;  %v7082_v15 = vld [vmem:[#allocation39_spill] sm:$0xff] }
 0x29c   :  { %3738 = vmatprep.subr.bf16.mxu0 %v7072_v32  ;;  %3802 = vmatprep.subr.bf16.mxu1 %v7073_v6  ;;  %v7083_v32 = vld [vmem:[#allocation40_spill] sm:$0xff]  ;;  %v7084_v6 = vld [vmem:[#allocation41_spill] sm:$0xff] }
 0x29f   :  { %3740 = vmatpush1.bf16.msra.mxu0 %v7074_v61  ;;  %3804 = vmatpush1.bf16.msra.mxu1 %v7075_v47  ;;  %v7085_v61 = vld [vmem:[#allocation42_spill] sm:$0xff]  ;;  %v7086_v47 = vld [vmem:[#allocation43_spill] sm:$0xff] }
 0x2a0   :  { %3742 = vmatprep.subr.bf16.mxu0 %v7076_v42  ;;  %3806 = vmatprep.subr.bf16.mxu1 %v7077_v5  ;;  %v7087_v42 = vld [vmem:[#allocation44_spill] sm:$0xff]  ;;  %v7088_v5 = vld [vmem:[#allocation45_spill] sm:$0xff] }
 0x2a3   :  { %3744 = vmatpush1.bf16.msra.mxu0 %v7078_v4  ;;  %3808 = vmatpush1.bf16.msra.mxu1 %v7079_v29  ;;  %v7089_v4 = vld [vmem:[#allocation46_spill] sm:$0xff]  ;;  %v7090_v29 = vld [vmem:[#allocation47_spill] sm:$0xff] }
 0x2a4   :  { %3746 = vmatprep.subr.bf16.mxu0 %v7080_v59  ;;  %3810 = vmatprep.subr.bf16.mxu1 %v7081_v30  ;;  %v7091_v59 = vld [vmem:[#allocation48_spill] sm:$0xff]  ;;  %v7092_v30 = vld [vmem:[#allocation49_spill] sm:$0xff] }
 0x2a7   :  { %3748 = vmatpush1.bf16.msra.mxu0 %v7082_v15  ;;  %3812 = vmatpush1.bf16.msra.mxu1 %v7083_v32  ;;  %v7093_v15 = vld [vmem:[#allocation50_spill] sm:$0xff]  ;;  %v7094_v32 = vld [vmem:[#allocation51_spill] sm:$0xff] }
 0x2a8   :  { %3750 = vmatprep.subr.bf16.mxu0 %v7084_v6  ;;  %3814 = vmatprep.subr.bf16.mxu1 %v7085_v61  ;;  %v7095_v6 = vld [vmem:[#allocation52_spill] sm:$0xff]  ;;  %v7096_v61 = vld [vmem:[#allocation53_spill] sm:$0xff] }
 0x2ab   :  { %3752 = vmatpush1.bf16.msra.mxu0 %v7086_v47  ;;  %3816 = vmatpush1.bf16.msra.mxu1 %v7087_v42  ;;  %v7097_v47 = vld [vmem:[#allocation54_spill] sm:$0xff]  ;;  %v7098_v42 = vld [vmem:[#allocation55_spill] sm:$0xff] }
 0x2ac   :  { %3754 = vmatprep.subr.bf16.mxu0 %v7088_v5  ;;  %3818 = vmatprep.subr.bf16.mxu1 %v7089_v4  ;;  %v7099_v5 = vld [vmem:[#allocation56_spill] sm:$0xff]  ;;  %v7100_v4 = vld [vmem:[#allocation3_spill] sm:$0xff] }
 0x2af   :  { %3756 = vmatpush1.bf16.msra.mxu0 %v7090_v29  ;;  %3820 = vmatpush1.bf16.msra.mxu1 %v7091_v59  ;;  %v7101_v29 = vld [vmem:[#allocation4_spill] sm:$0xff] }
 0x2b0   :  { %3758 = vmatprep.subr.bf16.mxu0 %v7092_v30  ;;  %3822 = vmatprep.subr.bf16.mxu1 %v7093_v15 }
 0x2b3   :  { %3760 = vmatpush1.bf16.msra.mxu0 %v7094_v32  ;;  %3824 = vmatpush1.bf16.msra.mxu1 %v7095_v6 }
 0x2b4   :  { %3762 = vmatprep.subr.bf16.mxu0 %v7096_v61  ;;  %3826 = vmatprep.subr.bf16.mxu1 %v7097_v47  ;;  %v7103_v47 = vld [vmem:[#allocation59_spill] sm:$0xff] }
 0x2b7   :  { %3764 = vmatpush1.bf16.msra.mxu0 %v7098_v42  ;;  %3828 = vmatpush1.bf16.msra.mxu1 %v7099_v5 }
 0x2b8   :  { %3830 = vmatprep.subr.bf16.mxu0 %v7100_v4  ;;  %3862 = vmatprep.subr.bf16.mxu1 %v7101_v29 }
 0x32d   :  { %v844_v59 = vpop.f32.mrb[6].mxu0  ;;  %v915_v30 = vpop.f32.mrb[6].mxu1 }
 0x32e   :  { %v845_v15 = vadd.f32 %v844_v59, %v7102_v24  ;;  %v846_v45 = vpop.f32.mrb[7].mxu0  ;;  %v917_v32 = vpop.f32.mrb[7].mxu1  ;;  %v916_v42 = vadd.f32 %v915_v30, %v7103_v47 }
 0x32f   :  { %v847_v6 = vadd.f32 %v846_v45, %v6038_v3  ;;  %v918_v5 = vadd.f32 %v917_v32, %v6046_v48 }
 0x330   :  { %v3167_v58 = vmul.f32 -1.442695, %v845_v15  ;;  %v3169_v2 = vmul.f32 -1.442695, %v916_v42 }
 0x331   :  { %v3168_v61 = vmul.f32 -1.442695, %v847_v6 }
 0x332   :  { %4849 = vpow2.f32 %v3167_v58 }
 0x333   :  { %4851 = vpow2.f32 %v3168_v61 }
 0x334   :  { %4853 = vtanh.f32 %v918_v5 }
 0x335   :  { %4855 = vpow2.f32 %v3169_v2 }
 0x33c   :  { %v4850_v4 = vpop.eup %4849 }
 0x33d   :  { %v929_v62 = vadd.f32 1.0, %v4850_v4  ;;  %v4852_v29 = vpop.eup %4851 }
 0x33e   :  { %v930_v59 = vadd.f32 1.0, %v4852_v29  ;;  %v4854_v24 = vpop.eup %4853 }
 0x33f   :  { %4857 = vrcp.f32 %v929_v62  ;;  %v4856_v21 = vpop.eup %4855  ;;  %v7104_v62 = vld [vmem:[#allocation58_spill] sm:$0xff] }
 0x340   :  { %4859 = vrcp.f32 %v930_v59  ;;  %v931_v58 = vadd.f32 1.0, %v4856_v21  ;;  %v3170_v21 = vld [vmem:[%s6809_s0 + $0x10] sm:$0xff] }
 0x342   :  { %4861 = vrcp.f32 %v931_v58 }
 0x349   :  { %v4858_v45 = vpop.eup %4857 }
 0x34a   :  { %v940_v15 = vmul.f32 %v4858_v45, %v4854_v24  ;;  %v4860_v6 = vpop.eup %4859 }
 0x34b   :  { %v939_v61 = vmul.f32 %v4860_v6, %v6050_v28 }
 0x34d   :  { %v1012_v30 = vpop.f32.mrb[8].mxu0  ;;  %v1083_v47 = vpop.f32.mrb[8].mxu1  ;;  %v6165_v32 = vadd.f32 %v940_v15, %v939_v61 }
 0x34e   :  { %v1014_v42 = vpop.f32.mrb[9].mxu0  ;;  %v1085_v4 = vpop.f32.mrb[9].mxu1 }
 0x34f   :  { %v1092_v5 = vcombine.low %v1012_v30, %v1014_v42  ;;  %v1093_v2 = vcombine.low %v1083_v47, %v1085_v4  ;;  %4863 = vtanh.f32 %v6165_v32  ;;  %v4862_v15 = vpop.eup %4861 }
 0x351   :  { %v1100_v29 = vrot.slane %v1092_v5, %v7104_v62  ;;  %v1107_v59 = vrot.slane %v1093_v2, %v7104_v62 }
 0x353   :  { %v1108_v28 = vcombine.low %v1100_v29, %v1107_v59 }
 0x355   :  { %v1110_v24 = vadd.f32 %v3170_v21, %v1108_v28 }
 0x357   :  { %v3171_v45 = vmul.f32 -1.442695, %v1110_v24  ;;  %v1118_v30 = vrot.slane %v1110_v24, 6  ;;  %v7107_v24 = vld [vmem:[#allocation7_spill] sm:$0xff] }
 0x359   :  { %4865 = vpow2.f32 %v3171_v45  ;;  %v4864_v6 = vpop.eup %4863  ;;  %v7108_v45 = vld [vmem:[#allocation8_spill] sm:$0xff] }
 0x35a   :  { %v943_v61 = vmul.f32 %v4864_v6, %v4862_v15  ;;  %v7109_v15 = vld [vmem:[#allocation9_spill] sm:$0xff]  ;;  %v7110_v6 = vld [vmem:[#allocation10_spill] sm:$0xff] }
 0x35c   :  { %1195 = vmatprep.mubr.f32.mxu0 %v943_v61  ;;  %1266 = vmatprep.mubr.f32.mxu1 %v943_v61  ;;  %v7111_v61 = vld [vmem:[#allocation11_spill] sm:$0xff] }
 0x363   :  { %v4866_v47 = vpop.eup %4865 }
 0x364   :  { %v1114_v58 = vadd.f32 1.0, %v4866_v47  ;;  %v7112_v47 = vld [vmem:[#allocation12_spill] sm:$0xff] }
 0x366   :  { %4867 = vrcp.f32 %v1114_v58  ;;  %v7113_v58 = vld [vmem:[#allocation13_spill] sm:$0xff] }
 0x367   :  { %4869 = vtanh.f32 %v1118_v30  ;;  %v7114_v30 = vld [vmem:[#allocation14_spill] sm:$0xff] }
 0x370   :  { %v4868_v42 = vpop.eup %4867 }
 0x371   :  { %v1122_v4 = vrot.slane %v4868_v42, 2  ;;  %v4870_v5 = vpop.eup %4869  ;;  %v1128_v59 = vrot.slane %v4868_v42, 4 }
 0x372   :  { %v1125_v2 = vmul.f32 %v4870_v5, %v4868_v42  ;;  %v7115_v42 = vld [vmem:[#allocation15_spill] sm:$0xff]  ;;  %v7117_v5 = vld [vmem:[#allocation17_spill] sm:$0xff] }
 0x373   :  { %v1124_v62 = vmul.f32 %v1122_v4, %v6059_v14  ;;  %v7105_v14 = vld [vmem:[#allocation5_spill] sm:$0xff]  ;;  %v7116_v4 = vld [vmem:[#allocation16_spill] sm:$0xff] }
 0x375   :  { %v6174_v29 = vadd.f32 %v1125_v2, %v1124_v62  ;;  %v7106_v62 = vld [vmem:[#allocation6_spill] sm:$0xff] }
 0x376   :  { %v7118_v2 = vld [vmem:[#allocation18_spill] sm:$0xff] }
 0x377   :  { %4871 = vtanh.f32 %v6174_v29 }
 0x381   :  { %v4872_v21 = vpop.eup %4871 }
 0x382   :  { %v1130_v28 = vmul.f32 %v4872_v21, %v1128_v59  ;;  %v7119_v59 = vld [vmem:[#allocation19_spill] sm:$0xff]  ;;  %v7120_v21 = vld [vmem:[#allocation20_spill] sm:$0xff] }
 0x384   :  { %1196 = vmatmul.mubr.f32.vlgmr.msra.gmra.mrb[10].mxu0 %v1130_v28  ;;  %1267 = vmatmul.mubr.f32.vlgmr.msra.gmra.mrb[10].mxu1 %v1130_v28 }
 0x385   :  { %3832 = vmatpush1.bf16.msra.mxu0 %v5072_v9  ;;  %3864 = vmatpush1.bf16.msra.mxu1 %v5084_v13 }
 0x386   :  { %3834 = vmatprep.subr.bf16.mxu0 %v5097_v17  ;;  %3866 = vmatprep.subr.bf16.mxu1 %v5099_v18 }
 0x387   :  { %1363 = vmatprep.mubr.f32.mxu0 %v6994_v8  ;;  %1434 = vmatprep.mubr.f32.mxu1 %v6994_v8 }
 0x389   :  { %3836 = vmatpush1.bf16.msra.mxu0 %v5111_v22  ;;  %3868 = vmatpush1.bf16.msra.mxu1 %v5124_v26 }
 0x38a   :  { %3838 = vmatprep.subr.bf16.mxu0 %v5126_v27  ;;  %3870 = vmatprep.subr.bf16.mxu1 %v5137_v31 }
 0x38d   :  { %3840 = vmatpush1.bf16.msra.mxu0 %v5149_v35  ;;  %3872 = vmatpush1.bf16.msra.mxu1 %v5162_v39 }
 0x38e   :  { %3842 = vmatprep.subr.bf16.mxu0 %v5164_v40  ;;  %3874 = vmatprep.subr.bf16.mxu1 %v5176_v44 }
 0x391   :  { %3844 = vmatpush1.bf16.msra.mxu0 %v5197_v51  ;;  %3876 = vmatpush1.bf16.msra.mxu1 %v5201_v52 }
 0x392   :  { %3846 = vmatprep.subr.bf16.mxu0 %v5203_v53  ;;  %3878 = vmatprep.subr.bf16.mxu1 %v5215_v57 }
 0x395   :  { %3848 = vmatpush1.bf16.msra.mxu0 %v5233_v63  ;;  %3880 = vmatpush1.bf16.msra.mxu1 %v5237_v0 }
 0x396   :  { %3850 = vmatprep.subr.bf16.mxu0 %v5239_v1  ;;  %3882 = vmatprep.subr.bf16.mxu1 %v5251_v7 }
 0x399   :  { %3852 = vmatpush1.bf16.msra.mxu0 %v5269_v16  ;;  %3884 = vmatpush1.bf16.msra.mxu1 %v5273_v19 }
 0x39a   :  { %3854 = vmatprep.subr.bf16.mxu0 %v5275_v20  ;;  %3886 = vmatprep.subr.bf16.mxu1 %v5287_v25 }
 0x39d   :  { %3856 = vmatpush1.bf16.msra.mxu0 %v5305_v34  ;;  %3888 = vmatpush1.bf16.msra.mxu1 %v5309_v36 }
 0x39e   :  { %3858 = vmatprep.subr.bf16.mxu0 %v5311_v37  ;;  %3890 = vmatprep.subr.bf16.mxu1 %v5323_v43 }
 0x3a1   :  { %3860 = vmatpush1.bf16.msra.mxu0 %v5341_v50  ;;  %3892 = vmatpush1.bf16.msra.mxu1 %v5345_v54 }
 0x3a2   :  { %3894 = vmatprep.subr.bf16.mxu0 %v5347_v55  ;;  %3958 = vmatprep.subr.bf16.mxu1 %v5359_v60 }
 0x3a4   :  { %1364 = vmatmul.mubr.f32.vlgmr.msra.gmra.mrb[12].mxu0 %v1130_v28  ;;  %1435 = vmatmul.mubr.f32.vlgmr.msra.gmra.mrb[12].mxu1 %v1130_v28  ;;  %v7121_v28 = vld [vmem:[#allocation21_spill] sm:$0xff] }
 0x3a5   :  { %3896 = vmatpush1.bf16.msra.mxu0 %v5377_v10  ;;  %3960 = vmatpush1.bf16.msra.mxu1 %v5381_v11 }
 0x3a6   :  { %3898 = vmatprep.subr.bf16.mxu0 %v5383_v12  ;;  %3962 = vmatprep.subr.bf16.mxu1 %v5395_v23 }
 0x3a9   :  { %3900 = vmatpush1.bf16.msra.mxu0 %v5415_v33  ;;  %3964 = vmatpush1.bf16.msra.mxu1 %v5419_v38 }
 0x3aa   :  { %3902 = vmatprep.subr.bf16.mxu0 %v5421_v41  ;;  %3966 = vmatprep.subr.bf16.mxu1 %v5430_v46 }
 0x3ad   :  { %3904 = vmatpush1.bf16.msra.mxu0 %v5441_v49  ;;  %3968 = vmatpush1.bf16.msra.mxu1 %v5445_v56 }
 0x3ae   :  { %3906 = vmatprep.subr.bf16.mxu0 %v7105_v14  ;;  %3970 = vmatprep.subr.bf16.mxu1 %v7106_v62 }
 0x3b1   :  { %3908 = vmatpush1.bf16.msra.mxu0 %v7107_v24  ;;  %3972 = vmatpush1.bf16.msra.mxu1 %v7108_v45 }
 0x3b2   :  { %3910 = vmatprep.subr.bf16.mxu0 %v7109_v15  ;;  %3974 = vmatprep.subr.bf16.mxu1 %v7110_v6  ;;  %v7159_v6 = vld [vmem:[#allocation57_spill] sm:$0xff] }
 0x3b5   :  { %3912 = vmatpush1.bf16.msra.mxu0 %v7111_v61  ;;  %3976 = vmatpush1.bf16.msra.mxu1 %v7112_v47  ;;  %v7122_v61 = vld [vmem:[#allocation22_spill] sm:$0xff]  ;;  %v7123_v47 = vld [vmem:[#allocation23_spill] sm:$0xff] }
 0x3b6   :  { %3914 = vmatprep.subr.bf16.mxu0 %v7113_v58  ;;  %3978 = vmatprep.subr.bf16.mxu1 %v7114_v30  ;;  %v7124_v58 = vld [vmem:[#allocation24_spill] sm:$0xff]  ;;  %v7125_v30 = vld [vmem:[#allocation25_spill] sm:$0xff] }
 0x3b9   :  { %3916 = vmatpush1.bf16.msra.mxu0 %v7115_v42  ;;  %3980 = vmatpush1.bf16.msra.mxu1 %v7116_v4  ;;  %v7126_v42 = vld [vmem:[#allocation26_spill] sm:$0xff]  ;;  %v7127_v4 = vld [vmem:[#allocation27_spill] sm:$0xff] }
 0x3ba   :  { %3918 = vmatprep.subr.bf16.mxu0 %v7117_v5  ;;  %3982 = vmatprep.subr.bf16.mxu1 %v7118_v2  ;;  %v7128_v5 = vld [vmem:[#allocation28_spill] sm:$0xff]  ;;  %v7129_v2 = vld [vmem:[#allocation29_spill] sm:$0xff] }
 0x3bd   :  { %3920 = vmatpush1.bf16.msra.mxu0 %v7119_v59  ;;  %3984 = vmatpush1.bf16.msra.mxu1 %v7120_v21  ;;  %v7130_v59 = vld [vmem:[#allocation30_spill] sm:$0xff]  ;;  %v7131_v21 = vld [vmem:[#allocation31_spill] sm:$0xff] }
 0x3be   :  { %3922 = vmatprep.subr.bf16.mxu0 %v7121_v28  ;;  %3986 = vmatprep.subr.bf16.mxu1 %v7122_v61  ;;  %v7132_v28 = vld [vmem:[#allocation32_spill] sm:$0xff]  ;;  %v7133_v61 = vld [vmem:[#allocation33_spill] sm:$0xff] }
 0x3c1   :  { %3924 = vmatpush1.bf16.msra.mxu0 %v7123_v47  ;;  %3988 = vmatpush1.bf16.msra.mxu1 %v7124_v58  ;;  %v7134_v47 = vld [vmem:[#allocation34_spill] sm:$0xff]  ;;  %v7135_v58 = vld [vmem:[#allocation35_spill] sm:$0xff] }
 0x3c2   :  { %3926 = vmatprep.subr.bf16.mxu0 %v7125_v30  ;;  %3990 = vmatprep.subr.bf16.mxu1 %v7126_v42  ;;  %v7136_v30 = vld [vmem:[#allocation36_spill] sm:$0xff]  ;;  %v7137_v42 = vld [vmem:[#allocation37_spill] sm:$0xff] }
 0x3c5   :  { %3928 = vmatpush1.bf16.msra.mxu0 %v7127_v4  ;;  %3992 = vmatpush1.bf16.msra.mxu1 %v7128_v5  ;;  %v7138_v4 = vld [vmem:[#allocation38_spill] sm:$0xff]  ;;  %v7139_v5 = vld [vmem:[#allocation39_spill] sm:$0xff] }
 0x3c6   :  { %3930 = vmatprep.subr.bf16.mxu0 %v7129_v2  ;;  %3994 = vmatprep.subr.bf16.mxu1 %v7130_v59  ;;  %v7140_v2 = vld [vmem:[#allocation40_spill] sm:$0xff]  ;;  %v7141_v59 = vld [vmem:[#allocation41_spill] sm:$0xff] }
 0x3c9   :  { %3932 = vmatpush1.bf16.msra.mxu0 %v7131_v21  ;;  %3996 = vmatpush1.bf16.msra.mxu1 %v7132_v28  ;;  %v7142_v21 = vld [vmem:[#allocation42_spill] sm:$0xff]  ;;  %v7143_v28 = vld [vmem:[#allocation43_spill] sm:$0xff] }
 0x3ca   :  { %3934 = vmatprep.subr.bf16.mxu0 %v7133_v61  ;;  %3998 = vmatprep.subr.bf16.mxu1 %v7134_v47  ;;  %v7144_v61 = vld [vmem:[#allocation44_spill] sm:$0xff]  ;;  %v7145_v47 = vld [vmem:[#allocation45_spill] sm:$0xff] }
 0x3cd   :  { %3936 = vmatpush1.bf16.msra.mxu0 %v7135_v58  ;;  %4000 = vmatpush1.bf16.msra.mxu1 %v7136_v30  ;;  %v7146_v58 = vld [vmem:[#allocation46_spill] sm:$0xff]  ;;  %v7147_v30 = vld [vmem:[#allocation47_spill] sm:$0xff] }
 0x3ce   :  { %3938 = vmatprep.subr.bf16.mxu0 %v7137_v42  ;;  %4002 = vmatprep.subr.bf16.mxu1 %v7138_v4  ;;  %v7148_v42 = vld [vmem:[#allocation48_spill] sm:$0xff]  ;;  %v7149_v4 = vld [vmem:[#allocation49_spill] sm:$0xff] }
 0x3d1   :  { %3940 = vmatpush1.bf16.msra.mxu0 %v7139_v5  ;;  %4004 = vmatpush1.bf16.msra.mxu1 %v7140_v2  ;;  %v7150_v5 = vld [vmem:[#allocation50_spill] sm:$0xff]  ;;  %v7151_v2 = vld [vmem:[#allocation51_spill] sm:$0xff] }
 0x3d2   :  { %3942 = vmatprep.subr.bf16.mxu0 %v7141_v59  ;;  %4006 = vmatprep.subr.bf16.mxu1 %v7142_v21  ;;  %v7152_v59 = vld [vmem:[#allocation52_spill] sm:$0xff]  ;;  %v7153_v21 = vld [vmem:[#allocation53_spill] sm:$0xff] }
 0x3d5   :  { %3944 = vmatpush1.bf16.msra.mxu0 %v7143_v28  ;;  %4008 = vmatpush1.bf16.msra.mxu1 %v7144_v61  ;;  %v7154_v28 = vld [vmem:[#allocation54_spill] sm:$0xff]  ;;  %v7155_v61 = vld [vmem:[#allocation55_spill] sm:$0xff] }
 0x3d6   :  { %3946 = vmatprep.subr.bf16.mxu0 %v7145_v47  ;;  %4010 = vmatprep.subr.bf16.mxu1 %v7146_v58  ;;  %v7156_v47 = vld [vmem:[#allocation56_spill] sm:$0xff]  ;;  %v7157_v58 = vld [vmem:[#allocation3_spill] sm:$0xff] }
 0x3d9   :  { %3948 = vmatpush1.bf16.msra.mxu0 %v7147_v30  ;;  %4012 = vmatpush1.bf16.msra.mxu1 %v7148_v42  ;;  %v7158_v30 = vld [vmem:[#allocation4_spill] sm:$0xff] }
 0x3da   :  { %3950 = vmatprep.subr.bf16.mxu0 %v7149_v4  ;;  %4014 = vmatprep.subr.bf16.mxu1 %v7150_v5 }
 0x3dd   :  { %3952 = vmatpush1.bf16.msra.mxu0 %v7151_v2  ;;  %4016 = vmatpush1.bf16.msra.mxu1 %v7152_v59 }
 0x3de   :  { %3954 = vmatprep.subr.bf16.mxu0 %v7153_v21  ;;  %4018 = vmatprep.subr.bf16.mxu1 %v7154_v28  ;;  %v7160_v28 = vld [vmem:[#allocation59_spill] sm:$0xff] }
 0x3e1   :  { %3956 = vmatpush1.bf16.msra.mxu0 %v7155_v61  ;;  %4020 = vmatpush1.bf16.msra.mxu1 %v7156_v47 }
 0x3e2   :  { %4022 = vmatprep.subr.bf16.mxu0 %v7157_v58  ;;  %4054 = vmatprep.subr.bf16.mxu1 %v7158_v30 }
 0x457   :  { %v1197_v42 = vpop.f32.mrb[10].mxu0  ;;  %v1268_v4 = vpop.f32.mrb[10].mxu1 }
 0x458   :  { %v1198_v5 = vadd.f32 %v1197_v42, %v7159_v6  ;;  %v1199_v15 = vpop.f32.mrb[11].mxu0  ;;  %v1270_v2 = vpop.f32.mrb[11].mxu1  ;;  %v1269_v61 = vadd.f32 %v1268_v4, %v7160_v28 }
 0x459   :  { %v1200_v59 = vadd.f32 %v1199_v15, %v6038_v3  ;;  %v1271_v47 = vadd.f32 %v1270_v2, %v6046_v48 }
 0x45a   :  { %v3172_v45 = vmul.f32 -1.442695, %v1198_v5  ;;  %v3174_v24 = vmul.f32 -1.442695, %v1269_v61 }
 0x45b   :  { %v3173_v21 = vmul.f32 -1.442695, %v1200_v59 }
 0x45c   :  { %4873 = vpow2.f32 %v3172_v45 }
 0x45d   :  { %4875 = vpow2.f32 %v3173_v21 }
 0x45e   :  { %4877 = vtanh.f32 %v1271_v47 }
 0x45f   :  { %4879 = vpow2.f32 %v3174_v24 }
 0x466   :  { %v4874_v58 = vpop.eup %4873 }
 0x467   :  { %v1282_v62 = vadd.f32 1.0, %v4874_v58  ;;  %v4876_v30 = vpop.eup %4875 }
 0x468   :  { %v1283_v42 = vadd.f32 1.0, %v4876_v30  ;;  %v4878_v6 = vpop.eup %4877 }
 0x469   :  { %4881 = vrcp.f32 %v1282_v62  ;;  %v4880_v14 = vpop.eup %4879  ;;  %v7161_v62 = vld [vmem:[#allocation58_spill] sm:$0xff] }
 0x46a   :  { %4883 = vrcp.f32 %v1283_v42  ;;  %v1284_v45 = vadd.f32 1.0, %v4880_v14  ;;  %v3175_v14 = vld [vmem:[%s6809_s0 + $0x18] sm:$0xff] }
 0x46c   :  { %4885 = vrcp.f32 %v1284_v45 }
 0x473   :  { %v4882_v15 = vpop.eup %4881 }
 0x474   :  { %v1293_v5 = vmul.f32 %v4882_v15, %v4878_v6  ;;  %v4884_v59 = vpop.eup %4883 }
 0x475   :  { %v1292_v21 = vmul.f32 %v4884_v59, %v6165_v32 }
 0x477   :  { %v1365_v4 = vpop.f32.mrb[12].mxu0  ;;  %v1436_v28 = vpop.f32.mrb[12].mxu1  ;;  %v6280_v2 = vadd.f32 %v1293_v5, %v1292_v21 }
 0x478   :  { %v1367_v61 = vpop.f32.mrb[13].mxu0  ;;  %v1438_v58 = vpop.f32.mrb[13].mxu1 }
 0x479   :  { %v1445_v47 = vcombine.low %v1365_v4, %v1367_v61  ;;  %v1446_v24 = vcombine.low %v1436_v28, %v1438_v58  ;;  %4887 = vtanh.f32 %v6280_v2  ;;  %v4886_v5 = vpop.eup %4885 }
 0x47b   :  { %v1453_v30 = vrot.slane %v1445_v47, %v7161_v62  ;;  %v1460_v42 = vrot.slane %v1446_v24, %v7161_v62 }
 0x47d   :  { %v1461_v32 = vcombine.low %v1453_v30, %v1460_v42 }
 0x47f   :  { %v1463_v6 = vadd.f32 %v3175_v14, %v1461_v32 }
 0x481   :  { %v3176_v15 = vmul.f32 -1.442695, %v1463_v6  ;;  %v1471_v4 = vrot.slane %v1463_v6, 6  ;;  %v7164_v6 = vld [vmem:[#allocation7_spill] sm:$0xff] }
 0x483   :  { %4889 = vpow2.f32 %v3176_v15  ;;  %v4888_v59 = vpop.eup %4887  ;;  %v7165_v15 = vld [vmem:[#allocation8_spill] sm:$0xff] }
 0x484   :  { %v1296_v21 = vmul.f32 %v4888_v59, %v4886_v5  ;;  %v7166_v5 = vld [vmem:[#allocation9_spill] sm:$0xff]  ;;  %v7167_v59 = vld [vmem:[#allocation10_spill] sm:$0xff] }
 0x486   :  { %1548 = vmatprep.mubr.f32.mxu0 %v1296_v21  ;;  %1619 = vmatprep.mubr.f32.mxu1 %v1296_v21  ;;  %v7168_v21 = vld [vmem:[#allocation11_spill] sm:$0xff] }
 0x48d   :  { %v4890_v28 = vpop.eup %4889 }
 0x48e   :  { %v1467_v45 = vadd.f32 1.0, %v4890_v28  ;;  %v7169_v28 = vld [vmem:[#allocation12_spill] sm:$0xff] }
 0x490   :  { %4891 = vrcp.f32 %v1467_v45  ;;  %v7170_v45 = vld [vmem:[#allocation13_spill] sm:$0xff] }
 0x491   :  { %4893 = vtanh.f32 %v1471_v4  ;;  %v7171_v4 = vld [vmem:[#allocation14_spill] sm:$0xff] }
 0x49a   :  { %v4892_v61 = vpop.eup %4891 }
 0x49b   :  { %v1475_v58 = vrot.slane %v4892_v61, 2  ;;  %v4894_v47 = vpop.eup %4893  ;;  %v1481_v42 = vrot.slane %v4892_v61, 4 }
 0x49c   :  { %v1478_v24 = vmul.f32 %v4894_v47, %v4892_v61  ;;  %v7172_v61 = vld [vmem:[#allocation15_spill] sm:$0xff]  ;;  %v7174_v47 = vld [vmem:[#allocation17_spill] sm:$0xff] }
 0x49d   :  { %v1477_v62 = vmul.f32 %v1475_v58, %v6174_v29  ;;  %v7162_v29 = vld [vmem:[#allocation5_spill] sm:$0xff]  ;;  %v7173_v58 = vld [vmem:[#allocation16_spill] sm:$0xff] }
 0x49f   :  { %v6289_v30 = vadd.f32 %v1478_v24, %v1477_v62  ;;  %v7163_v62 = vld [vmem:[#allocation6_spill] sm:$0xff] }
 0x4a0   :  { %v7175_v24 = vld [vmem:[#allocation18_spill] sm:$0xff] }
 0x4a1   :  { %4895 = vtanh.f32 %v6289_v30 }
 0x4ab   :  { %v4896_v14 = vpop.eup %4895 }
 0x4ac   :  { %v1483_v32 = vmul.f32 %v4896_v14, %v1481_v42  ;;  %v7176_v42 = vld [vmem:[#allocation19_spill] sm:$0xff]  ;;  %v7177_v14 = vld [vmem:[#allocation20_spill] sm:$0xff] }
 0x4ae   :  { %1549 = vmatmul.mubr.f32.vlgmr.msra.gmra.mrb[14].mxu0 %v1483_v32  ;;  %1620 = vmatmul.mubr.f32.vlgmr.msra.gmra.mrb[14].mxu1 %v1483_v32 }
 0x4af   :  { %4024 = vmatpush1.bf16.msra.mxu0 %v5072_v9  ;;  %4056 = vmatpush1.bf16.msra.mxu1 %v5084_v13 }
 0x4b0   :  { %4026 = vmatprep.subr.bf16.mxu0 %v5097_v17  ;;  %4058 = vmatprep.subr.bf16.mxu1 %v5099_v18 }
 0x4b1   :  { %1716 = vmatprep.mubr.f32.mxu0 %v6994_v8  ;;  %1787 = vmatprep.mubr.f32.mxu1 %v6994_v8 }
 0x4b3   :  { %4028 = vmatpush1.bf16.msra.mxu0 %v5111_v22  ;;  %4060 = vmatpush1.bf16.msra.mxu1 %v5124_v26 }
 0x4b4   :  { %4030 = vmatprep.subr.bf16.mxu0 %v5126_v27  ;;  %4062 = vmatprep.subr.bf16.mxu1 %v5137_v31 }
 0x4b7   :  { %4032 = vmatpush1.bf16.msra.mxu0 %v5149_v35  ;;  %4064 = vmatpush1.bf16.msra.mxu1 %v5162_v39 }
 0x4b8   :  { %4034 = vmatprep.subr.bf16.mxu0 %v5164_v40  ;;  %4066 = vmatprep.subr.bf16.mxu1 %v5176_v44 }
 0x4bb   :  { %4036 = vmatpush1.bf16.msra.mxu0 %v5197_v51  ;;  %4068 = vmatpush1.bf16.msra.mxu1 %v5201_v52 }
 0x4bc   :  { %4038 = vmatprep.subr.bf16.mxu0 %v5203_v53  ;;  %4070 = vmatprep.subr.bf16.mxu1 %v5215_v57 }
 0x4bf   :  { %4040 = vmatpush1.bf16.msra.mxu0 %v5233_v63  ;;  %4072 = vmatpush1.bf16.msra.mxu1 %v5237_v0 }
 0x4c0   :  { %4042 = vmatprep.subr.bf16.mxu0 %v5239_v1  ;;  %4074 = vmatprep.subr.bf16.mxu1 %v5251_v7 }
 0x4c3   :  { %4044 = vmatpush1.bf16.msra.mxu0 %v5269_v16  ;;  %4076 = vmatpush1.bf16.msra.mxu1 %v5273_v19 }
 0x4c4   :  { %4046 = vmatprep.subr.bf16.mxu0 %v5275_v20  ;;  %4078 = vmatprep.subr.bf16.mxu1 %v5287_v25 }
 0x4c7   :  { %4048 = vmatpush1.bf16.msra.mxu0 %v5305_v34  ;;  %4080 = vmatpush1.bf16.msra.mxu1 %v5309_v36 }
 0x4c8   :  { %4050 = vmatprep.subr.bf16.mxu0 %v5311_v37  ;;  %4082 = vmatprep.subr.bf16.mxu1 %v5323_v43 }
 0x4cb   :  { %4052 = vmatpush1.bf16.msra.mxu0 %v5341_v50  ;;  %4084 = vmatpush1.bf16.msra.mxu1 %v5345_v54 }
 0x4cc   :  { %4086 = vmatprep.subr.bf16.mxu0 %v5347_v55  ;;  %4150 = vmatprep.subr.bf16.mxu1 %v5359_v60 }
 0x4ce   :  { %1717 = vmatmul.mubr.f32.vlgmr.msra.gmra.mrb[16].mxu0 %v1483_v32  ;;  %1788 = vmatmul.mubr.f32.vlgmr.msra.gmra.mrb[16].mxu1 %v1483_v32  ;;  %v7178_v32 = vld [vmem:[#allocation21_spill] sm:$0xff] }
 0x4cf   :  { %4088 = vmatpush1.bf16.msra.mxu0 %v5377_v10  ;;  %4152 = vmatpush1.bf16.msra.mxu1 %v5381_v11 }
 0x4d0   :  { %4090 = vmatprep.subr.bf16.mxu0 %v5383_v12  ;;  %4154 = vmatprep.subr.bf16.mxu1 %v5395_v23 }
 0x4d3   :  { %4092 = vmatpush1.bf16.msra.mxu0 %v5415_v33  ;;  %4156 = vmatpush1.bf16.msra.mxu1 %v5419_v38 }
 0x4d4   :  { %4094 = vmatprep.subr.bf16.mxu0 %v5421_v41  ;;  %4158 = vmatprep.subr.bf16.mxu1 %v5430_v46 }
 0x4d7   :  { %4096 = vmatpush1.bf16.msra.mxu0 %v5441_v49  ;;  %4160 = vmatpush1.bf16.msra.mxu1 %v5445_v56 }
 0x4d8   :  { %4098 = vmatprep.subr.bf16.mxu0 %v7162_v29  ;;  %4162 = vmatprep.subr.bf16.mxu1 %v7163_v62 }
 0x4db   :  { %4100 = vmatpush1.bf16.msra.mxu0 %v7164_v6  ;;  %4164 = vmatpush1.bf16.msra.mxu1 %v7165_v15 }
 0x4dc   :  { %4102 = vmatprep.subr.bf16.mxu0 %v7166_v5  ;;  %4166 = vmatprep.subr.bf16.mxu1 %v7167_v59  ;;  %v7216_v59 = vld [vmem:[#allocation57_spill] sm:$0xff] }
 0x4df   :  { %4104 = vmatpush1.bf16.msra.mxu0 %v7168_v21  ;;  %4168 = vmatpush1.bf16.msra.mxu1 %v7169_v28  ;;  %v7179_v21 = vld [vmem:[#allocation22_spill] sm:$0xff]  ;;  %v7180_v28 = vld [vmem:[#allocation23_spill] sm:$0xff] }
 0x4e0   :  { %4106 = vmatprep.subr.bf16.mxu0 %v7170_v45  ;;  %4170 = vmatprep.subr.bf16.mxu1 %v7171_v4  ;;  %v7181_v45 = vld [vmem:[#allocation24_spill] sm:$0xff]  ;;  %v7182_v4 = vld [vmem:[#allocation25_spill] sm:$0xff] }
 0x4e3   :  { %4108 = vmatpush1.bf16.msra.mxu0 %v7172_v61  ;;  %4172 = vmatpush1.bf16.msra.mxu1 %v7173_v58  ;;  %v7183_v61 = vld [vmem:[#allocation26_spill] sm:$0xff]  ;;  %v7184_v58 = vld [vmem:[#allocation27_spill] sm:$0xff] }
 0x4e4   :  { %4110 = vmatprep.subr.bf16.mxu0 %v7174_v47  ;;  %4174 = vmatprep.subr.bf16.mxu1 %v7175_v24  ;;  %v7185_v47 = vld [vmem:[#allocation28_spill] sm:$0xff]  ;;  %v7186_v24 = vld [vmem:[#allocation29_spill] sm:$0xff] }
 0x4e7   :  { %4112 = vmatpush1.bf16.msra.mxu0 %v7176_v42  ;;  %4176 = vmatpush1.bf16.msra.mxu1 %v7177_v14  ;;  %v7187_v42 = vld [vmem:[#allocation30_spill] sm:$0xff]  ;;  %v7188_v14 = vld [vmem:[#allocation31_spill] sm:$0xff] }
 0x4e8   :  { %4114 = vmatprep.subr.bf16.mxu0 %v7178_v32  ;;  %4178 = vmatprep.subr.bf16.mxu1 %v7179_v21  ;;  %v7189_v32 = vld [vmem:[#allocation32_spill] sm:$0xff]  ;;  %v7190_v21 = vld [vmem:[#allocation33_spill] sm:$0xff] }
 0x4eb   :  { %4116 = vmatpush1.bf16.msra.mxu0 %v7180_v28  ;;  %4180 = vmatpush1.bf16.msra.mxu1 %v7181_v45  ;;  %v7191_v28 = vld [vmem:[#allocation34_spill] sm:$0xff]  ;;  %v7192_v45 = vld [vmem:[#allocation35_spill] sm:$0xff] }
 0x4ec   :  { %4118 = vmatprep.subr.bf16.mxu0 %v7182_v4  ;;  %4182 = vmatprep.subr.bf16.mxu1 %v7183_v61  ;;  %v7193_v4 = vld [vmem:[#allocation36_spill] sm:$0xff]  ;;  %v7194_v61 = vld [vmem:[#allocation37_spill] sm:$0xff] }
 0x4ef   :  { %4120 = vmatpush1.bf16.msra.mxu0 %v7184_v58  ;;  %4184 = vmatpush1.bf16.msra.mxu1 %v7185_v47  ;;  %v7195_v58 = vld [vmem:[#allocation38_spill] sm:$0xff]  ;;  %v7196_v47 = vld [vmem:[#allocation39_spill] sm:$0xff] }
 0x4f0   :  { %4122 = vmatprep.subr.bf16.mxu0 %v7186_v24  ;;  %4186 = vmatprep.subr.bf16.mxu1 %v7187_v42  ;;  %v7197_v24 = vld [vmem:[#allocation40_spill] sm:$0xff]  ;;  %v7198_v42 = vld [vmem:[#allocation41_spill] sm:$0xff] }
 0x4f3   :  { %4124 = vmatpush1.bf16.msra.mxu0 %v7188_v14  ;;  %4188 = vmatpush1.bf16.msra.mxu1 %v7189_v32  ;;  %v7199_v14 = vld [vmem:[#allocation42_spill] sm:$0xff]  ;;  %v7200_v32 = vld [vmem:[#allocation43_spill] sm:$0xff] }
 0x4f4   :  { %4126 = vmatprep.subr.bf16.mxu0 %v7190_v21  ;;  %4190 = vmatprep.subr.bf16.mxu1 %v7191_v28  ;;  %v7201_v21 = vld [vmem:[#allocation44_spill] sm:$0xff]  ;;  %v7202_v28 = vld [vmem:[#allocation45_spill] sm:$0xff] }
 0x4f7   :  { %4128 = vmatpush1.bf16.msra.mxu0 %v7192_v45  ;;  %4192 = vmatpush1.bf16.msra.mxu1 %v7193_v4  ;;  %v7203_v45 = vld [vmem:[#allocation46_spill] sm:$0xff]  ;;  %v7204_v4 = vld [vmem:[#allocation47_spill] sm:$0xff] }
 0x4f8   :  { %4130 = vmatprep.subr.bf16.mxu0 %v7194_v61  ;;  %4194 = vmatprep.subr.bf16.mxu1 %v7195_v58  ;;  %v7205_v61 = vld [vmem:[#allocation48_spill] sm:$0xff]  ;;  %v7206_v58 = vld [vmem:[#allocation49_spill] sm:$0xff] }
 0x4fb   :  { %4132 = vmatpush1.bf16.msra.mxu0 %v7196_v47  ;;  %4196 = vmatpush1.bf16.msra.mxu1 %v7197_v24  ;;  %v7207_v47 = vld [vmem:[#allocation50_spill] sm:$0xff]  ;;  %v7208_v24 = vld [vmem:[#allocation51_spill] sm:$0xff] }
 0x4fc   :  { %4134 = vmatprep.subr.bf16.mxu0 %v7198_v42  ;;  %4198 = vmatprep.subr.bf16.mxu1 %v7199_v14  ;;  %v7209_v42 = vld [vmem:[#allocation52_spill] sm:$0xff]  ;;  %v7210_v14 = vld [vmem:[#allocation53_spill] sm:$0xff] }
 0x4ff   :  { %4136 = vmatpush1.bf16.msra.mxu0 %v7200_v32  ;;  %4200 = vmatpush1.bf16.msra.mxu1 %v7201_v21  ;;  %v7211_v32 = vld [vmem:[#allocation54_spill] sm:$0xff]  ;;  %v7212_v21 = vld [vmem:[#allocation55_spill] sm:$0xff] }
 0x500   :  { %4138 = vmatprep.subr.bf16.mxu0 %v7202_v28  ;;  %4202 = vmatprep.subr.bf16.mxu1 %v7203_v45  ;;  %v7213_v28 = vld [vmem:[#allocation56_spill] sm:$0xff]  ;;  %v7214_v45 = vld [vmem:[#allocation3_spill] sm:$0xff] }
 0x503   :  { %4140 = vmatpush1.bf16.msra.mxu0 %v7204_v4  ;;  %4204 = vmatpush1.bf16.msra.mxu1 %v7205_v61  ;;  %v7215_v4 = vld [vmem:[#allocation4_spill] sm:$0xff] }
 0x504   :  { %4142 = vmatprep.subr.bf16.mxu0 %v7206_v58  ;;  %4206 = vmatprep.subr.bf16.mxu1 %v7207_v47 }
 0x507   :  { %4144 = vmatpush1.bf16.msra.mxu0 %v7208_v24  ;;  %4208 = vmatpush1.bf16.msra.mxu1 %v7209_v42 }
 0x508   :  { %4146 = vmatprep.subr.bf16.mxu0 %v7210_v14  ;;  %4210 = vmatprep.subr.bf16.mxu1 %v7211_v32  ;;  %v7217_v32 = vld [vmem:[#allocation59_spill] sm:$0xff] }
 0x50b   :  { %4148 = vmatpush1.bf16.msra.mxu0 %v7212_v21  ;;  %4212 = vmatpush1.bf16.msra.mxu1 %v7213_v28 }
 0x50c   :  { %4214 = vmatprep.subr.bf16.mxu0 %v7214_v45  ;;  %4246 = vmatprep.subr.bf16.mxu1 %v7215_v4 }
 0x581   :  { %v1550_v61 = vpop.f32.mrb[14].mxu0  ;;  %v1621_v58 = vpop.f32.mrb[14].mxu1 }
 0x582   :  { %v1551_v47 = vadd.f32 %v1550_v61, %v7216_v59  ;;  %v1552_v5 = vpop.f32.mrb[15].mxu0  ;;  %v1623_v24 = vpop.f32.mrb[15].mxu1  ;;  %v1622_v21 = vadd.f32 %v1621_v58, %v7217_v32 }
 0x583   :  { %v1553_v42 = vadd.f32 %v1552_v5, %v6038_v3  ;;  %v1624_v28 = vadd.f32 %v1623_v24, %v6046_v48 }
 0x584   :  { %v3177_v15 = vmul.f32 -1.442695, %v1551_v47  ;;  %v3179_v6 = vmul.f32 -1.442695, %v1622_v21 }
 0x585   :  { %v3178_v14 = vmul.f32 -1.442695, %v1553_v42 }
 0x586   :  { %4897 = vpow2.f32 %v3177_v15 }
 0x587   :  { %4899 = vpow2.f32 %v3178_v14 }
 0x588   :  { %4901 = vtanh.f32 %v1624_v28 }
 0x589   :  { %4903 = vpow2.f32 %v3179_v6 }
 0x590   :  { %v4898_v45 = vpop.eup %4897 }
 0x591   :  { %v1635_v62 = vadd.f32 1.0, %v4898_v45  ;;  %v4900_v4 = vpop.eup %4899 }
 0x592   :  { %v1636_v61 = vadd.f32 1.0, %v4900_v4  ;;  %v4902_v59 = vpop.eup %4901 }
 0x593   :  { %4905 = vrcp.f32 %v1635_v62  ;;  %v4904_v29 = vpop.eup %4903  ;;  %v7218_v62 = vld [vmem:[#allocation58_spill] sm:$0xff] }
 0x594   :  { %4907 = vrcp.f32 %v1636_v61  ;;  %v1637_v15 = vadd.f32 1.0, %v4904_v29  ;;  %v3180_v29 = vld [vmem:[%s6809_s0 + $0x20] sm:$0xff] }
 0x596   :  { %4909 = vrcp.f32 %v1637_v15 }
 0x59d   :  { %v4906_v5 = vpop.eup %4905 }
 0x59e   :  { %v1646_v47 = vmul.f32 %v4906_v5, %v4902_v59  ;;  %v4908_v42 = vpop.eup %4907 }
 0x59f   :  { %v1645_v14 = vmul.f32 %v4908_v42, %v6280_v2 }
 0x5a1   :  { %v1718_v58 = vpop.f32.mrb[16].mxu0  ;;  %v1789_v32 = vpop.f32.mrb[16].mxu1  ;;  %v6395_v24 = vadd.f32 %v1646_v47, %v1645_v14 }
 0x5a2   :  { %v1720_v21 = vpop.f32.mrb[17].mxu0  ;;  %v1791_v45 = vpop.f32.mrb[17].mxu1 }
 0x5a3   :  { %v1798_v28 = vcombine.low %v1718_v58, %v1720_v21  ;;  %v1799_v6 = vcombine.low %v1789_v32, %v1791_v45  ;;  %4911 = vtanh.f32 %v6395_v24  ;;  %v4910_v47 = vpop.eup %4909 }
 0x5a5   :  { %v1806_v4 = vrot.slane %v1798_v28, %v7218_v62  ;;  %v1813_v61 = vrot.slane %v1799_v6, %v7218_v62 }
 0x5a7   :  { %v1814_v2 = vcombine.low %v1806_v4, %v1813_v61 }
 0x5a9   :  { %v1816_v59 = vadd.f32 %v3180_v29, %v1814_v2 }
 0x5ab   :  { %v3181_v5 = vmul.f32 -1.442695, %v1816_v59  ;;  %v1824_v58 = vrot.slane %v1816_v59, 6  ;;  %v7221_v59 = vld [vmem:[#allocation7_spill] sm:$0xff] }
 0x5ad   :  { %4913 = vpow2.f32 %v3181_v5  ;;  %v4912_v42 = vpop.eup %4911  ;;  %v7222_v5 = vld [vmem:[#allocation8_spill] sm:$0xff] }
 0x5ae   :  { %v1649_v14 = vmul.f32 %v4912_v42, %v4910_v47  ;;  %v7223_v47 = vld [vmem:[#allocation9_spill] sm:$0xff]  ;;  %v7224_v42 = vld [vmem:[#allocation10_spill] sm:$0xff] }
 0x5b0   :  { %1901 = vmatprep.mubr.f32.mxu0 %v1649_v14  ;;  %1972 = vmatprep.mubr.f32.mxu1 %v1649_v14  ;;  %v7225_v14 = vld [vmem:[#allocation11_spill] sm:$0xff] }
 0x5b7   :  { %v4914_v32 = vpop.eup %4913 }
 0x5b8   :  { %v1820_v15 = vadd.f32 1.0, %v4914_v32  ;;  %v7226_v32 = vld [vmem:[#allocation12_spill] sm:$0xff] }
 0x5ba   :  { %4915 = vrcp.f32 %v1820_v15  ;;  %v7227_v15 = vld [vmem:[#allocation13_spill] sm:$0xff] }
 0x5bb   :  { %4917 = vtanh.f32 %v1824_v58  ;;  %v7228_v58 = vld [vmem:[#allocation14_spill] sm:$0xff] }
 0x5c4   :  { %v4916_v21 = vpop.eup %4915 }
 0x5c5   :  { %v1828_v45 = vrot.slane %v4916_v21, 2  ;;  %v4918_v28 = vpop.eup %4917  ;;  %v1834_v61 = vrot.slane %v4916_v21, 4 }
 0x5c6   :  { %v1831_v6 = vmul.f32 %v4918_v28, %v4916_v21  ;;  %v7229_v21 = vld [vmem:[#allocation15_spill] sm:$0xff]  ;;  %v7231_v28 = vld [vmem:[#allocation17_spill] sm:$0xff] }
 0x5c7   :  { %v1830_v62 = vmul.f32 %v1828_v45, %v6289_v30  ;;  %v7219_v30 = vld [vmem:[#allocation5_spill] sm:$0xff]  ;;  %v7230_v45 = vld [vmem:[#allocation16_spill] sm:$0xff] }
 0x5c9   :  { %v6404_v4 = vadd.f32 %v1831_v6, %v1830_v62  ;;  %v7220_v62 = vld [vmem:[#allocation6_spill] sm:$0xff] }
 0x5ca   :  { %v7232_v6 = vld [vmem:[#allocation18_spill] sm:$0xff] }
 0x5cb   :  { %4919 = vtanh.f32 %v6404_v4 }
 0x5d5   :  { %v4920_v29 = vpop.eup %4919 }
 0x5d6   :  { %v1836_v2 = vmul.f32 %v4920_v29, %v1834_v61  ;;  %v7233_v61 = vld [vmem:[#allocation19_spill] sm:$0xff]  ;;  %v7234_v29 = vld [vmem:[#allocation20_spill] sm:$0xff] }
 0x5d8   :  { %1902 = vmatmul.mubr.f32.vlgmr.msra.gmra.mrb[18].mxu0 %v1836_v2  ;;  %1973 = vmatmul.mubr.f32.vlgmr.msra.gmra.mrb[18].mxu1 %v1836_v2 }
 0x5d9   :  { %4216 = vmatpush1.bf16.msra.mxu0 %v5072_v9  ;;  %4248 = vmatpush1.bf16.msra.mxu1 %v5084_v13 }
 0x5da   :  { %4218 = vmatprep.subr.bf16.mxu0 %v5097_v17  ;;  %4250 = vmatprep.subr.bf16.mxu1 %v5099_v18 }
 0x5db   :  { %2069 = vmatprep.mubr.f32.mxu0 %v6994_v8  ;;  %2140 = vmatprep.mubr.f32.mxu1 %v6994_v8 }
 0x5dd   :  { %4220 = vmatpush1.bf16.msra.mxu0 %v5111_v22  ;;  %4252 = vmatpush1.bf16.msra.mxu1 %v5124_v26 }
 0x5de   :  { %4222 = vmatprep.subr.bf16.mxu0 %v5126_v27  ;;  %4254 = vmatprep.subr.bf16.mxu1 %v5137_v31 }
 0x5e1   :  { %4224 = vmatpush1.bf16.msra.mxu0 %v5149_v35  ;;  %4256 = vmatpush1.bf16.msra.mxu1 %v5162_v39 }
 0x5e2   :  { %4226 = vmatprep.subr.bf16.mxu0 %v5164_v40  ;;  %4258 = vmatprep.subr.bf16.mxu1 %v5176_v44 }
 0x5e5   :  { %4228 = vmatpush1.bf16.msra.mxu0 %v5197_v51  ;;  %4260 = vmatpush1.bf16.msra.mxu1 %v5201_v52 }
 0x5e6   :  { %4230 = vmatprep.subr.bf16.mxu0 %v5203_v53  ;;  %4262 = vmatprep.subr.bf16.mxu1 %v5215_v57 }
 0x5e9   :  { %4232 = vmatpush1.bf16.msra.mxu0 %v5233_v63  ;;  %4264 = vmatpush1.bf16.msra.mxu1 %v5237_v0 }
 0x5ea   :  { %4234 = vmatprep.subr.bf16.mxu0 %v5239_v1  ;;  %4266 = vmatprep.subr.bf16.mxu1 %v5251_v7 }
 0x5ed   :  { %4236 = vmatpush1.bf16.msra.mxu0 %v5269_v16  ;;  %4268 = vmatpush1.bf16.msra.mxu1 %v5273_v19 }
 0x5ee   :  { %4238 = vmatprep.subr.bf16.mxu0 %v5275_v20  ;;  %4270 = vmatprep.subr.bf16.mxu1 %v5287_v25 }
 0x5f1   :  { %4240 = vmatpush1.bf16.msra.mxu0 %v5305_v34  ;;  %4272 = vmatpush1.bf16.msra.mxu1 %v5309_v36 }
 0x5f2   :  { %4242 = vmatprep.subr.bf16.mxu0 %v5311_v37  ;;  %4274 = vmatprep.subr.bf16.mxu1 %v5323_v43 }
 0x5f5   :  { %4244 = vmatpush1.bf16.msra.mxu0 %v5341_v50  ;;  %4276 = vmatpush1.bf16.msra.mxu1 %v5345_v54 }
 0x5f6   :  { %4278 = vmatprep.subr.bf16.mxu0 %v5347_v55  ;;  %4342 = vmatprep.subr.bf16.mxu1 %v5359_v60 }
 0x5f8   :  { %2070 = vmatmul.mubr.f32.vlgmr.msra.gmra.mrb[20].mxu0 %v1836_v2  ;;  %2141 = vmatmul.mubr.f32.vlgmr.msra.gmra.mrb[20].mxu1 %v1836_v2  ;;  %v7235_v2 = vld [vmem:[#allocation21_spill] sm:$0xff] }
 0x5f9   :  { %4280 = vmatpush1.bf16.msra.mxu0 %v5377_v10  ;;  %4344 = vmatpush1.bf16.msra.mxu1 %v5381_v11 }
 0x5fa   :  { %4282 = vmatprep.subr.bf16.mxu0 %v5383_v12  ;;  %4346 = vmatprep.subr.bf16.mxu1 %v5395_v23 }
 0x5fd   :  { %4284 = vmatpush1.bf16.msra.mxu0 %v5415_v33  ;;  %4348 = vmatpush1.bf16.msra.mxu1 %v5419_v38 }
 0x5fe   :  { %4286 = vmatprep.subr.bf16.mxu0 %v5421_v41  ;;  %4350 = vmatprep.subr.bf16.mxu1 %v5430_v46 }
 0x601   :  { %4288 = vmatpush1.bf16.msra.mxu0 %v5441_v49  ;;  %4352 = vmatpush1.bf16.msra.mxu1 %v5445_v56 }
 0x602   :  { %4290 = vmatprep.subr.bf16.mxu0 %v7219_v30  ;;  %4354 = vmatprep.subr.bf16.mxu1 %v7220_v62 }
 0x605   :  { %4292 = vmatpush1.bf16.msra.mxu0 %v7221_v59  ;;  %4356 = vmatpush1.bf16.msra.mxu1 %v7222_v5 }
 0x606   :  { %4294 = vmatprep.subr.bf16.mxu0 %v7223_v47  ;;  %4358 = vmatprep.subr.bf16.mxu1 %v7224_v42  ;;  %v7273_v42 = vld [vmem:[#allocation57_spill] sm:$0xff] }
 0x609   :  { %4296 = vmatpush1.bf16.msra.mxu0 %v7225_v14  ;;  %4360 = vmatpush1.bf16.msra.mxu1 %v7226_v32  ;;  %v7236_v14 = vld [vmem:[#allocation22_spill] sm:$0xff]  ;;  %v7237_v32 = vld [vmem:[#allocation23_spill] sm:$0xff] }
 0x60a   :  { %4298 = vmatprep.subr.bf16.mxu0 %v7227_v15  ;;  %4362 = vmatprep.subr.bf16.mxu1 %v7228_v58  ;;  %v7238_v15 = vld [vmem:[#allocation24_spill] sm:$0xff]  ;;  %v7239_v58 = vld [vmem:[#allocation25_spill] sm:$0xff] }
 0x60d   :  { %4300 = vmatpush1.bf16.msra.mxu0 %v7229_v21  ;;  %4364 = vmatpush1.bf16.msra.mxu1 %v7230_v45  ;;  %v7240_v21 = vld [vmem:[#allocation26_spill] sm:$0xff]  ;;  %v7241_v45 = vld [vmem:[#allocation27_spill] sm:$0xff] }
 0x60e   :  { %4302 = vmatprep.subr.bf16.mxu0 %v7231_v28  ;;  %4366 = vmatprep.subr.bf16.mxu1 %v7232_v6  ;;  %v7242_v28 = vld [vmem:[#allocation28_spill] sm:$0xff]  ;;  %v7243_v6 = vld [vmem:[#allocation29_spill] sm:$0xff] }
 0x611   :  { %4304 = vmatpush1.bf16.msra.mxu0 %v7233_v61  ;;  %4368 = vmatpush1.bf16.msra.mxu1 %v7234_v29  ;;  %v7244_v61 = vld [vmem:[#allocation30_spill] sm:$0xff]  ;;  %v7245_v29 = vld [vmem:[#allocation31_spill] sm:$0xff] }
 0x612   :  { %4306 = vmatprep.subr.bf16.mxu0 %v7235_v2  ;;  %4370 = vmatprep.subr.bf16.mxu1 %v7236_v14  ;;  %v7246_v2 = vld [vmem:[#allocation32_spill] sm:$0xff]  ;;  %v7247_v14 = vld [vmem:[#allocation33_spill] sm:$0xff] }
 0x615   :  { %4308 = vmatpush1.bf16.msra.mxu0 %v7237_v32  ;;  %4372 = vmatpush1.bf16.msra.mxu1 %v7238_v15  ;;  %v7248_v32 = vld [vmem:[#allocation34_spill] sm:$0xff]  ;;  %v7249_v15 = vld [vmem:[#allocation35_spill] sm:$0xff] }
 0x616   :  { %4310 = vmatprep.subr.bf16.mxu0 %v7239_v58  ;;  %4374 = vmatprep.subr.bf16.mxu1 %v7240_v21  ;;  %v7250_v58 = vld [vmem:[#allocation36_spill] sm:$0xff]  ;;  %v7251_v21 = vld [vmem:[#allocation37_spill] sm:$0xff] }
 0x619   :  { %4312 = vmatpush1.bf16.msra.mxu0 %v7241_v45  ;;  %4376 = vmatpush1.bf16.msra.mxu1 %v7242_v28  ;;  %v7252_v45 = vld [vmem:[#allocation38_spill] sm:$0xff]  ;;  %v7253_v28 = vld [vmem:[#allocation39_spill] sm:$0xff] }
 0x61a   :  { %4314 = vmatprep.subr.bf16.mxu0 %v7243_v6  ;;  %4378 = vmatprep.subr.bf16.mxu1 %v7244_v61  ;;  %v7254_v6 = vld [vmem:[#allocation40_spill] sm:$0xff]  ;;  %v7255_v61 = vld [vmem:[#allocation41_spill] sm:$0xff] }
 0x61d   :  { %4316 = vmatpush1.bf16.msra.mxu0 %v7245_v29  ;;  %4380 = vmatpush1.bf16.msra.mxu1 %v7246_v2  ;;  %v7256_v29 = vld [vmem:[#allocation42_spill] sm:$0xff]  ;;  %v7257_v2 = vld [vmem:[#allocation43_spill] sm:$0xff] }
 0x61e   :  { %4318 = vmatprep.subr.bf16.mxu0 %v7247_v14  ;;  %4382 = vmatprep.subr.bf16.mxu1 %v7248_v32  ;;  %v7258_v14 = vld [vmem:[#allocation44_spill] sm:$0xff]  ;;  %v7259_v32 = vld [vmem:[#allocation45_spill] sm:$0xff] }
 0x621   :  { %4320 = vmatpush1.bf16.msra.mxu0 %v7249_v15  ;;  %4384 = vmatpush1.bf16.msra.mxu1 %v7250_v58  ;;  %v7260_v15 = vld [vmem:[#allocation46_spill] sm:$0xff]  ;;  %v7261_v58 = vld [vmem:[#allocation47_spill] sm:$0xff] }
 0x622   :  { %4322 = vmatprep.subr.bf16.mxu0 %v7251_v21  ;;  %4386 = vmatprep.subr.bf16.mxu1 %v7252_v45  ;;  %v7262_v21 = vld [vmem:[#allocation48_spill] sm:$0xff]  ;;  %v7263_v45 = vld [vmem:[#allocation49_spill] sm:$0xff] }
 0x625   :  { %4324 = vmatpush1.bf16.msra.mxu0 %v7253_v28  ;;  %4388 = vmatpush1.bf16.msra.mxu1 %v7254_v6  ;;  %v7264_v28 = vld [vmem:[#allocation50_spill] sm:$0xff]  ;;  %v7265_v6 = vld [vmem:[#allocation51_spill] sm:$0xff] }
 0x626   :  { %4326 = vmatprep.subr.bf16.mxu0 %v7255_v61  ;;  %4390 = vmatprep.subr.bf16.mxu1 %v7256_v29  ;;  %v7266_v61 = vld [vmem:[#allocation52_spill] sm:$0xff]  ;;  %v7267_v29 = vld [vmem:[#allocation53_spill] sm:$0xff] }
 0x629   :  { %4328 = vmatpush1.bf16.msra.mxu0 %v7257_v2  ;;  %4392 = vmatpush1.bf16.msra.mxu1 %v7258_v14  ;;  %v7268_v2 = vld [vmem:[#allocation54_spill] sm:$0xff]  ;;  %v7269_v14 = vld [vmem:[#allocation55_spill] sm:$0xff] }
 0x62a   :  { %4330 = vmatprep.subr.bf16.mxu0 %v7259_v32  ;;  %4394 = vmatprep.subr.bf16.mxu1 %v7260_v15  ;;  %v7270_v32 = vld [vmem:[#allocation56_spill] sm:$0xff]  ;;  %v7271_v15 = vld [vmem:[#allocation3_spill] sm:$0xff] }
 0x62d   :  { %4332 = vmatpush1.bf16.msra.mxu0 %v7261_v58  ;;  %4396 = vmatpush1.bf16.msra.mxu1 %v7262_v21  ;;  %v7272_v58 = vld [vmem:[#allocation4_spill] sm:$0xff] }
 0x62e   :  { %4334 = vmatprep.subr.bf16.mxu0 %v7263_v45  ;;  %4398 = vmatprep.subr.bf16.mxu1 %v7264_v28 }
 0x631   :  { %4336 = vmatpush1.bf16.msra.mxu0 %v7265_v6  ;;  %4400 = vmatpush1.bf16.msra.mxu1 %v7266_v61 }
 0x632   :  { %4338 = vmatprep.subr.bf16.mxu0 %v7267_v29  ;;  %4402 = vmatprep.subr.bf16.mxu1 %v7268_v2  ;;  %v7274_v2 = vld [vmem:[#allocation59_spill] sm:$0xff] }
 0x635   :  { %4340 = vmatpush1.bf16.msra.mxu0 %v7269_v14  ;;  %4404 = vmatpush1.bf16.msra.mxu1 %v7270_v32 }
 0x636   :  { %4406 = vmatprep.subr.bf16.mxu0 %v7271_v15  ;;  %4438 = vmatprep.subr.bf16.mxu1 %v7272_v58 }
 0x6ab   :  { %v1903_v21 = vpop.f32.mrb[18].mxu0  ;;  %v1974_v45 = vpop.f32.mrb[18].mxu1 }
 0x6ac   :  { %v1904_v28 = vadd.f32 %v1903_v21, %v7273_v42  ;;  %v1905_v47 = vpop.f32.mrb[19].mxu0  ;;  %v1976_v6 = vpop.f32.mrb[19].mxu1  ;;  %v1975_v14 = vadd.f32 %v1974_v45, %v7274_v2 }
 0x6ad   :  { %v1906_v61 = vadd.f32 %v1905_v47, %v6038_v3  ;;  %v1977_v32 = vadd.f32 %v1976_v6, %v6046_v48 }
 0x6ae   :  { %v3182_v5 = vmul.f32 -1.442695, %v1904_v28  ;;  %v3184_v59 = vmul.f32 -1.442695, %v1975_v14 }
 0x6af   :  { %v3183_v29 = vmul.f32 -1.442695, %v1906_v61 }
 0x6b0   :  { %4921 = vpow2.f32 %v3182_v5 }
 0x6b1   :  { %4923 = vpow2.f32 %v3183_v29 }
 0x6b2   :  { %4925 = vtanh.f32 %v1977_v32 }
 0x6b3   :  { %4927 = vpow2.f32 %v3184_v59 }
 0x6ba   :  { %v4922_v15 = vpop.eup %4921 }
 0x6bb   :  { %v1988_v62 = vadd.f32 1.0, %v4922_v15  ;;  %v4924_v58 = vpop.eup %4923 }
 0x6bc   :  { %v1989_v21 = vadd.f32 1.0, %v4924_v58  ;;  %v4926_v42 = vpop.eup %4925 }
 0x6bd   :  { %4929 = vrcp.f32 %v1988_v62  ;;  %v4928_v30 = vpop.eup %4927  ;;  %v7275_v62 = vld [vmem:[#allocation58_spill] sm:$0xff] }
 0x6be   :  { %4931 = vrcp.f32 %v1989_v21  ;;  %v1990_v5 = vadd.f32 1.0, %v4928_v30  ;;  %v3185_v30 = vld [vmem:[%s6809_s0 + $0x28] sm:$0xff] }
 0x6c0   :  { %4933 = vrcp.f32 %v1990_v5 }
 0x6c7   :  { %v4930_v47 = vpop.eup %4929 }
 0x6c8   :  { %v1999_v28 = vmul.f32 %v4930_v47, %v4926_v42  ;;  %v4932_v61 = vpop.eup %4931 }
 0x6c9   :  { %v1998_v29 = vmul.f32 %v4932_v61, %v6395_v24 }
 0x6cb   :  { %v2071_v45 = vpop.f32.mrb[20].mxu0  ;;  %v2142_v2 = vpop.f32.mrb[20].mxu1  ;;  %v6510_v6 = vadd.f32 %v1999_v28, %v1998_v29 }
 0x6cc   :  { %v2073_v14 = vpop.f32.mrb[21].mxu0  ;;  %v2144_v15 = vpop.f32.mrb[21].mxu1 }
 0x6cd   :  { %v2151_v32 = vcombine.low %v2071_v45, %v2073_v14  ;;  %v2152_v59 = vcombine.low %v2142_v2, %v2144_v15  ;;  %4935 = vtanh.f32 %v6510_v6  ;;  %v4934_v28 = vpop.eup %4933 }
 0x6cf   :  { %v2159_v58 = vrot.slane %v2151_v32, %v7275_v62  ;;  %v2166_v21 = vrot.slane %v2152_v59, %v7275_v62 }
 0x6d1   :  { %v2167_v24 = vcombine.low %v2159_v58, %v2166_v21 }
 0x6d3   :  { %v2169_v42 = vadd.f32 %v3185_v30, %v2167_v24 }
 0x6d5   :  { %v3186_v47 = vmul.f32 -1.442695, %v2169_v42  ;;  %v2177_v45 = vrot.slane %v2169_v42, 6  ;;  %v7278_v42 = vld [vmem:[#allocation7_spill] sm:$0xff] }
 0x6d7   :  { %4937 = vpow2.f32 %v3186_v47  ;;  %v4936_v61 = vpop.eup %4935  ;;  %v7279_v47 = vld [vmem:[#allocation8_spill] sm:$0xff] }
 0x6d8   :  { %v2002_v29 = vmul.f32 %v4936_v61, %v4934_v28  ;;  %v7280_v28 = vld [vmem:[#allocation9_spill] sm:$0xff]  ;;  %v7281_v61 = vld [vmem:[#allocation10_spill] sm:$0xff] }
 0x6da   :  { %2254 = vmatprep.mubr.f32.mxu0 %v2002_v29  ;;  %2325 = vmatprep.mubr.f32.mxu1 %v2002_v29  ;;  %v7282_v29 = vld [vmem:[#allocation11_spill] sm:$0xff] }
 0x6e1   :  { %v4938_v2 = vpop.eup %4937 }
 0x6e2   :  { %v2173_v5 = vadd.f32 1.0, %v4938_v2  ;;  %v7283_v2 = vld [vmem:[#allocation12_spill] sm:$0xff] }
 0x6e4   :  { %4939 = vrcp.f32 %v2173_v5  ;;  %v7284_v5 = vld [vmem:[#allocation13_spill] sm:$0xff] }
 0x6e5   :  { %4941 = vtanh.f32 %v2177_v45  ;;  %v7285_v45 = vld [vmem:[#allocation14_spill] sm:$0xff] }
 0x6ee   :  { %v4940_v14 = vpop.eup %4939 }
 0x6ef   :  { %v2181_v15 = vrot.slane %v4940_v14, 2  ;;  %v4942_v32 = vpop.eup %4941  ;;  %v2187_v21 = vrot.slane %v4940_v14, 4 }
 0x6f0   :  { %v2184_v59 = vmul.f32 %v4942_v32, %v4940_v14  ;;  %v7286_v14 = vld [vmem:[#allocation15_spill] sm:$0xff]  ;;  %v7288_v32 = vld [vmem:[#allocation17_spill] sm:$0xff] }
 0x6f1   :  { %v2183_v62 = vmul.f32 %v2181_v15, %v6404_v4  ;;  %v7276_v4 = vld [vmem:[#allocation5_spill] sm:$0xff]  ;;  %v7287_v15 = vld [vmem:[#allocation16_spill] sm:$0xff] }
 0x6f3   :  { %v6519_v58 = vadd.f32 %v2184_v59, %v2183_v62  ;;  %v7277_v62 = vld [vmem:[#allocation6_spill] sm:$0xff] }
 0x6f4   :  { %v7289_v59 = vld [vmem:[#allocation18_spill] sm:$0xff] }
 0x6f5   :  { %4943 = vtanh.f32 %v6519_v58 }
 0x6ff   :  { %v4944_v30 = vpop.eup %4943 }
 0x700   :  { %v2189_v24 = vmul.f32 %v4944_v30, %v2187_v21  ;;  %v7290_v21 = vld [vmem:[#allocation19_spill] sm:$0xff]  ;;  %v7291_v30 = vld [vmem:[#allocation20_spill] sm:$0xff] }
 0x702   :  { %2255 = vmatmul.mubr.f32.vlgmr.msra.gmra.mrb[22].mxu0 %v2189_v24  ;;  %2326 = vmatmul.mubr.f32.vlgmr.msra.gmra.mrb[22].mxu1 %v2189_v24 }
 0x703   :  { %4408 = vmatpush1.bf16.msra.mxu0 %v5072_v9  ;;  %4440 = vmatpush1.bf16.msra.mxu1 %v5084_v13 }
 0x704   :  { %4410 = vmatprep.subr.bf16.mxu0 %v5097_v17  ;;  %4442 = vmatprep.subr.bf16.mxu1 %v5099_v18 }
 0x705   :  { %2422 = vmatprep.mubr.f32.mxu0 %v6994_v8  ;;  %2493 = vmatprep.mubr.f32.mxu1 %v6994_v8 }
 0x707   :  { %4412 = vmatpush1.bf16.msra.mxu0 %v5111_v22  ;;  %4444 = vmatpush1.bf16.msra.mxu1 %v5124_v26 }
 0x708   :  { %4414 = vmatprep.subr.bf16.mxu0 %v5126_v27  ;;  %4446 = vmatprep.subr.bf16.mxu1 %v5137_v31 }
 0x70b   :  { %4416 = vmatpush1.bf16.msra.mxu0 %v5149_v35  ;;  %4448 = vmatpush1.bf16.msra.mxu1 %v5162_v39 }
 0x70c   :  { %4418 = vmatprep.subr.bf16.mxu0 %v5164_v40  ;;  %4450 = vmatprep.subr.bf16.mxu1 %v5176_v44 }
 0x70f   :  { %4420 = vmatpush1.bf16.msra.mxu0 %v5197_v51  ;;  %4452 = vmatpush1.bf16.msra.mxu1 %v5201_v52 }
 0x710   :  { %4422 = vmatprep.subr.bf16.mxu0 %v5203_v53  ;;  %4454 = vmatprep.subr.bf16.mxu1 %v5215_v57 }
 0x713   :  { %4424 = vmatpush1.bf16.msra.mxu0 %v5233_v63  ;;  %4456 = vmatpush1.bf16.msra.mxu1 %v5237_v0 }
 0x714   :  { %4426 = vmatprep.subr.bf16.mxu0 %v5239_v1  ;;  %4458 = vmatprep.subr.bf16.mxu1 %v5251_v7 }
 0x717   :  { %4428 = vmatpush1.bf16.msra.mxu0 %v5269_v16  ;;  %4460 = vmatpush1.bf16.msra.mxu1 %v5273_v19 }
 0x718   :  { %4430 = vmatprep.subr.bf16.mxu0 %v5275_v20  ;;  %4462 = vmatprep.subr.bf16.mxu1 %v5287_v25 }
 0x71b   :  { %4432 = vmatpush1.bf16.msra.mxu0 %v5305_v34  ;;  %4464 = vmatpush1.bf16.msra.mxu1 %v5309_v36 }
 0x71c   :  { %4434 = vmatprep.subr.bf16.mxu0 %v5311_v37  ;;  %4466 = vmatprep.subr.bf16.mxu1 %v5323_v43 }
 0x71f   :  { %4436 = vmatpush1.bf16.msra.mxu0 %v5341_v50  ;;  %4468 = vmatpush1.bf16.msra.mxu1 %v5345_v54 }
 0x720   :  { %4470 = vmatprep.subr.bf16.mxu0 %v5347_v55  ;;  %4534 = vmatprep.subr.bf16.mxu1 %v5359_v60 }
 0x722   :  { %2423 = vmatmul.mubr.f32.vlgmr.msra.gmra.mrb[24].mxu0 %v2189_v24  ;;  %2494 = vmatmul.mubr.f32.vlgmr.msra.gmra.mrb[24].mxu1 %v2189_v24  ;;  %v7292_v24 = vld [vmem:[#allocation21_spill] sm:$0xff] }
 0x723   :  { %4472 = vmatpush1.bf16.msra.mxu0 %v5377_v10  ;;  %4536 = vmatpush1.bf16.msra.mxu1 %v5381_v11 }
 0x724   :  { %4474 = vmatprep.subr.bf16.mxu0 %v5383_v12  ;;  %4538 = vmatprep.subr.bf16.mxu1 %v5395_v23 }
 0x727   :  { %4476 = vmatpush1.bf16.msra.mxu0 %v5415_v33  ;;  %4540 = vmatpush1.bf16.msra.mxu1 %v5419_v38 }
 0x728   :  { %4478 = vmatprep.subr.bf16.mxu0 %v5421_v41  ;;  %4542 = vmatprep.subr.bf16.mxu1 %v5430_v46 }
 0x72b   :  { %4480 = vmatpush1.bf16.msra.mxu0 %v5441_v49  ;;  %4544 = vmatpush1.bf16.msra.mxu1 %v5445_v56 }
 0x72c   :  { %4482 = vmatprep.subr.bf16.mxu0 %v7276_v4  ;;  %4546 = vmatprep.subr.bf16.mxu1 %v7277_v62 }
 0x72f   :  { %4484 = vmatpush1.bf16.msra.mxu0 %v7278_v42  ;;  %4548 = vmatpush1.bf16.msra.mxu1 %v7279_v47 }
 0x730   :  { %4486 = vmatprep.subr.bf16.mxu0 %v7280_v28  ;;  %4550 = vmatprep.subr.bf16.mxu1 %v7281_v61  ;;  %v7330_v61 = vld [vmem:[#allocation57_spill] sm:$0xff] }
 0x733   :  { %4488 = vmatpush1.bf16.msra.mxu0 %v7282_v29  ;;  %4552 = vmatpush1.bf16.msra.mxu1 %v7283_v2  ;;  %v7293_v29 = vld [vmem:[#allocation22_spill] sm:$0xff]  ;;  %v7294_v2 = vld [vmem:[#allocation23_spill] sm:$0xff] }
 0x734   :  { %4490 = vmatprep.subr.bf16.mxu0 %v7284_v5  ;;  %4554 = vmatprep.subr.bf16.mxu1 %v7285_v45  ;;  %v7295_v5 = vld [vmem:[#allocation24_spill] sm:$0xff]  ;;  %v7296_v45 = vld [vmem:[#allocation25_spill] sm:$0xff] }
 0x737   :  { %4492 = vmatpush1.bf16.msra.mxu0 %v7286_v14  ;;  %4556 = vmatpush1.bf16.msra.mxu1 %v7287_v15  ;;  %v7297_v14 = vld [vmem:[#allocation26_spill] sm:$0xff]  ;;  %v7298_v15 = vld [vmem:[#allocation27_spill] sm:$0xff] }
 0x738   :  { %4494 = vmatprep.subr.bf16.mxu0 %v7288_v32  ;;  %4558 = vmatprep.subr.bf16.mxu1 %v7289_v59  ;;  %v7299_v32 = vld [vmem:[#allocation28_spill] sm:$0xff]  ;;  %v7300_v59 = vld [vmem:[#allocation29_spill] sm:$0xff] }
 0x73b   :  { %4496 = vmatpush1.bf16.msra.mxu0 %v7290_v21  ;;  %4560 = vmatpush1.bf16.msra.mxu1 %v7291_v30  ;;  %v7301_v21 = vld [vmem:[#allocation30_spill] sm:$0xff]  ;;  %v7302_v30 = vld [vmem:[#allocation31_spill] sm:$0xff] }
 0x73c   :  { %4498 = vmatprep.subr.bf16.mxu0 %v7292_v24  ;;  %4562 = vmatprep.subr.bf16.mxu1 %v7293_v29  ;;  %v7303_v24 = vld [vmem:[#allocation32_spill] sm:$0xff]  ;;  %v7304_v29 = vld [vmem:[#allocation33_spill] sm:$0xff] }
 0x73f   :  { %4500 = vmatpush1.bf16.msra.mxu0 %v7294_v2  ;;  %4564 = vmatpush1.bf16.msra.mxu1 %v7295_v5  ;;  %v7305_v2 = vld [vmem:[#allocation34_spill] sm:$0xff]  ;;  %v7306_v5 = vld [vmem:[#allocation35_spill] sm:$0xff] }
 0x740   :  { %4502 = vmatprep.subr.bf16.mxu0 %v7296_v45  ;;  %4566 = vmatprep.subr.bf16.mxu1 %v7297_v14  ;;  %v7307_v45 = vld [vmem:[#allocation36_spill] sm:$0xff]  ;;  %v7308_v14 = vld [vmem:[#allocation37_spill] sm:$0xff] }
 0x743   :  { %4504 = vmatpush1.bf16.msra.mxu0 %v7298_v15  ;;  %4568 = vmatpush1.bf16.msra.mxu1 %v7299_v32  ;;  %v7309_v15 = vld [vmem:[#allocation38_spill] sm:$0xff]  ;;  %v7310_v32 = vld [vmem:[#allocation39_spill] sm:$0xff] }
 0x744   :  { %4506 = vmatprep.subr.bf16.mxu0 %v7300_v59  ;;  %4570 = vmatprep.subr.bf16.mxu1 %v7301_v21  ;;  %v7311_v59 = vld [vmem:[#allocation40_spill] sm:$0xff]  ;;  %v7312_v21 = vld [vmem:[#allocation41_spill] sm:$0xff] }
 0x747   :  { %4508 = vmatpush1.bf16.msra.mxu0 %v7302_v30  ;;  %4572 = vmatpush1.bf16.msra.mxu1 %v7303_v24  ;;  %v7313_v30 = vld [vmem:[#allocation42_spill] sm:$0xff]  ;;  %v7314_v24 = vld [vmem:[#allocation43_spill] sm:$0xff] }
 0x748   :  { %4510 = vmatprep.subr.bf16.mxu0 %v7304_v29  ;;  %4574 = vmatprep.subr.bf16.mxu1 %v7305_v2  ;;  %v7315_v29 = vld [vmem:[#allocation44_spill] sm:$0xff]  ;;  %v7316_v2 = vld [vmem:[#allocation45_spill] sm:$0xff] }
 0x74b   :  { %4512 = vmatpush1.bf16.msra.mxu0 %v7306_v5  ;;  %4576 = vmatpush1.bf16.msra.mxu1 %v7307_v45  ;;  %v7317_v5 = vld [vmem:[#allocation46_spill] sm:$0xff]  ;;  %v7318_v45 = vld [vmem:[#allocation47_spill] sm:$0xff] }
 0x74c   :  { %4514 = vmatprep.subr.bf16.mxu0 %v7308_v14  ;;  %4578 = vmatprep.subr.bf16.mxu1 %v7309_v15  ;;  %v7319_v14 = vld [vmem:[#allocation48_spill] sm:$0xff]  ;;  %v7320_v15 = vld [vmem:[#allocation49_spill] sm:$0xff] }
 0x74f   :  { %4516 = vmatpush1.bf16.msra.mxu0 %v7310_v32  ;;  %4580 = vmatpush1.bf16.msra.mxu1 %v7311_v59  ;;  %v7321_v32 = vld [vmem:[#allocation50_spill] sm:$0xff]  ;;  %v7322_v59 = vld [vmem:[#allocation51_spill] sm:$0xff] }
 0x750   :  { %4518 = vmatprep.subr.bf16.mxu0 %v7312_v21  ;;  %4582 = vmatprep.subr.bf16.mxu1 %v7313_v30  ;;  %v7323_v21 = vld [vmem:[#allocation52_spill] sm:$0xff]  ;;  %v7324_v30 = vld [vmem:[#allocation53_spill] sm:$0xff] }
 0x753   :  { %4520 = vmatpush1.bf16.msra.mxu0 %v7314_v24  ;;  %4584 = vmatpush1.bf16.msra.mxu1 %v7315_v29  ;;  %v7325_v24 = vld [vmem:[#allocation54_spill] sm:$0xff]  ;;  %v7326_v29 = vld [vmem:[#allocation55_spill] sm:$0xff] }
 0x754   :  { %4522 = vmatprep.subr.bf16.mxu0 %v7316_v2  ;;  %4586 = vmatprep.subr.bf16.mxu1 %v7317_v5  ;;  %v7327_v2 = vld [vmem:[#allocation56_spill] sm:$0xff]  ;;  %v7328_v5 = vld [vmem:[#allocation3_spill] sm:$0xff] }
 0x757   :  { %4524 = vmatpush1.bf16.msra.mxu0 %v7318_v45  ;;  %4588 = vmatpush1.bf16.msra.mxu1 %v7319_v14  ;;  %v7329_v45 = vld [vmem:[#allocation4_spill] sm:$0xff] }
 0x758   :  { %4526 = vmatprep.subr.bf16.mxu0 %v7320_v15  ;;  %4590 = vmatprep.subr.bf16.mxu1 %v7321_v32 }
 0x75b   :  { %4528 = vmatpush1.bf16.msra.mxu0 %v7322_v59  ;;  %4592 = vmatpush1.bf16.msra.mxu1 %v7323_v21 }
 0x75c   :  { %4530 = vmatprep.subr.bf16.mxu0 %v7324_v30  ;;  %4594 = vmatprep.subr.bf16.mxu1 %v7325_v24  ;;  %v7331_v24 = vld [vmem:[#allocation59_spill] sm:$0xff] }
 0x75f   :  { %4532 = vmatpush1.bf16.msra.mxu0 %v7326_v29  ;;  %4596 = vmatpush1.bf16.msra.mxu1 %v7327_v2 }
 0x760   :  { %4598 = vmatprep.subr.bf16.mxu0 %v7328_v5  ;;  %4630 = vmatprep.subr.bf16.mxu1 %v7329_v45 }
 0x7d5   :  { %v2256_v14 = vpop.f32.mrb[22].mxu0  ;;  %v2327_v15 = vpop.f32.mrb[22].mxu1 }
 0x7d6   :  { %v2257_v32 = vadd.f32 %v2256_v14, %v7330_v61  ;;  %v2258_v28 = vpop.f32.mrb[23].mxu0  ;;  %v2329_v59 = vpop.f32.mrb[23].mxu1  ;;  %v2328_v29 = vadd.f32 %v2327_v15, %v7331_v24 }
 0x7d7   :  { %v2259_v21 = vadd.f32 %v2258_v28, %v6038_v3  ;;  %v2330_v2 = vadd.f32 %v2329_v59, %v6046_v48 }
 0x7d8   :  { %v3187_v47 = vmul.f32 -1.442695, %v2257_v32  ;;  %v3189_v42 = vmul.f32 -1.442695, %v2328_v29 }
 0x7d9   :  { %v3188_v30 = vmul.f32 -1.442695, %v2259_v21 }
 0x7da   :  { %4945 = vpow2.f32 %v3187_v47 }
 0x7db   :  { %4947 = vpow2.f32 %v3188_v30 }
 0x7dc   :  { %4949 = vtanh.f32 %v2330_v2 }
 0x7dd   :  { %4951 = vpow2.f32 %v3189_v42 }
 0x7e4   :  { %v4946_v5 = vpop.eup %4945 }
 0x7e5   :  { %v2341_v62 = vadd.f32 1.0, %v4946_v5  ;;  %v4948_v45 = vpop.eup %4947 }
 0x7e6   :  { %v2342_v14 = vadd.f32 1.0, %v4948_v45  ;;  %v4950_v61 = vpop.eup %4949 }
 0x7e7   :  { %4953 = vrcp.f32 %v2341_v62  ;;  %v4952_v4 = vpop.eup %4951  ;;  %v7332_v62 = vld [vmem:[#allocation58_spill] sm:$0xff] }
 0x7e8   :  { %4955 = vrcp.f32 %v2342_v14  ;;  %v2343_v47 = vadd.f32 1.0, %v4952_v4  ;;  %v3190_v4 = vld [vmem:[%s6809_s0 + $0x30] sm:$0xff] }
 0x7ea   :  { %4957 = vrcp.f32 %v2343_v47 }
 0x7f1   :  { %v4954_v28 = vpop.eup %4953 }
 0x7f2   :  { %v2352_v32 = vmul.f32 %v4954_v28, %v4950_v61  ;;  %v4956_v21 = vpop.eup %4955 }
 0x7f3   :  { %v2351_v30 = vmul.f32 %v4956_v21, %v6510_v6 }
 0x7f5   :  { %v2424_v15 = vpop.f32.mrb[24].mxu0  ;;  %v2495_v24 = vpop.f32.mrb[24].mxu1  ;;  %v6625_v59 = vadd.f32 %v2352_v32, %v2351_v30 }
 0x7f6   :  { %v2426_v29 = vpop.f32.mrb[25].mxu0  ;;  %v2497_v5 = vpop.f32.mrb[25].mxu1 }
 0x7f7   :  { %v2504_v2 = vcombine.low %v2424_v15, %v2426_v29  ;;  %v2505_v42 = vcombine.low %v2495_v24, %v2497_v5  ;;  %4959 = vtanh.f32 %v6625_v59  ;;  %v4958_v32 = vpop.eup %4957 }
 0x7f9   :  { %v2512_v45 = vrot.slane %v2504_v2, %v7332_v62  ;;  %v2519_v14 = vrot.slane %v2505_v42, %v7332_v62 }
 0x7fb   :  { %v2520_v6 = vcombine.low %v2512_v45, %v2519_v14 }
 0x7fd   :  { %v2522_v61 = vadd.f32 %v3190_v4, %v2520_v6 }
 0x7ff   :  { %v3191_v28 = vmul.f32 -1.442695, %v2522_v61  ;;  %v2530_v15 = vrot.slane %v2522_v61, 6  ;;  %v7377_v61 = vld [vmem:[#allocation49_spill] sm:$0xff] }
 0x801   :  { %4961 = vpow2.f32 %v3191_v28  ;;  %v4960_v21 = vpop.eup %4959  ;;  %v7378_v28 = vld [vmem:[#allocation50_spill] sm:$0xff] }
 0x802   :  { %v2355_v30 = vmul.f32 %v4960_v21, %v4958_v32  ;;  %v7379_v32 = vld [vmem:[#allocation51_spill] sm:$0xff]  ;;  %v7380_v21 = vld [vmem:[#allocation52_spill] sm:$0xff] }
 0x804   :  { %2607 = vmatprep.mubr.f32.mxu0 %v2355_v30  ;;  %2678 = vmatprep.mubr.f32.mxu1 %v2355_v30  ;;  %v7381_v30 = vld [vmem:[#allocation53_spill] sm:$0xff] }
 0x80b   :  { %v4962_v24 = vpop.eup %4961 }
 0x80c   :  { %v2526_v47 = vadd.f32 1.0, %v4962_v24  ;;  %v7382_v24 = vld [vmem:[#allocation54_spill] sm:$0xff] }
 0x80e   :  { %4963 = vrcp.f32 %v2526_v47  ;;  %v7383_v47 = vld [vmem:[#allocation55_spill] sm:$0xff] }
 0x80f   :  { %4965 = vtanh.f32 %v2530_v15  ;;  %v7384_v15 = vld [vmem:[#allocation56_spill] sm:$0xff] }
 0x818   :  { %v4964_v29 = vpop.eup %4963 }
 0x819   :  { %v2534_v5 = vrot.slane %v4964_v29, 2  ;;  %v4966_v2 = vpop.eup %4965  ;;  %v2540_v14 = vrot.slane %v4964_v29, 4 }
 0x81a   :  { %v2537_v42 = vmul.f32 %v4966_v2, %v4964_v29  ;;  %v7385_v2 = vld [vmem:[#allocation57_spill] sm:$0xff] }
 0x81b   :  { %v2536_v62 = vmul.f32 %v2534_v5, %v6519_v58  ;;  %v7375_v58 = vld [vmem:[#allocation47_spill] sm:$0xff] }
 0x81d   :  { %v6634_v45 = vadd.f32 %v2537_v42, %v2536_v62  ;;  %v7376_v62 = vld [vmem:[#allocation48_spill] sm:$0xff] }
 0x81f   :  { %4967 = vtanh.f32 %v6634_v45 }
 0x829   :  { %v4968_v4 = vpop.eup %4967 }
 0x82a   :  { %v2542_v6 = vmul.f32 %v4968_v4, %v2540_v14 }
 0x82c   :  { %2608 = vmatmul.mubr.f32.vlgmr.msra.gmra.mrb[26].mxu0 %v2542_v6  ;;  %2679 = vmatmul.mubr.f32.vlgmr.msra.gmra.mrb[26].mxu1 %v2542_v6 }
 0x82d   :  { %4600 = vmatpush1.bf16.msra.mxu0 %v5072_v9  ;;  %4632 = vmatpush1.bf16.msra.mxu1 %v5084_v13  ;;  %v7333_v9 = vld [vmem:[#allocation5_spill] sm:$0xff]  ;;  %v7334_v13 = vld [vmem:[#allocation6_spill] sm:$0xff] }
 0x82e   :  { %4602 = vmatprep.subr.bf16.mxu0 %v5097_v17  ;;  %4634 = vmatprep.subr.bf16.mxu1 %v5099_v18  ;;  %v7335_v17 = vld [vmem:[#allocation7_spill] sm:$0xff]  ;;  %v7336_v18 = vld [vmem:[#allocation8_spill] sm:$0xff] }
 0x82f   :  { %2775 = vmatprep.mubr.f32.mxu0 %v6994_v8  ;;  %2846 = vmatprep.mubr.f32.mxu1 %v6994_v8 }
 0x831   :  { %4604 = vmatpush1.bf16.msra.mxu0 %v5111_v22  ;;  %4636 = vmatpush1.bf16.msra.mxu1 %v5124_v26  ;;  %v7337_v22 = vld [vmem:[#allocation9_spill] sm:$0xff]  ;;  %v7338_v26 = vld [vmem:[#allocation10_spill] sm:$0xff] }
 0x832   :  { %4606 = vmatprep.subr.bf16.mxu0 %v5126_v27  ;;  %4638 = vmatprep.subr.bf16.mxu1 %v5137_v31  ;;  %v7339_v27 = vld [vmem:[#allocation11_spill] sm:$0xff]  ;;  %v7340_v31 = vld [vmem:[#allocation12_spill] sm:$0xff] }
 0x835   :  { %4608 = vmatpush1.bf16.msra.mxu0 %v5149_v35  ;;  %4640 = vmatpush1.bf16.msra.mxu1 %v5162_v39  ;;  %v7341_v35 = vld [vmem:[#allocation13_spill] sm:$0xff]  ;;  %v7342_v39 = vld [vmem:[#allocation14_spill] sm:$0xff] }
 0x836   :  { %4610 = vmatprep.subr.bf16.mxu0 %v5164_v40  ;;  %4642 = vmatprep.subr.bf16.mxu1 %v5176_v44  ;;  %v7343_v40 = vld [vmem:[#allocation15_spill] sm:$0xff]  ;;  %v7344_v44 = vld [vmem:[#allocation16_spill] sm:$0xff] }
 0x839   :  { %4612 = vmatpush1.bf16.msra.mxu0 %v5197_v51  ;;  %4644 = vmatpush1.bf16.msra.mxu1 %v5201_v52  ;;  %v7345_v51 = vld [vmem:[#allocation17_spill] sm:$0xff]  ;;  %v7346_v52 = vld [vmem:[#allocation18_spill] sm:$0xff] }
 0x83a   :  { %4614 = vmatprep.subr.bf16.mxu0 %v5203_v53  ;;  %4646 = vmatprep.subr.bf16.mxu1 %v5215_v57  ;;  %v7347_v53 = vld [vmem:[#allocation19_spill] sm:$0xff]  ;;  %v7348_v57 = vld [vmem:[#allocation20_spill] sm:$0xff] }
 0x83d   :  { %4616 = vmatpush1.bf16.msra.mxu0 %v5233_v63  ;;  %4648 = vmatpush1.bf16.msra.mxu1 %v5237_v0  ;;  %v7349_v63 = vld [vmem:[#allocation21_spill] sm:$0xff]  ;;  %v7350_v0 = vld [vmem:[#allocation22_spill] sm:$0xff] }
 0x83e   :  { %4618 = vmatprep.subr.bf16.mxu0 %v5239_v1  ;;  %4650 = vmatprep.subr.bf16.mxu1 %v5251_v7  ;;  %v7351_v1 = vld [vmem:[#allocation23_spill] sm:$0xff]  ;;  %v7352_v7 = vld [vmem:[#allocation24_spill] sm:$0xff] }
 0x841   :  { %4620 = vmatpush1.bf16.msra.mxu0 %v5269_v16  ;;  %4652 = vmatpush1.bf16.msra.mxu1 %v5273_v19  ;;  %v7353_v16 = vld [vmem:[#allocation25_spill] sm:$0xff]  ;;  %v7354_v19 = vld [vmem:[#allocation26_spill] sm:$0xff] }
 0x842   :  { %4622 = vmatprep.subr.bf16.mxu0 %v5275_v20  ;;  %4654 = vmatprep.subr.bf16.mxu1 %v5287_v25  ;;  %v7355_v20 = vld [vmem:[#allocation27_spill] sm:$0xff]  ;;  %v7356_v25 = vld [vmem:[#allocation28_spill] sm:$0xff] }
 0x845   :  { %4624 = vmatpush1.bf16.msra.mxu0 %v5305_v34  ;;  %4656 = vmatpush1.bf16.msra.mxu1 %v5309_v36  ;;  %v7357_v34 = vld [vmem:[#allocation29_spill] sm:$0xff]  ;;  %v7358_v36 = vld [vmem:[#allocation30_spill] sm:$0xff] }
 0x846   :  { %4626 = vmatprep.subr.bf16.mxu0 %v5311_v37  ;;  %4658 = vmatprep.subr.bf16.mxu1 %v5323_v43  ;;  %v7359_v37 = vld [vmem:[#allocation31_spill] sm:$0xff]  ;;  %v7360_v43 = vld [vmem:[#allocation32_spill] sm:$0xff] }
 0x849   :  { %4628 = vmatpush1.bf16.msra.mxu0 %v5341_v50  ;;  %4660 = vmatpush1.bf16.msra.mxu1 %v5345_v54  ;;  %v7361_v50 = vld [vmem:[#allocation33_spill] sm:$0xff]  ;;  %v7362_v54 = vld [vmem:[#allocation34_spill] sm:$0xff] }
 0x84a   :  { %4662 = vmatprep.subr.bf16.mxu0 %v5347_v55  ;;  %4726 = vmatprep.subr.bf16.mxu1 %v5359_v60  ;;  %v7363_v55 = vld [vmem:[#allocation35_spill] sm:$0xff]  ;;  %v7364_v60 = vld [vmem:[#allocation36_spill] sm:$0xff] }
 0x84c   :  { %2776 = vmatmul.mubr.f32.vlgmr.msra.gmra.mrb[28].mxu0 %v2542_v6  ;;  %2847 = vmatmul.mubr.f32.vlgmr.msra.gmra.mrb[28].mxu1 %v2542_v6 }
 0x84d   :  { %4664 = vmatpush1.bf16.msra.mxu0 %v5377_v10  ;;  %4728 = vmatpush1.bf16.msra.mxu1 %v5381_v11  ;;  %v7365_v10 = vld [vmem:[#allocation37_spill] sm:$0xff]  ;;  %v7366_v11 = vld [vmem:[#allocation38_spill] sm:$0xff] }
 0x84e   :  { %4666 = vmatprep.subr.bf16.mxu0 %v5383_v12  ;;  %4730 = vmatprep.subr.bf16.mxu1 %v5395_v23  ;;  %v7367_v12 = vld [vmem:[#allocation39_spill] sm:$0xff]  ;;  %v7368_v23 = vld [vmem:[#allocation40_spill] sm:$0xff] }
 0x851   :  { %4668 = vmatpush1.bf16.msra.mxu0 %v5415_v33  ;;  %4732 = vmatpush1.bf16.msra.mxu1 %v5419_v38  ;;  %v7369_v33 = vld [vmem:[#allocation41_spill] sm:$0xff]  ;;  %v7370_v38 = vld [vmem:[#allocation42_spill] sm:$0xff] }
 0x852   :  { %4670 = vmatprep.subr.bf16.mxu0 %v5421_v41  ;;  %4734 = vmatprep.subr.bf16.mxu1 %v5430_v46  ;;  %v7371_v41 = vld [vmem:[#allocation43_spill] sm:$0xff]  ;;  %v7372_v46 = vld [vmem:[#allocation44_spill] sm:$0xff] }
 0x855   :  { %4672 = vmatpush1.bf16.msra.mxu0 %v5441_v49  ;;  %4736 = vmatpush1.bf16.msra.mxu1 %v5445_v56  ;;  %v7373_v49 = vld [vmem:[#allocation45_spill] sm:$0xff]  ;;  %v7374_v56 = vld [vmem:[#allocation46_spill] sm:$0xff] }
 0x856   :  { %4674 = vmatprep.subr.bf16.mxu0 %v7333_v9  ;;  %4738 = vmatprep.subr.bf16.mxu1 %v7334_v13 }
 0x859   :  { %4676 = vmatpush1.bf16.msra.mxu0 %v7335_v17  ;;  %4740 = vmatpush1.bf16.msra.mxu1 %v7336_v18  ;;  %v7386_v17 = vld [vmem:[#allocation59_spill] sm:$0xff] }
 0x85a   :  { %4678 = vmatprep.subr.bf16.mxu0 %v7337_v22  ;;  %4742 = vmatprep.subr.bf16.mxu1 %v7338_v26 }
 0x85d   :  { %4680 = vmatpush1.bf16.msra.mxu0 %v7339_v27  ;;  %4744 = vmatpush1.bf16.msra.mxu1 %v7340_v31 }
 0x85e   :  { %4682 = vmatprep.subr.bf16.mxu0 %v7341_v35  ;;  %4746 = vmatprep.subr.bf16.mxu1 %v7342_v39 }
 0x861   :  { %4684 = vmatpush1.bf16.msra.mxu0 %v7343_v40  ;;  %4748 = vmatpush1.bf16.msra.mxu1 %v7344_v44 }
 0x862   :  { %4686 = vmatprep.subr.bf16.mxu0 %v7345_v51  ;;  %4750 = vmatprep.subr.bf16.mxu1 %v7346_v52 }
 0x865   :  { %4688 = vmatpush1.bf16.msra.mxu0 %v7347_v53  ;;  %4752 = vmatpush1.bf16.msra.mxu1 %v7348_v57 }
 0x866   :  { %4690 = vmatprep.subr.bf16.mxu0 %v7349_v63  ;;  %4754 = vmatprep.subr.bf16.mxu1 %v7350_v0 }
 0x869   :  { %4692 = vmatpush1.bf16.msra.mxu0 %v7351_v1  ;;  %4756 = vmatpush1.bf16.msra.mxu1 %v7352_v7 }
 0x86a   :  { %4694 = vmatprep.subr.bf16.mxu0 %v7353_v16  ;;  %4758 = vmatprep.subr.bf16.mxu1 %v7354_v19 }
 0x86d   :  { %4696 = vmatpush1.bf16.msra.mxu0 %v7355_v20  ;;  %4760 = vmatpush1.bf16.msra.mxu1 %v7356_v25 }
 0x86e   :  { %4698 = vmatprep.subr.bf16.mxu0 %v7357_v34  ;;  %4762 = vmatprep.subr.bf16.mxu1 %v7358_v36  ;;  %v7387_v34 = vld [vmem:[#allocation58_spill] sm:$0xff] }
 0x871   :  { %4700 = vmatpush1.bf16.msra.mxu0 %v7359_v37  ;;  %4764 = vmatpush1.bf16.msra.mxu1 %v7360_v43  ;;  %v3195_v43 = vld [vmem:[%s6809_s0 + $0x38] sm:$0xff] }
 0x872   :  { %4702 = vmatprep.subr.bf16.mxu0 %v7361_v50  ;;  %4766 = vmatprep.subr.bf16.mxu1 %v7362_v54 }
 0x875   :  { %4704 = vmatpush1.bf16.msra.mxu0 %v7363_v55  ;;  %4768 = vmatpush1.bf16.msra.mxu1 %v7364_v60 }
 0x876   :  { %4706 = vmatprep.subr.bf16.mxu0 %v7365_v10  ;;  %4770 = vmatprep.subr.bf16.mxu1 %v7366_v11 }
 0x879   :  { %4708 = vmatpush1.bf16.msra.mxu0 %v7367_v12  ;;  %4772 = vmatpush1.bf16.msra.mxu1 %v7368_v23 }
 0x87a   :  { %4710 = vmatprep.subr.bf16.mxu0 %v7369_v33  ;;  %4774 = vmatprep.subr.bf16.mxu1 %v7370_v38 }
 0x87d   :  { %4712 = vmatpush1.bf16.msra.mxu0 %v7371_v41  ;;  %4776 = vmatpush1.bf16.msra.mxu1 %v7372_v46 }
 0x87e   :  { %4714 = vmatprep.subr.bf16.mxu0 %v7373_v49  ;;  %4778 = vmatprep.subr.bf16.mxu1 %v7374_v56 }
 0x881   :  { %4716 = vmatpush1.bf16.msra.mxu0 %v7375_v58  ;;  %4780 = vmatpush1.bf16.msra.mxu1 %v7376_v62 }
 0x882   :  { %4718 = vmatprep.subr.bf16.mxu0 %v7377_v61  ;;  %4782 = vmatprep.subr.bf16.mxu1 %v7378_v28  ;;  %v3062_v28 = vld [vmem:[%s6811_s4] sm:$0xff] }
 0x885   :  { %4720 = vmatpush1.bf16.msra.mxu0 %v7379_v32  ;;  %4784 = vmatpush1.bf16.msra.mxu1 %v7380_v21  ;;  %v3063_v32 = vld [vmem:[%s6811_s4 + $0x8] sm:$0xff] }
 0x886   :  { %4722 = vmatprep.subr.bf16.mxu0 %v7381_v30  ;;  %4786 = vmatprep.subr.bf16.mxu1 %v7382_v24  ;;  %v4790_v21 = vpack.c.bf16 %v3063_v32, %v3062_v28  ;;  %v5011_v30 = vmov 0.0|0.0   ;;  %v3065_v24 = vld [vmem:[%s6811_s4 + $0x18] sm:$0xff] }
 0x889   :  { %4724 = vmatpush1.bf16.msra.mxu0 %v7383_v47  ;;  %4788 = vmatpush1.bf16.msra.mxu1 %v7384_v15  ;;  %v3066_v15 = vld [vmem:[%s6811_s4 + $0x20] sm:$0xff] }
 0x88a   :  { %4789 = vmatprep.subr.bf16.mxu0 %v5011_v30 }
 0x8ff   :  { %v2609_v29 = vpop.f32.mrb[26].mxu0  ;;  %v2680_v5 = vpop.f32.mrb[26].mxu1 }
 0x900   :  { %v2610_v42 = vadd.f32 %v2609_v29, %v7385_v2  ;;  %v2611_v14 = vpop.f32.mrb[27].mxu0  ;;  %v2682_v4 = vpop.f32.mrb[27].mxu1  ;;  %v2681_v18 = vadd.f32 %v2680_v5, %v7386_v17  ;;  %v3067_v29 = vld [vmem:[%s6811_s4 + $0x28] sm:$0xff] }
 0x901   :  { %v2612_v6 = vadd.f32 %v2611_v14, %v6038_v3  ;;  %v2683_v22 = vadd.f32 %v2682_v4, %v6046_v48  ;;  %v4796_v5 = vpack.c.bf16 %v3067_v29, %v3066_v15  ;;  %v3069_v14 = vld [vmem:[%s6811_s4 + $0x38] sm:$0xff] }
 0x902   :  { %v3192_v9 = vmul.f32 -1.442695, %v2610_v42  ;;  %v3194_v26 = vmul.f32 -1.442695, %v2681_v18  ;;  %v3068_v42 = vld [vmem:[%s6811_s4 + $0x30] sm:$0xff] }
 0x903   :  { %v3193_v13 = vmul.f32 -1.442695, %v2612_v6  ;;  %v4799_v4 = vpack.c.bf16 %v3069_v14, %v3068_v42  ;;  %v3070_v6 = vld [vmem:[%s6811_s4 + $0x40] sm:$0xff]  ;;  %v3072_v18 = vld [vmem:[%s6811_s4 + $0x50] sm:$0xff] }
 0x904   :  { %4969 = vpow2.f32 %v3192_v9  ;;  %v3071_v9 = vld [vmem:[%s6811_s4 + $0x48] sm:$0xff] }
 0x905   :  { %4971 = vpow2.f32 %v3193_v13  ;;  %v4802_v13 = vpack.c.bf16 %v3071_v9, %v3070_v6 }
 0x906   :  { %4973 = vtanh.f32 %v2683_v22  ;;  %v3073_v22 = vld [vmem:[%s6811_s4 + $0x58] sm:$0xff] }
 0x907   :  { %4975 = vpow2.f32 %v3194_v26  ;;  %v4805_v26 = vpack.c.bf16 %v3073_v22, %v3072_v18 }
 0x90e   :  { %v4970_v27 = vpop.eup %4969 }
 0x90f   :  { %v2694_v31 = vadd.f32 1.0, %v4970_v27  ;;  %v4972_v35 = vpop.eup %4971  ;;  %v3074_v27 = vld [vmem:[%s6811_s4 + $0x60] sm:$0xff] }
 0x910   :  { %v2695_v39 = vadd.f32 1.0, %v4972_v35  ;;  %v4974_v40 = vpop.eup %4973 }
 0x911   :  { %4977 = vrcp.f32 %v2694_v31  ;;  %v4976_v44 = vpop.eup %4975  ;;  %v3075_v31 = vld [vmem:[%s6811_s4 + $0x68] sm:$0xff] }
 0x912   :  { %4979 = vrcp.f32 %v2695_v39  ;;  %v2696_v57 = vadd.f32 1.0, %v4976_v44  ;;  %v4808_v35 = vpack.c.bf16 %v3075_v31, %v3074_v27  ;;  %v3076_v39 = vld [vmem:[%s6811_s4 + $0x70] sm:$0xff] }
 0x914   :  { %4981 = vrcp.f32 %v2696_v57 }
 0x91b   :  { %v4978_v51 = vpop.eup %4977 }
 0x91c   :  { %v2705_v52 = vmul.f32 %v4978_v51, %v4974_v40  ;;  %v4980_v53 = vpop.eup %4979  ;;  %v3077_v40 = vld [vmem:[%s6811_s4 + $0x78] sm:$0xff]  ;;  %v11_v51 = vstv %s6812_s5 }
 0x91d   :  { %v2704_v63 = vmul.f32 %v4980_v53, %v6625_v59  ;;  %v4811_v44 = vpack.c.bf16 %v3077_v40, %v3076_v39  ;;  %12 = vst [vmem:[#allocation2] sm:$0x1] %v11_v51 }
 0x91e   :  { %v4982_v55 = vpop.eup %4981 }
 0x91f   :  { %v2777_v0 = vpop.f32.mrb[28].mxu0  ;;  %v2848_v1 = vpop.f32.mrb[28].mxu1  ;;  %v6738_v7 = vadd.f32 %v2705_v52, %v2704_v63 }
 0x920   :  { %v2779_v16 = vpop.f32.mrb[29].mxu0  ;;  %v2850_v19 = vpop.f32.mrb[29].mxu1 }
 0x921   :  { %v2857_v20 = vcombine.low %v2777_v0, %v2779_v16  ;;  %v2858_v25 = vcombine.low %v2848_v1, %v2850_v19  ;;  %4983 = vtanh.f32 %v6738_v7 }
 0x923   :  { %v2865_v36 = vrot.slane %v2857_v20, %v7387_v34  ;;  %v2872_v37 = vrot.slane %v2858_v25, %v7387_v34 }
 0x925   :  { %v2873_v59 = vcombine.low %v2865_v36, %v2872_v37 }
 0x927   :  { %v2875_v50 = vadd.f32 %v3195_v43, %v2873_v59 }
 0x929   :  { %v3196_v54 = vmul.f32 -1.442695, %v2875_v50  ;;  %v2883_v23 = vrot.slane %v2875_v50, 6 }
 0x92b   :  { %4985 = vpow2.f32 %v3196_v54  ;;  %v4984_v60 = vpop.eup %4983 }
 0x92c   :  { %v2708_v10 = vmul.f32 %v4984_v60, %v4982_v55 }
 0x92e   :  { %2960 = vmatprep.mubr.f32.mxu0 %v2708_v10  ;;  %3031 = vmatprep.mubr.f32.mxu1 %v2708_v10 }
 0x935   :  { %v4986_v11 = vpop.eup %4985 }
 0x936   :  { %v2879_v12 = vadd.f32 1.0, %v4986_v11 }
 0x938   :  { %4987 = vrcp.f32 %v2879_v12  ;;  %v3200_v12 = vld [vmem:[#allocation2] ss:$0 sm:$0xff] }
 0x939   :  { %4989 = vtanh.f32 %v2883_v23 }
 0x942   :  { %v4988_v33 = vpop.eup %4987 }
 0x943   :  { %v2887_v38 = vrot.slane %v4988_v33, 2  ;;  %v4990_v41 = vpop.eup %4989  ;;  %v2893_v58 = vrot.slane %v4988_v33, 4 }
 0x944   :  { %v2890_v46 = vmul.f32 %v4990_v41, %v4988_v33 }
 0x945   :  { %v2889_v49 = vmul.f32 %v2887_v38, %v6634_v45  ;;  %v3064_v45 = vld [vmem:[%s6811_s4 + $0x10] sm:$0xff] }
 0x946   :  { %v4793_v47 = vpack.c.bf16 %v3065_v24, %v3064_v45 }
 0x947   :  { %v2891_v56 = vadd.f32 %v2890_v46, %v2889_v49 }
 0x949   :  { %4991 = vtanh.f32 %v2891_v56 }
 0x953   :  { %v4992_v62 = vpop.eup %4991 }
 0x954   :  { %v2895_v61 = vmul.f32 %v4992_v62, %v2893_v58 }
 0x956   :  { %2961 = vmatmul.mubr.f32.vlgmr.msra.gmra.mrb[30].mxu0 %v2895_v61  ;;  %3032 = vmatmul.mubr.f32.vlgmr.msra.gmra.mrb[30].mxu1 %v2895_v61 }
 0x957   :  { %4791 = vmatpush3.bf16.msra.mxu0 %v4790_v21  ;;  %3250 = vmatprep.mubr.msk.f32.mxu0 %vm5012_vm0, %v6994_v8 }
 0x958   :  { %4792 = vmatprep.subr.bf16.mxu0 %v5011_v30 }
 0x95b   :  { %4794 = vmatpush3.bf16.msra.mxu0 %v4793_v47 }
 0x95c   :  { %4795 = vmatprep.subr.bf16.mxu0 %v5011_v30 }
 0x95f   :  { %4797 = vmatpush3.bf16.msra.mxu0 %v4796_v5 }
 0x960   :  { %4798 = vmatprep.subr.bf16.mxu0 %v5011_v30 }
 0x963   :  { %4800 = vmatpush3.bf16.msra.mxu0 %v4799_v4 }
 0x964   :  { %4801 = vmatprep.subr.bf16.mxu0 %v5011_v30 }
 0x967   :  { %4803 = vmatpush3.bf16.msra.mxu0 %v4802_v13 }
 0x968   :  { %4804 = vmatprep.subr.bf16.mxu0 %v5011_v30 }
 0x96b   :  { %4806 = vmatpush3.bf16.msra.mxu0 %v4805_v26 }
 0x96c   :  { %4807 = vmatprep.subr.bf16.mxu0 %v5011_v30 }
 0x96f   :  { %4809 = vmatpush3.bf16.msra.mxu0 %v4808_v35 }
 0x970   :  { %4810 = vmatprep.subr.bf16.mxu0 %v5011_v30 }
 0x973   :  { %4812 = vmatpush3.bf16.msra.mxu0 %v4811_v44 }
 0xa29   :  { %v2962_v8 = vpop.f32.mrb[30].mxu0  ;;  %v3033_v52 = vpop.f32.mrb[30].mxu1 }
 0xa2a   :  { %v2963_v53 = vadd.f32 %v2962_v8, %v7385_v2  ;;  %v2964_v57 = vpop.f32.mrb[31].mxu0  ;;  %v3035_v63 = vpop.f32.mrb[31].mxu1  ;;  %v3034_v19 = vadd.f32 %v3033_v52, %v7386_v17 }
 0xa2b   :  { %v2965_v0 = vadd.f32 %v2964_v57, %v6038_v3  ;;  %v3036_v20 = vadd.f32 %v3035_v63, %v6046_v48 }
 0xa2c   :  { %v3197_v1 = vmul.f32 -1.442695, %v2963_v53  ;;  %v3199_v25 = vmul.f32 -1.442695, %v3034_v19 }
 0xa2d   :  { %v3198_v16 = vmul.f32 -1.442695, %v2965_v0 }
 0xa2e   :  { %4993 = vpow2.f32 %v3197_v1 }
 0xa2f   :  { %4995 = vpow2.f32 %v3198_v16 }
 0xa30   :  { %4997 = vtanh.f32 %v3036_v20 }
 0xa31   :  { %4999 = vpow2.f32 %v3199_v25 }
 0xa38   :  { %v4994_v34 = vpop.eup %4993 }
 0xa39   :  { %v3047_v36 = vadd.f32 1.0, %v4994_v34  ;;  %v4996_v37 = vpop.eup %4995 }
 0xa3a   :  { %v3048_v2 = vadd.f32 1.0, %v4996_v37  ;;  %v4998_v43 = vpop.eup %4997 }
 0xa3b   :  { %5001 = vrcp.f32 %v3047_v36  ;;  %v5000_v59 = vpop.eup %4999 }
 0xa3c   :  { %5003 = vrcp.f32 %v3048_v2  ;;  %v3049_v55 = vadd.f32 1.0, %v5000_v59 }
 0xa3e   :  { %5005 = vrcp.f32 %v3049_v55 }
 0xa45   :  { %v5002_v3 = vpop.eup %5001 }
 0xa46   :  { %v3058_v50 = vmul.f32 %v5002_v3, %v4998_v43  ;;  %v5004_v54 = vpop.eup %5003 }
 0xa47   :  { %v3057_v60 = vmul.f32 %v5004_v54, %v6738_v7 }
 0xa48   :  { %v5006_v48 = vpop.eup %5005 }
 0xa49   :  { %v3059_v17 = vadd.f32 %v3058_v50, %v3057_v60 }
 0xa4b   :  { %5007 = vtanh.f32 %v3059_v17 }
 0xa55   :  { %v5008_v10 = vpop.eup %5007 }
 0xa56   :  { %v3061_v11 = vmul.f32 %v5008_v10, %v5006_v48 }
 0xa58   :  { %3251 = vmatmul.mubr.f32.vlgmr.msra.gmra.mrb[32].mxu0 %v3061_v11 }
 0xb2b   :  { %v3151_v23 = vpop.f32.mrb[32].mxu0 }
 0xb2c   :  { %v3152_v33 = vadd.f32 %v3200_v12, %v3151_v23  ;;  %v3252_v38 = vpop.f32.mrb[33].mxu0 }
 0xb2e   :  { %3156 = vst.msk [vmem:[%s6813_s6] sm:$0x3] %vm3155_vm1, %v3152_v33 }

</bundles_post_ra>
